<compile_context>
chip_gen: v7x
topology: tpu7x:2x2x1
jax: 0.10.0
libtpu: 0.0.40
codegen_flags: <defaults>
</compile_context>

<pallas_src>
import jax
import jax.numpy as jnp
from jax.experimental import pallas as pl
from jax.experimental.pallas import tpu as pltpu

# ----------------------------- config (small) --------------------------------
B = 2                                   # batch
IMG_C, IMG_HW = 3, 32                   # image channels / spatial
PATCH = 8
N_PATCH = (IMG_HW // PATCH) ** 2        # 16 image tokens
PATCH_DIM = IMG_C * PATCH * PATCH       # 192
T_TEXT = 8                              # text tokens
D = 128                                 # hidden size
H = 4                                   # attention heads
HD = D // H                             # 32
F = 256                                 # MLP hidden
V = 256                                 # vocab size
N_LAYERS = 2                            # tiny synthetic decoder stack
MAX_NEW_TOKENS = 4
S_MAX = 32                              # padded max sequence (24 prompt + 4 new <= 32)
BS = B * S_MAX                          # folded batch*seq rows
NEG_INF = -1e9
PARAM_DTYPE = jnp.bfloat16              # mirrors .to(torch.bfloat16)


# ------------------------------- fused decode kernel ---------------------------
def _fused_decode_kernel(lens0_ref,                                   # SMEM (B,) int32 (prefetch)
                         emb0_ref,                                    # (B, S_MAX, D) bf16
                         ln1s_ref, ln1b_ref, wqkv_ref, bqkv_ref, wo_ref, bo_ref,
                         ln2s_ref, ln2b_ref, w1_ref, b1_ref, w2_ref, b2_ref,
                         lmw_ref,                                     # (D, V)  bf16
                         emb_tbl_ref,                                 # (V, D)  bf16
                         tok_ref,                                     # (B, MAX_NEW_TOKENS) int32 out
                         buf_ref,                                     # VMEM (BS, D) f32  resident seq buffer
                         acc_ref,                                     # VMEM (BS, D) f32  residual stream
                         bias_ref,                                    # VMEM (BS, BS) f32 causal bias
                         ctx_ref,                                     # VMEM (BS, D) f32  per-head ctx staging
                         len_ref):                                    # SMEM (B,) int32   current lengths
    step = pl.program_id(0)
    layer = pl.program_id(1)
    last_layer = pl.num_programs(1) - 1

    # ---- one-time init on the very first grid iteration ----
    @pl.when((step == 0) & (layer == 0))
    def _():
        buf_ref[...] = emb0_ref[...].reshape(BS, D).astype(jnp.float32)
        tok_ref[...] = jnp.zeros_like(tok_ref)
        for b in range(B):
            len_ref[b] = lens0_ref[b]

    # ---- per-step init (layer 0 only): residual reload + causal/valid bias ----
    # Bias is a function of len only -> built ONCE per decode step, not per layer.
    @pl.when(layer == 0)
    def _():
        acc_ref[...] = buf_ref[...]
        row = jax.lax.broadcasted_iota(jnp.int32, (BS, BS), 0)
        col = jax.lax.broadcasted_iota(jnp.int32, (BS, BS), 1)
        bias = jnp.full((BS, BS), NEG_INF, jnp.float32)
        for b in range(B):
            lo = b * S_MAX
            in_q = (row >= lo) & (row < lo + S_MAX)
            in_k = (col >= lo) & (col < lo + S_MAX)
            ok = in_q & in_k & (row >= col) & (col < lo + len_ref[b])
            bias = jnp.where(ok, 0.0, bias)
        bias_ref[...] = bias

    x = acc_ref[...]                                                  # (BS, D) f32
    bias = bias_ref[...]                                              # (BS, BS) f32

    def layer_norm(h, scale, shift):
        mu = jnp.mean(h, axis=-1, keepdims=True)
        var = jnp.mean(jnp.square(h - mu), axis=-1, keepdims=True)
        return (h - mu) * jax.lax.rsqrt(var + 1e-5) * scale + shift

    # ---------------- self-attention (pre-LN) ----------------
    xn = layer_norm(x, ln1s_ref[layer].astype(jnp.float32),
                    ln1b_ref[layer].astype(jnp.float32)).astype(PARAM_DTYPE)
    qkv = jnp.dot(xn, wqkv_ref[layer], preferred_element_type=jnp.float32)
    qkv = qkv + bqkv_ref[layer].astype(jnp.float32)                   # (BS, 3D)
    q, k_, v = qkv[:, :D], qkv[:, D:2 * D], qkv[:, 2 * D:]
    attn_scale = 1.0 / (HD ** 0.5)

    # Per-head contexts are staged at static lane offsets in a VMEM scratch so the
    # output projection is ONE full-depth 128-contraction matmul (no 4x 32-deep
    # matmuls + f32 accumulation adds).
    for h in range(H):
        sl = slice(h * HD, (h + 1) * HD)
        qh = q[:, sl].astype(PARAM_DTYPE)
        kh = k_[:, sl].astype(PARAM_DTYPE)
        vh = v[:, sl].astype(PARAM_DTYPE)
        s = jax.lax.dot_general(qh, kh, (((1,), (1,)), ((), ())),
                                preferred_element_type=jnp.float32)   # (BS, BS)
        s = s * attn_scale + bias
        s = s - jnp.max(s, axis=-1, keepdims=True)
        p = jnp.exp(s)
        p = p / jnp.sum(p, axis=-1, keepdims=True)   # exact divide (greedy-argmax parity)
        ctx_ref[:, sl] = jnp.dot(p.astype(PARAM_DTYPE), vh,
                                 preferred_element_type=jnp.float32)  # (BS, HD)
    attn = jnp.dot(ctx_ref[...].astype(PARAM_DTYPE), wo_ref[layer],
                   preferred_element_type=jnp.float32)                # (BS, D)
    x = x + attn + bo_ref[layer].astype(jnp.float32)

    # ---------------- MLP (pre-LN) ----------------
    xn2 = layer_norm(x, ln2s_ref[layer].astype(jnp.float32),
                     ln2b_ref[layer].astype(jnp.float32)).astype(PARAM_DTYPE)
    hdn = jnp.dot(xn2, w1_ref[layer], preferred_element_type=jnp.float32)
    hdn = jax.nn.gelu(hdn + b1_ref[layer].astype(jnp.float32))
    hdn = jnp.dot(hdn.astype(PARAM_DTYPE), w2_ref[layer],
                  preferred_element_type=jnp.float32)
    x = x + hdn + b2_ref[layer].astype(jnp.float32)
    acc_ref[...] = x                                                  # carry to next layer

    # ---- last layer: fused LM head, greedy argmax, append new token ----
    @pl.when(layer == last_layer)
    def _():
        # Dynamic sublane slice of the last valid row per batch (SMEM index).
        rows = []
        for b in range(B):
            r = b * S_MAX + len_ref[b] - 1
            rows.append(acc_ref[pl.ds(r, 1), :])                      # (1, D)
        last = jnp.concatenate(rows, axis=0).astype(PARAM_DTYPE)      # (B, D)
        logits = jnp.dot(last, lmw_ref[...],
                         preferred_element_type=jnp.float32)          # (B, V) f32

        # Greedy argmax (first max index) built from max/min lane reductions.
        col_v = jax.lax.broadcasted_iota(jnp.int32, (B, V), 1)
        mx = jnp.max(logits, axis=-1, keepdims=True)
        nxt = jnp.min(jnp.where(logits == mx, col_v, V),
                      axis=-1, keepdims=True)                         # (B, 1) int32

        # Next-token embedding: one-hot(B,V) @ embed_table(V,D) on the MXU
        # (bit-exact row select; round through bf16 for parity with a bf16 buffer).
        oh = (col_v == nxt).astype(PARAM_DTYPE)
        new_emb = jnp.dot(oh, emb_tbl_ref[...],
                          preferred_element_type=jnp.float32)
        new_emb = new_emb.astype(PARAM_DTYPE).astype(jnp.float32)     # (B, D)

        # Append the new embedding row(s) into the resident sequence buffer.
        row_ids = jax.lax.broadcasted_iota(jnp.int32, (BS, 1), 0)
        bufv = buf_ref[...]
        for b in range(B):
            pos = b * S_MAX + len_ref[b]
            bufv = jnp.where(row_ids == pos, new_emb[b:b + 1, :], bufv)
        buf_ref[...] = bufv
        for b in range(B):
            len_ref[b] = len_ref[b] + 1

        # Record the generated token id for this decode step.
        col_t = jax.lax.broadcasted_iota(jnp.int32, (B, MAX_NEW_TOKENS), 1)
        tok_ref[...] = jnp.where(col_t == step, nxt, tok_ref[...])


def generate_fused(lens, emb0, stacked_layers, lm_head_w, embed_table):
    """One pallas_call running the entire greedy decode (all steps x all layers).

    lens:            (B,) int32 valid prompt lengths (scalar prefetch -> SMEM)
    emb0:            (B, S_MAX, D) bf16 zero-padded prompt embedding buffer
    stacked_layers:  12 arrays, each with a leading N_LAYERS axis (VMEM-resident)
    lm_head_w:       (D, V) bf16
    embed_table:     (V, D) bf16 (for in-kernel next-token embedding lookup)
    returns:         (B, MAX_NEW_TOKENS) int32 generated token ids
    """
    idx3 = lambda s, l, lens_ref: (0, 0, 0)
    idx2 = lambda s, l, lens_ref: (0, 0)
    grid_spec = pltpu.PrefetchScalarGridSpec(
        num_scalar_prefetch=1,
        grid=(MAX_NEW_TOKENS, N_LAYERS),
        in_specs=[pl.BlockSpec((B, S_MAX, D), idx3)]
                 + [pl.BlockSpec(w.shape, idx3) for w in stacked_layers]
                 + [pl.BlockSpec((D, V), idx2),
                    pl.BlockSpec((V, D), idx2)],
        out_specs=pl.BlockSpec((B, MAX_NEW_TOKENS), idx2),
        scratch_shapes=[
            pltpu.VMEM((BS, D), jnp.float32),       # buf: resident sequence embeddings
            pltpu.VMEM((BS, D), jnp.float32),       # acc: residual stream
            pltpu.VMEM((BS, BS), jnp.float32),      # bias: built once per step
            pltpu.VMEM((BS, D), jnp.float32),       # ctx: per-head context staging
            pltpu.SMEM((B,), jnp.int32),            # current lengths
        ],
    )
    return pl.pallas_call(
        _fused_decode_kernel,
        out_shape=jax.ShapeDtypeStruct((B, MAX_NEW_TOKENS), jnp.int32),
        grid_spec=grid_spec,
        compiler_params=pltpu.CompilerParams(
            dimension_semantics=("arbitrary", "arbitrary")),   # sequential VMEM carry
    )(lens, emb0, *stacked_layers, lm_head_w, embed_table)


# ------------------------------ parameters ------------------------------------
def init_params(key):
    ks = jax.random.split(key, 3 + N_LAYERS)

    def randw(k, shape, scale=0.02):
        return (scale * jax.random.normal(k, shape, jnp.float32)).astype(PARAM_DTYPE)

    params = {
        "patch_w": randw(ks[0], (PATCH_DIM, D)),      # vision patch projection
        "embed_table": randw(ks[1], (V, D)),          # token embedding
        "lm_head_w": randw(ks[2], (D, V)),            # LM head
    }
    per_layer = []
    for l in range(N_LAYERS):
        lk = jax.random.split(ks[3 + l], 4)
        per_layer.append((
            jnp.ones((1, D), PARAM_DTYPE),            # ln1 scale
            jnp.zeros((1, D), PARAM_DTYPE),           # ln1 bias
            randw(lk[0], (D, 3 * D)),                 # Wqkv
            jnp.zeros((1, 3 * D), PARAM_DTYPE),       # bqkv
            randw(lk[1], (D, D)),                     # Wo
            jnp.zeros((1, D), PARAM_DTYPE),           # bo
            jnp.ones((1, D), PARAM_DTYPE),            # ln2 scale
            jnp.zeros((1, D), PARAM_DTYPE),           # ln2 bias
            randw(lk[2], (D, F)),                     # W1
            jnp.zeros((1, F), PARAM_DTYPE),           # b1
            randw(lk[3], (F, D)),                     # W2
            jnp.zeros((1, D), PARAM_DTYPE),           # b2
        ))
    # Stack each of the 12 per-layer params on a leading N_LAYERS axis; the fused
    # kernel keeps the full stack VMEM-resident and indexes the layer in-kernel.
    params["layers_stacked"] = tuple(
        jnp.stack([layer[i] for layer in per_layer], axis=0) for i in range(12))
    return params


# --------------------------- forward-pass glue ---------------------------------
def prepare_inputs_embeds(images, input_ids, patch_w, embed_table):
    """images: (B, C, H, W) NCHW; input_ids: (B, T_TEXT)."""
    p = images.reshape(B, IMG_C, IMG_HW // PATCH, PATCH, IMG_HW // PATCH, PATCH)
    p = p.transpose(0, 2, 4, 1, 3, 5).reshape(B, N_PATCH, PATCH_DIM).astype(PARAM_DTYPE)
    # Patch projection + token-embedding gather stay in XLA (tiny; fuse with the
    # unfold/reshape — a standalone pallas_call would cost more than the compute).
    img_emb = jnp.dot(p, patch_w,
                      preferred_element_type=jnp.float32).astype(PARAM_DTYPE)
    txt_emb = jnp.take(embed_table, input_ids, axis=0)     # (B, T_TEXT, D)
    return jnp.concatenate([img_emb, txt_emb], axis=1)     # (B, N_PATCH+T_TEXT, D)


@jax.jit
def vlm_forward(images, input_ids, attention_mask, params):
    inputs_embeds = prepare_inputs_embeds(
        images, input_ids, params["patch_w"], params["embed_table"])
    prompt_len = inputs_embeds.shape[1]
    emb0 = jnp.zeros((B, S_MAX, D), PARAM_DTYPE)
    emb0 = emb0.at[:, :prompt_len, :].set(inputs_embeds.astype(PARAM_DTYPE))
    # TODO(synk): non-contiguous / left-padded attention masks are not modeled; the
    # in-kernel mask assumes valid keys are exactly positions [0, len_b).
    lens = attention_mask.astype(jnp.int32).sum(axis=1)     # (B,)
    # TODO(synk): do_sample / temperature / top_p sampling omitted; greedy decode.
    return generate_fused(lens, emb0, params["layers_stacked"],
                          params["lm_head_w"], params["embed_table"])


# ---------------------------------- main ---------------------------------------
if __name__ == "__main__":
    key = jax.random.PRNGKey(0)
    k_img, k_ids, k_param = jax.random.split(key, 3)

    images = jax.random.normal(k_img, (B, IMG_C, IMG_HW, IMG_HW), jnp.float32)
    input_ids = jax.random.randint(k_ids, (B, T_TEXT), 0, V)
    attention_mask = jnp.ones((B, N_PATCH + T_TEXT), jnp.int32)

    params = init_params(k_param)

    out_tokens = vlm_forward(images, input_ids, attention_mask, params)
    jax.block_until_ready(out_tokens)
    # TODO(synk): tokenizer.decode of generated ids has no Pallas equivalent.
    print("KERNEL_OK")
</pallas_src>

<mosaic_0001>
module attributes {stable_mosaic.version = 11 : i64} {
  func.func @_fused_decode_kernel(%arg0: i32, %arg1: i32, %arg2: memref<2xi32, #tpu.memory_space<smem>>, %arg3: memref<2x32x128xbf16, #tpu.memory_space<vmem>>, %arg4: memref<2x1x128xbf16, #tpu.memory_space<vmem>>, %arg5: memref<2x1x128xbf16, #tpu.memory_space<vmem>>, %arg6: memref<2x128x384xbf16, #tpu.memory_space<vmem>>, %arg7: memref<2x1x384xbf16, #tpu.memory_space<vmem>>, %arg8: memref<2x128x128xbf16, #tpu.memory_space<vmem>>, %arg9: memref<2x1x128xbf16, #tpu.memory_space<vmem>>, %arg10: memref<2x1x128xbf16, #tpu.memory_space<vmem>>, %arg11: memref<2x1x128xbf16, #tpu.memory_space<vmem>>, %arg12: memref<2x128x256xbf16, #tpu.memory_space<vmem>>, %arg13: memref<2x1x256xbf16, #tpu.memory_space<vmem>>, %arg14: memref<2x256x128xbf16, #tpu.memory_space<vmem>>, %arg15: memref<2x1x128xbf16, #tpu.memory_space<vmem>>, %arg16: memref<128x256xbf16, #tpu.memory_space<vmem>>, %arg17: memref<256x128xbf16, #tpu.memory_space<vmem>>, %arg18: memref<2x4xi32, #tpu.memory_space<vmem>>, %arg19: memref<64x128xf32, #tpu.memory_space<vmem>>, %arg20: memref<64x128xf32, #tpu.memory_space<vmem>>, %arg21: memref<64x64xf32, #tpu.memory_space<vmem>>, %arg22: memref<64x128xf32, #tpu.memory_space<vmem>>, %arg23: memref<2xi32, #tpu.memory_space<smem>>) attributes {dimension_semantics = [#tpu.dimension_semantics<arbitrary>, #tpu.dimension_semantics<arbitrary>], iteration_bounds = array<i64: 4, 2>, scalar_prefetch = 1 : i64, scratch_operands = 5 : i64, tpu.core_type = #tpu.core_type<tc>, window_params = [{pipeline_mode = #tpu.pipeline_mode<synchronous>, transform_indices = @transform_0, window_bounds = array<i64: 2, 32, 128>}, {pipeline_mode = #tpu.pipeline_mode<synchronous>, transform_indices = @transform_1, window_bounds = array<i64: 2, 1, 128>}, {pipeline_mode = #tpu.pipeline_mode<synchronous>, transform_indices = @transform_2, window_bounds = array<i64: 2, 1, 128>}, {pipeline_mode = #tpu.pipeline_mode<synchronous>, transform_indices = @transform_3, window_bounds = array<i64: 2, 128, 384>}, {pipeline_mode = #tpu.pipeline_mode<synchronous>, transform_indices = @transform_4, window_bounds = array<i64: 2, 1, 384>}, {pipeline_mode = #tpu.pipeline_mode<synchronous>, transform_indices = @transform_5, window_bounds = array<i64: 2, 128, 128>}, {pipeline_mode = #tpu.pipeline_mode<synchronous>, transform_indices = @transform_6, window_bounds = array<i64: 2, 1, 128>}, {pipeline_mode = #tpu.pipeline_mode<synchronous>, transform_indices = @transform_7, window_bounds = array<i64: 2, 1, 128>}, {pipeline_mode = #tpu.pipeline_mode<synchronous>, transform_indices = @transform_8, window_bounds = array<i64: 2, 1, 128>}, {pipeline_mode = #tpu.pipeline_mode<synchronous>, transform_indices = @transform_9, window_bounds = array<i64: 2, 128, 256>}, {pipeline_mode = #tpu.pipeline_mode<synchronous>, transform_indices = @transform_10, window_bounds = array<i64: 2, 1, 256>}, {pipeline_mode = #tpu.pipeline_mode<synchronous>, transform_indices = @transform_11, window_bounds = array<i64: 2, 256, 128>}, {pipeline_mode = #tpu.pipeline_mode<synchronous>, transform_indices = @transform_12, window_bounds = array<i64: 2, 1, 128>}, {pipeline_mode = #tpu.pipeline_mode<synchronous>, transform_indices = @transform_13, window_bounds = array<i64: 128, 256>}, {pipeline_mode = #tpu.pipeline_mode<synchronous>, transform_indices = @transform_14, window_bounds = array<i64: 256, 128>}, {pipeline_mode = #tpu.pipeline_mode<synchronous>, transform_indices = @transform_15, window_bounds = array<i64: 2, 4>}]} {
    %c0_i32 = arith.constant 0 : i32
    %0 = arith.cmpi eq, %arg0, %c0_i32 : i32
    %c0_i32_0 = arith.constant 0 : i32
    %1 = arith.cmpi eq, %arg1, %c0_i32_0 : i32
    %2 = arith.andi %0, %1 : i1
    %3 = arith.extui %2 : i1 to i32
    %c0_i32_1 = arith.constant 0 : i32
    %4 = arith.cmpi ne, %3, %c0_i32_1 : i32
    scf.if %4 {
      %c0_78 = arith.constant 0 : index
      %c0_79 = arith.constant 0 : index
      %c0_80 = arith.constant 0 : index
      %225 = vector.load %arg3[%c0_78, %c0_79, %c0_80] : memref<2x32x128xbf16, #tpu.memory_space<vmem>>, vector<2x32x128xbf16>
      %226 = vector.shape_cast %225 : vector<2x32x128xbf16> to vector<64x128xbf16>
      %227 = arith.extf %226 : vector<64x128xbf16> to vector<64x128xf32>
      %c0_81 = arith.constant 0 : index
      %c0_82 = arith.constant 0 : index
      %228 = vector.load %arg19[%c0_81, %c0_82] : memref<64x128xf32, #tpu.memory_space<vmem>>, vector<64x128xf32>
      tpu.vector_store %arg19[%c0_81, %c0_82], %227 {strides = array<i32>} : memref<64x128xf32, #tpu.memory_space<vmem>>, vector<64x128xf32>,
      %c0_i32_83 = arith.constant 0 : i32
      %229 = vector.broadcast %c0_i32_83 : i32 to vector<2x4xi32>
      %c0_84 = arith.constant 0 : index
      %c0_85 = arith.constant 0 : index
      %230 = vector.load %arg18[%c0_84, %c0_85] : memref<2x4xi32, #tpu.memory_space<vmem>>, vector<2x4xi32>
      tpu.vector_store %arg18[%c0_84, %c0_85], %229 {strides = array<i32>} : memref<2x4xi32, #tpu.memory_space<vmem>>, vector<2x4xi32>,
      %c0_86 = arith.constant 0 : index
      %231 = memref.load %arg2[%c0_86] : memref<2xi32, #tpu.memory_space<smem>>
      %c0_87 = arith.constant 0 : index
      %232 = memref.load %arg23[%c0_87] : memref<2xi32, #tpu.memory_space<smem>>
      memref.store %231, %arg23[%c0_87] : memref<2xi32, #tpu.memory_space<smem>>
      %c1 = arith.constant 1 : index
      %233 = memref.load %arg2[%c1] : memref<2xi32, #tpu.memory_space<smem>>
      %c1_88 = arith.constant 1 : index
      %234 = memref.load %arg23[%c1_88] : memref<2xi32, #tpu.memory_space<smem>>
      memref.store %233, %arg23[%c1_88] : memref<2xi32, #tpu.memory_space<smem>>
    } else {
    }
    %c0_i32_2 = arith.constant 0 : i32
    %5 = arith.cmpi eq, %arg1, %c0_i32_2 : i32
    %6 = arith.extui %5 : i1 to i32
    %c0_i32_3 = arith.constant 0 : i32
    %7 = arith.cmpi ne, %6, %c0_i32_3 : i32
    scf.if %7 {
      %c0_78 = arith.constant 0 : index
      %c0_79 = arith.constant 0 : index
      %225 = vector.load %arg19[%c0_78, %c0_79] : memref<64x128xf32, #tpu.memory_space<vmem>>, vector<64x128xf32>
      %c0_80 = arith.constant 0 : index
      %c0_81 = arith.constant 0 : index
      %226 = vector.load %arg20[%c0_80, %c0_81] : memref<64x128xf32, #tpu.memory_space<vmem>>, vector<64x128xf32>
      tpu.vector_store %arg20[%c0_80, %c0_81], %225 {strides = array<i32>} : memref<64x128xf32, #tpu.memory_space<vmem>>, vector<64x128xf32>,
      %227 = tpu.iota {dimensions = array<i32: 0>} : vector<64x64xi32>
      %228 = tpu.iota {dimensions = array<i32: 1>} : vector<64x64xi32>
      %cst_82 = arith.constant -1.000000e+09 : f32
      %229 = vector.broadcast %cst_82 : f32 to vector<64x64xf32>
      %c0_i32_83 = arith.constant 0 : i32
      %230 = vector.broadcast %c0_i32_83 : i32 to vector<64x64xi32>
      %231 = arith.cmpi sge, %227, %230 : vector<64x64xi32>
      %c32_i32 = arith.constant 32 : i32
      %232 = vector.broadcast %c32_i32 : i32 to vector<64x64xi32>
      %233 = arith.cmpi slt, %227, %232 : vector<64x64xi32>
      %234 = arith.andi %231, %233 : vector<64x64xi1>
      %c0_i32_84 = arith.constant 0 : i32
      %235 = vector.broadcast %c0_i32_84 : i32 to vector<64x64xi32>
      %236 = arith.cmpi sge, %228, %235 : vector<64x64xi32>
      %c32_i32_85 = arith.constant 32 : i32
      %237 = vector.broadcast %c32_i32_85 : i32 to vector<64x64xi32>
      %238 = arith.cmpi slt, %228, %237 : vector<64x64xi32>
      %239 = arith.andi %236, %238 : vector<64x64xi1>
      %240 = arith.andi %234, %239 : vector<64x64xi1>
      %241 = arith.cmpi sge, %227, %228 : vector<64x64xi32>
      %242 = arith.andi %240, %241 : vector<64x64xi1>
      %c0_86 = arith.constant 0 : index
      %243 = memref.load %arg23[%c0_86] : memref<2xi32, #tpu.memory_space<smem>>
      %c0_i32_87 = arith.constant 0 : i32
      %244 = arith.addi %c0_i32_87, %243 : i32
      %245 = vector.broadcast %244 : i32 to vector<64x64xi32>
      %246 = arith.cmpi slt, %228, %245 : vector<64x64xi32>
      %247 = arith.andi %242, %246 : vector<64x64xi1>
      %cst_88 = arith.constant 0.000000e+00 : f32
      %248 = vector.broadcast %cst_88 : f32 to vector<64x64xf32>
      %249 = arith.select %247, %248, %229 : vector<64x64xi1>, vector<64x64xf32>
      %c32_i32_89 = arith.constant 32 : i32
      %250 = vector.broadcast %c32_i32_89 : i32 to vector<64x64xi32>
      %251 = arith.cmpi sge, %227, %250 : vector<64x64xi32>
      %c64_i32 = arith.constant 64 : i32
      %252 = vector.broadcast %c64_i32 : i32 to vector<64x64xi32>
      %253 = arith.cmpi slt, %227, %252 : vector<64x64xi32>
      %254 = arith.andi %251, %253 : vector<64x64xi1>
      %c32_i32_90 = arith.constant 32 : i32
      %255 = vector.broadcast %c32_i32_90 : i32 to vector<64x64xi32>
      %256 = arith.cmpi sge, %228, %255 : vector<64x64xi32>
      %c64_i32_91 = arith.constant 64 : i32
      %257 = vector.broadcast %c64_i32_91 : i32 to vector<64x64xi32>
      %258 = arith.cmpi slt, %228, %257 : vector<64x64xi32>
      %259 = arith.andi %256, %258 : vector<64x64xi1>
      %260 = arith.andi %254, %259 : vector<64x64xi1>
      %261 = arith.cmpi sge, %227, %228 : vector<64x64xi32>
      %262 = arith.andi %260, %261 : vector<64x64xi1>
      %c1 = arith.constant 1 : index
      %263 = memref.load %arg23[%c1] : memref<2xi32, #tpu.memory_space<smem>>
      %c32_i32_92 = arith.constant 32 : i32
      %264 = arith.addi %c32_i32_92, %263 : i32
      %265 = vector.broadcast %264 : i32 to vector<64x64xi32>
      %266 = arith.cmpi slt, %228, %265 : vector<64x64xi32>
      %267 = arith.andi %262, %266 : vector<64x64xi1>
      %cst_93 = arith.constant 0.000000e+00 : f32
      %268 = vector.broadcast %cst_93 : f32 to vector<64x64xf32>
      %269 = arith.select %267, %268, %249 : vector<64x64xi1>, vector<64x64xf32>
      %c0_94 = arith.constant 0 : index
      %c0_95 = arith.constant 0 : index
      %270 = vector.load %arg21[%c0_94, %c0_95] : memref<64x64xf32, #tpu.memory_space<vmem>>, vector<64x64xf32>
      tpu.vector_store %arg21[%c0_94, %c0_95], %269 {strides = array<i32>} : memref<64x64xf32, #tpu.memory_space<vmem>>, vector<64x64xf32>,
    } else {
    }
    %c0 = arith.constant 0 : index
    %c0_4 = arith.constant 0 : index
    %8 = vector.load %arg20[%c0, %c0_4] : memref<64x128xf32, #tpu.memory_space<vmem>>, vector<64x128xf32>
    %c0_5 = arith.constant 0 : index
    %c0_6 = arith.constant 0 : index
    %9 = vector.load %arg21[%c0_5, %c0_6] : memref<64x64xf32, #tpu.memory_space<vmem>>, vector<64x64xf32>
    %10 = arith.index_cast %arg1 : i32 to index
    %c0_7 = arith.constant 0 : index
    %c0_8 = arith.constant 0 : index
    %11 = vector.load %arg4[%10, %c0_7, %c0_8] : memref<2x1x128xbf16, #tpu.memory_space<vmem>>, vector<1x1x128xbf16>
    %12 = vector.shape_cast %11 : vector<1x1x128xbf16> to vector<1x128xbf16>
    %13 = arith.extf %12 : vector<1x128xbf16> to vector<1x128xf32>
    %14 = arith.index_cast %arg1 : i32 to index
    %c0_9 = arith.constant 0 : index
    %c0_10 = arith.constant 0 : index
    %15 = vector.load %arg5[%14, %c0_9, %c0_10] : memref<2x1x128xbf16, #tpu.memory_space<vmem>>, vector<1x1x128xbf16>
    %16 = vector.shape_cast %15 : vector<1x1x128xbf16> to vector<1x128xbf16>
    %17 = arith.extf %16 : vector<1x128xbf16> to vector<1x128xf32>
    %cst = arith.constant dense<0.000000e+00> : vector<64xf32>
    %18 = vector.multi_reduction <add>, %8, %cst [1] : vector<64x128xf32> to vector<64xf32>
    %19 = vector.shape_cast %18 : vector<64xf32> to vector<64x1xf32>
    %cst_11 = arith.constant 1.280000e+02 : f32
    %20 = vector.broadcast %cst_11 : f32 to vector<64x1xf32>
    %21 = arith.divf %19, %20 : vector<64x1xf32>
    %22 = vector.broadcast %21 : vector<64x1xf32> to vector<64x128xf32>
    %23 = arith.subf %8, %22 : vector<64x128xf32>
    %24 = arith.mulf %23, %23 : vector<64x128xf32>
    %cst_12 = arith.constant dense<0.000000e+00> : vector<64xf32>
    %25 = vector.multi_reduction <add>, %24, %cst_12 [1] : vector<64x128xf32> to vector<64xf32>
    %26 = vector.shape_cast %25 : vector<64xf32> to vector<64x1xf32>
    %cst_13 = arith.constant 1.280000e+02 : f32
    %27 = vector.broadcast %cst_13 : f32 to vector<64x1xf32>
    %28 = arith.divf %26, %27 : vector<64x1xf32>
    %29 = vector.broadcast %21 : vector<64x1xf32> to vector<64x128xf32>
    %30 = arith.subf %8, %29 : vector<64x128xf32>
    %cst_14 = arith.constant 9.99999974E-6 : f32
    %31 = vector.broadcast %cst_14 : f32 to vector<64x1xf32>
    %32 = arith.addf %28, %31 : vector<64x1xf32>
    %33 = math.rsqrt %32 : vector<64x1xf32>
    %34 = vector.broadcast %33 : vector<64x1xf32> to vector<64x128xf32>
    %35 = arith.mulf %30, %34 : vector<64x128xf32>
    %36 = vector.broadcast %13 : vector<1x128xf32> to vector<64x128xf32>
    %37 = arith.mulf %35, %36 : vector<64x128xf32>
    %38 = vector.broadcast %17 : vector<1x128xf32> to vector<64x128xf32>
    %39 = arith.addf %37, %38 : vector<64x128xf32>
    %40 = arith.truncf %39 : vector<64x128xf32> to vector<64x128xbf16>
    %41 = arith.index_cast %arg1 : i32 to index
    %c0_15 = arith.constant 0 : index
    %c0_16 = arith.constant 0 : index
    %42 = vector.load %arg6[%41, %c0_15, %c0_16] : memref<2x128x384xbf16, #tpu.memory_space<vmem>>, vector<1x128x384xbf16>
    %43 = vector.shape_cast %42 : vector<1x128x384xbf16> to vector<128x384xbf16>
    %cst_17 = arith.constant dense<0.000000e+00> : vector<64x384xf32>
    %44 = tpu.matmul %40, %43, %cst_17 {dimension_numbers = #tpu.dot_dimension_numbers<[1], [0], [0], [1], [0, 0, 1, 1], [], []>} : vector<64x128xbf16>, vector<128x384xbf16>, vector<64x384xf32> -> vector<64x384xf32>
    %45 = arith.index_cast %arg1 : i32 to index
    %c0_18 = arith.constant 0 : index
    %c0_19 = arith.constant 0 : index
    %46 = vector.load %arg7[%45, %c0_18, %c0_19] : memref<2x1x384xbf16, #tpu.memory_space<vmem>>, vector<1x1x384xbf16>
    %47 = vector.shape_cast %46 : vector<1x1x384xbf16> to vector<1x384xbf16>
    %48 = arith.extf %47 : vector<1x384xbf16> to vector<1x384xf32>
    %49 = vector.broadcast %48 : vector<1x384xf32> to vector<64x384xf32>
    %50 = arith.addf %44, %49 : vector<64x384xf32>
    %51 = vector.extract_strided_slice %50 {offsets = [0, 0], sizes = [64, 128], strides = [1, 1]} : vector<64x384xf32> to vector<64x128xf32>
    %52 = vector.extract_strided_slice %50 {offsets = [0, 128], sizes = [64, 128], strides = [1, 1]} : vector<64x384xf32> to vector<64x128xf32>
    %53 = vector.extract_strided_slice %50 {offsets = [0, 256], sizes = [64, 128], strides = [1, 1]} : vector<64x384xf32> to vector<64x128xf32>
    %54 = vector.extract_strided_slice %51 {offsets = [0, 0], sizes = [64, 32], strides = [1, 1]} : vector<64x128xf32> to vector<64x32xf32>
    %55 = arith.truncf %54 : vector<64x32xf32> to vector<64x32xbf16>
    %56 = vector.extract_strided_slice %52 {offsets = [0, 0], sizes = [64, 32], strides = [1, 1]} : vector<64x128xf32> to vector<64x32xf32>
    %57 = arith.truncf %56 : vector<64x32xf32> to vector<64x32xbf16>
    %58 = vector.extract_strided_slice %53 {offsets = [0, 0], sizes = [64, 32], strides = [1, 1]} : vector<64x128xf32> to vector<64x32xf32>
    %59 = arith.truncf %58 : vector<64x32xf32> to vector<64x32xbf16>
    %cst_20 = arith.constant dense<0.000000e+00> : vector<64x64xf32>
    %60 = tpu.matmul %55, %57, %cst_20 {dimension_numbers = #tpu.dot_dimension_numbers<[1], [1], [0], [0], [0, 0, 1, 0], [], []>} : vector<64x32xbf16>, vector<64x32xbf16>, vector<64x64xf32> -> vector<64x64xf32>
    %cst_21 = arith.constant 0.176776692 : f32
    %61 = vector.broadcast %cst_21 : f32 to vector<64x64xf32>
    %62 = arith.mulf %60, %61 : vector<64x64xf32>
    %63 = arith.addf %62, %9 : vector<64x64xf32>
    %cst_22 = arith.constant dense<0xFF800000> : vector<64xf32>
    %64 = vector.multi_reduction <maximumf>, %63, %cst_22 [1] : vector<64x64xf32> to vector<64xf32>
    %65 = vector.shape_cast %64 : vector<64xf32> to vector<64x1xf32>
    %66 = vector.broadcast %65 : vector<64x1xf32> to vector<64x64xf32>
    %67 = arith.subf %63, %66 : vector<64x64xf32>
    %68 = math.exp %67 : vector<64x64xf32>
    %cst_23 = arith.constant dense<0.000000e+00> : vector<64xf32>
    %69 = vector.multi_reduction <add>, %68, %cst_23 [1] : vector<64x64xf32> to vector<64xf32>
    %70 = vector.shape_cast %69 : vector<64xf32> to vector<64x1xf32>
    %71 = vector.broadcast %70 : vector<64x1xf32> to vector<64x64xf32>
    %72 = arith.divf %68, %71 : vector<64x64xf32>
    %73 = arith.truncf %72 : vector<64x64xf32> to vector<64x64xbf16>
    %cst_24 = arith.constant dense<0.000000e+00> : vector<64x32xf32>
    %74 = tpu.matmul %73, %59, %cst_24 {dimension_numbers = #tpu.dot_dimension_numbers<[1], [0], [0], [1], [0, 0, 1, 1], [], []>} : vector<64x64xbf16>, vector<64x32xbf16>, vector<64x32xf32> -> vector<64x32xf32>
    %c0_25 = arith.constant 0 : index
    %c0_26 = arith.constant 0 : index
    %75 = vector.load %arg22[%c0_25, %c0_26] : memref<64x128xf32, #tpu.memory_space<vmem>>, vector<64x32xf32>
    tpu.vector_store %arg22[%c0_25, %c0_26], %74 {strides = array<i32>} : memref<64x128xf32, #tpu.memory_space<vmem>>, vector<64x32xf32>,
    %76 = vector.extract_strided_slice %51 {offsets = [0, 32], sizes = [64, 32], strides = [1, 1]} : vector<64x128xf32> to vector<64x32xf32>
    %77 = arith.truncf %76 : vector<64x32xf32> to vector<64x32xbf16>
    %78 = vector.extract_strided_slice %52 {offsets = [0, 32], sizes = [64, 32], strides = [1, 1]} : vector<64x128xf32> to vector<64x32xf32>
    %79 = arith.truncf %78 : vector<64x32xf32> to vector<64x32xbf16>
    %80 = vector.extract_strided_slice %53 {offsets = [0, 32], sizes = [64, 32], strides = [1, 1]} : vector<64x128xf32> to vector<64x32xf32>
    %81 = arith.truncf %80 : vector<64x32xf32> to vector<64x32xbf16>
    %cst_27 = arith.constant dense<0.000000e+00> : vector<64x64xf32>
    %82 = tpu.matmul %77, %79, %cst_27 {dimension_numbers = #tpu.dot_dimension_numbers<[1], [1], [0], [0], [0, 0, 1, 0], [], []>} : vector<64x32xbf16>, vector<64x32xbf16>, vector<64x64xf32> -> vector<64x64xf32>
    %cst_28 = arith.constant 0.176776692 : f32
    %83 = vector.broadcast %cst_28 : f32 to vector<64x64xf32>
    %84 = arith.mulf %82, %83 : vector<64x64xf32>
    %85 = arith.addf %84, %9 : vector<64x64xf32>
    %cst_29 = arith.constant dense<0xFF800000> : vector<64xf32>
    %86 = vector.multi_reduction <maximumf>, %85, %cst_29 [1] : vector<64x64xf32> to vector<64xf32>
    %87 = vector.shape_cast %86 : vector<64xf32> to vector<64x1xf32>
    %88 = vector.broadcast %87 : vector<64x1xf32> to vector<64x64xf32>
    %89 = arith.subf %85, %88 : vector<64x64xf32>
    %90 = math.exp %89 : vector<64x64xf32>
    %cst_30 = arith.constant dense<0.000000e+00> : vector<64xf32>
    %91 = vector.multi_reduction <add>, %90, %cst_30 [1] : vector<64x64xf32> to vector<64xf32>
    %92 = vector.shape_cast %91 : vector<64xf32> to vector<64x1xf32>
    %93 = vector.broadcast %92 : vector<64x1xf32> to vector<64x64xf32>
    %94 = arith.divf %90, %93 : vector<64x64xf32>
    %95 = arith.truncf %94 : vector<64x64xf32> to vector<64x64xbf16>
    %cst_31 = arith.constant dense<0.000000e+00> : vector<64x32xf32>
    %96 = tpu.matmul %95, %81, %cst_31 {dimension_numbers = #tpu.dot_dimension_numbers<[1], [0], [0], [1], [0, 0, 1, 1], [], []>} : vector<64x64xbf16>, vector<64x32xbf16>, vector<64x32xf32> -> vector<64x32xf32>
    %c0_32 = arith.constant 0 : index
    %c32 = arith.constant 32 : index
    %97 = vector.load %arg22[%c0_32, %c32] : memref<64x128xf32, #tpu.memory_space<vmem>>, vector<64x32xf32>
    tpu.vector_store %arg22[%c0_32, %c32], %96 {strides = array<i32>} : memref<64x128xf32, #tpu.memory_space<vmem>>, vector<64x32xf32>,
    %98 = vector.extract_strided_slice %51 {offsets = [0, 64], sizes = [64, 32], strides = [1, 1]} : vector<64x128xf32> to vector<64x32xf32>
    %99 = arith.truncf %98 : vector<64x32xf32> to vector<64x32xbf16>
    %100 = vector.extract_strided_slice %52 {offsets = [0, 64], sizes = [64, 32], strides = [1, 1]} : vector<64x128xf32> to vector<64x32xf32>
    %101 = arith.truncf %100 : vector<64x32xf32> to vector<64x32xbf16>
    %102 = vector.extract_strided_slice %53 {offsets = [0, 64], sizes = [64, 32], strides = [1, 1]} : vector<64x128xf32> to vector<64x32xf32>
    %103 = arith.truncf %102 : vector<64x32xf32> to vector<64x32xbf16>
    %cst_33 = arith.constant dense<0.000000e+00> : vector<64x64xf32>
    %104 = tpu.matmul %99, %101, %cst_33 {dimension_numbers = #tpu.dot_dimension_numbers<[1], [1], [0], [0], [0, 0, 1, 0], [], []>} : vector<64x32xbf16>, vector<64x32xbf16>, vector<64x64xf32> -> vector<64x64xf32>
    %cst_34 = arith.constant 0.176776692 : f32
    %105 = vector.broadcast %cst_34 : f32 to vector<64x64xf32>
    %106 = arith.mulf %104, %105 : vector<64x64xf32>
    %107 = arith.addf %106, %9 : vector<64x64xf32>
    %cst_35 = arith.constant dense<0xFF800000> : vector<64xf32>
    %108 = vector.multi_reduction <maximumf>, %107, %cst_35 [1] : vector<64x64xf32> to vector<64xf32>
    %109 = vector.shape_cast %108 : vector<64xf32> to vector<64x1xf32>
    %110 = vector.broadcast %109 : vector<64x1xf32> to vector<64x64xf32>
    %111 = arith.subf %107, %110 : vector<64x64xf32>
    %112 = math.exp %111 : vector<64x64xf32>
    %cst_36 = arith.constant dense<0.000000e+00> : vector<64xf32>
    %113 = vector.multi_reduction <add>, %112, %cst_36 [1] : vector<64x64xf32> to vector<64xf32>
    %114 = vector.shape_cast %113 : vector<64xf32> to vector<64x1xf32>
    %115 = vector.broadcast %114 : vector<64x1xf32> to vector<64x64xf32>
    %116 = arith.divf %112, %115 : vector<64x64xf32>
    %117 = arith.truncf %116 : vector<64x64xf32> to vector<64x64xbf16>
    %cst_37 = arith.constant dense<0.000000e+00> : vector<64x32xf32>
    %118 = tpu.matmul %117, %103, %cst_37 {dimension_numbers = #tpu.dot_dimension_numbers<[1], [0], [0], [1], [0, 0, 1, 1], [], []>} : vector<64x64xbf16>, vector<64x32xbf16>, vector<64x32xf32> -> vector<64x32xf32>
    %c0_38 = arith.constant 0 : index
    %c64 = arith.constant 64 : index
    %119 = vector.load %arg22[%c0_38, %c64] : memref<64x128xf32, #tpu.memory_space<vmem>>, vector<64x32xf32>
    tpu.vector_store %arg22[%c0_38, %c64], %118 {strides = array<i32>} : memref<64x128xf32, #tpu.memory_space<vmem>>, vector<64x32xf32>,
    %120 = vector.extract_strided_slice %51 {offsets = [0, 96], sizes = [64, 32], strides = [1, 1]} : vector<64x128xf32> to vector<64x32xf32>
    %121 = arith.truncf %120 : vector<64x32xf32> to vector<64x32xbf16>
    %122 = vector.extract_strided_slice %52 {offsets = [0, 96], sizes = [64, 32], strides = [1, 1]} : vector<64x128xf32> to vector<64x32xf32>
    %123 = arith.truncf %122 : vector<64x32xf32> to vector<64x32xbf16>
    %124 = vector.extract_strided_slice %53 {offsets = [0, 96], sizes = [64, 32], strides = [1, 1]} : vector<64x128xf32> to vector<64x32xf32>
    %125 = arith.truncf %124 : vector<64x32xf32> to vector<64x32xbf16>
    %cst_39 = arith.constant dense<0.000000e+00> : vector<64x64xf32>
    %126 = tpu.matmul %121, %123, %cst_39 {dimension_numbers = #tpu.dot_dimension_numbers<[1], [1], [0], [0], [0, 0, 1, 0], [], []>} : vector<64x32xbf16>, vector<64x32xbf16>, vector<64x64xf32> -> vector<64x64xf32>
    %cst_40 = arith.constant 0.176776692 : f32
    %127 = vector.broadcast %cst_40 : f32 to vector<64x64xf32>
    %128 = arith.mulf %126, %127 : vector<64x64xf32>
    %129 = arith.addf %128, %9 : vector<64x64xf32>
    %cst_41 = arith.constant dense<0xFF800000> : vector<64xf32>
    %130 = vector.multi_reduction <maximumf>, %129, %cst_41 [1] : vector<64x64xf32> to vector<64xf32>
    %131 = vector.shape_cast %130 : vector<64xf32> to vector<64x1xf32>
    %132 = vector.broadcast %131 : vector<64x1xf32> to vector<64x64xf32>
    %133 = arith.subf %129, %132 : vector<64x64xf32>
    %134 = math.exp %133 : vector<64x64xf32>
    %cst_42 = arith.constant dense<0.000000e+00> : vector<64xf32>
    %135 = vector.multi_reduction <add>, %134, %cst_42 [1] : vector<64x64xf32> to vector<64xf32>
    %136 = vector.shape_cast %135 : vector<64xf32> to vector<64x1xf32>
    %137 = vector.broadcast %136 : vector<64x1xf32> to vector<64x64xf32>
    %138 = arith.divf %134, %137 : vector<64x64xf32>
    %139 = arith.truncf %138 : vector<64x64xf32> to vector<64x64xbf16>
    %cst_43 = arith.constant dense<0.000000e+00> : vector<64x32xf32>
    %140 = tpu.matmul %139, %125, %cst_43 {dimension_numbers = #tpu.dot_dimension_numbers<[1], [0], [0], [1], [0, 0, 1, 1], [], []>} : vector<64x64xbf16>, vector<64x32xbf16>, vector<64x32xf32> -> vector<64x32xf32>
    %c0_44 = arith.constant 0 : index
    %c96 = arith.constant 96 : index
    %141 = vector.load %arg22[%c0_44, %c96] : memref<64x128xf32, #tpu.memory_space<vmem>>, vector<64x32xf32>
    tpu.vector_store %arg22[%c0_44, %c96], %140 {strides = array<i32>} : memref<64x128xf32, #tpu.memory_space<vmem>>, vector<64x32xf32>,
    %c0_45 = arith.constant 0 : index
    %c0_46 = arith.constant 0 : index
    %142 = vector.load %arg22[%c0_45, %c0_46] : memref<64x128xf32, #tpu.memory_space<vmem>>, vector<64x128xf32>
    %143 = arith.truncf %142 : vector<64x128xf32> to vector<64x128xbf16>
    %144 = arith.index_cast %arg1 : i32 to index
    %c0_47 = arith.constant 0 : index
    %c0_48 = arith.constant 0 : index
    %145 = vector.load %arg8[%144, %c0_47, %c0_48] : memref<2x128x128xbf16, #tpu.memory_space<vmem>>, vector<1x128x128xbf16>
    %146 = vector.shape_cast %145 : vector<1x128x128xbf16> to vector<128x128xbf16>
    %cst_49 = arith.constant dense<0.000000e+00> : vector<64x128xf32>
    %147 = tpu.matmul %143, %146, %cst_49 {dimension_numbers = #tpu.dot_dimension_numbers<[1], [0], [0], [1], [0, 0, 1, 1], [], []>} : vector<64x128xbf16>, vector<128x128xbf16>, vector<64x128xf32> -> vector<64x128xf32>
    %148 = arith.addf %8, %147 : vector<64x128xf32>
    %149 = arith.index_cast %arg1 : i32 to index
    %c0_50 = arith.constant 0 : index
    %c0_51 = arith.constant 0 : index
    %150 = vector.load %arg9[%149, %c0_50, %c0_51] : memref<2x1x128xbf16, #tpu.memory_space<vmem>>, vector<1x1x128xbf16>
    %151 = vector.shape_cast %150 : vector<1x1x128xbf16> to vector<1x128xbf16>
    %152 = arith.extf %151 : vector<1x128xbf16> to vector<1x128xf32>
    %153 = vector.broadcast %152 : vector<1x128xf32> to vector<64x128xf32>
    %154 = arith.addf %148, %153 : vector<64x128xf32>
    %155 = arith.index_cast %arg1 : i32 to index
    %c0_52 = arith.constant 0 : index
    %c0_53 = arith.constant 0 : index
    %156 = vector.load %arg10[%155, %c0_52, %c0_53] : memref<2x1x128xbf16, #tpu.memory_space<vmem>>, vector<1x1x128xbf16>
    %157 = vector.shape_cast %156 : vector<1x1x128xbf16> to vector<1x128xbf16>
    %158 = arith.extf %157 : vector<1x128xbf16> to vector<1x128xf32>
    %159 = arith.index_cast %arg1 : i32 to index
    %c0_54 = arith.constant 0 : index
    %c0_55 = arith.constant 0 : index
    %160 = vector.load %arg11[%159, %c0_54, %c0_55] : memref<2x1x128xbf16, #tpu.memory_space<vmem>>, vector<1x1x128xbf16>
    %161 = vector.shape_cast %160 : vector<1x1x128xbf16> to vector<1x128xbf16>
    %162 = arith.extf %161 : vector<1x128xbf16> to vector<1x128xf32>
    %cst_56 = arith.constant dense<0.000000e+00> : vector<64xf32>
    %163 = vector.multi_reduction <add>, %154, %cst_56 [1] : vector<64x128xf32> to vector<64xf32>
    %164 = vector.shape_cast %163 : vector<64xf32> to vector<64x1xf32>
    %cst_57 = arith.constant 1.280000e+02 : f32
    %165 = vector.broadcast %cst_57 : f32 to vector<64x1xf32>
    %166 = arith.divf %164, %165 : vector<64x1xf32>
    %167 = vector.broadcast %166 : vector<64x1xf32> to vector<64x128xf32>
    %168 = arith.subf %154, %167 : vector<64x128xf32>
    %169 = arith.mulf %168, %168 : vector<64x128xf32>
    %cst_58 = arith.constant dense<0.000000e+00> : vector<64xf32>
    %170 = vector.multi_reduction <add>, %169, %cst_58 [1] : vector<64x128xf32> to vector<64xf32>
    %171 = vector.shape_cast %170 : vector<64xf32> to vector<64x1xf32>
    %cst_59 = arith.constant 1.280000e+02 : f32
    %172 = vector.broadcast %cst_59 : f32 to vector<64x1xf32>
    %173 = arith.divf %171, %172 : vector<64x1xf32>
    %174 = vector.broadcast %166 : vector<64x1xf32> to vector<64x128xf32>
    %175 = arith.subf %154, %174 : vector<64x128xf32>
    %cst_60 = arith.constant 9.99999974E-6 : f32
    %176 = vector.broadcast %cst_60 : f32 to vector<64x1xf32>
    %177 = arith.addf %173, %176 : vector<64x1xf32>
    %178 = math.rsqrt %177 : vector<64x1xf32>
    %179 = vector.broadcast %178 : vector<64x1xf32> to vector<64x128xf32>
    %180 = arith.mulf %175, %179 : vector<64x128xf32>
    %181 = vector.broadcast %158 : vector<1x128xf32> to vector<64x128xf32>
    %182 = arith.mulf %180, %181 : vector<64x128xf32>
    %183 = vector.broadcast %162 : vector<1x128xf32> to vector<64x128xf32>
    %184 = arith.addf %182, %183 : vector<64x128xf32>
    %185 = arith.truncf %184 : vector<64x128xf32> to vector<64x128xbf16>
    %186 = arith.index_cast %arg1 : i32 to index
    %c0_61 = arith.constant 0 : index
    %c0_62 = arith.constant 0 : index
    %187 = vector.load %arg12[%186, %c0_61, %c0_62] : memref<2x128x256xbf16, #tpu.memory_space<vmem>>, vector<1x128x256xbf16>
    %188 = vector.shape_cast %187 : vector<1x128x256xbf16> to vector<128x256xbf16>
    %cst_63 = arith.constant dense<0.000000e+00> : vector<64x256xf32>
    %189 = tpu.matmul %185, %188, %cst_63 {dimension_numbers = #tpu.dot_dimension_numbers<[1], [0], [0], [1], [0, 0, 1, 1], [], []>} : vector<64x128xbf16>, vector<128x256xbf16>, vector<64x256xf32> -> vector<64x256xf32>
    %190 = arith.index_cast %arg1 : i32 to index
    %c0_64 = arith.constant 0 : index
    %c0_65 = arith.constant 0 : index
    %191 = vector.load %arg13[%190, %c0_64, %c0_65] : memref<2x1x256xbf16, #tpu.memory_space<vmem>>, vector<1x1x256xbf16>
    %192 = vector.shape_cast %191 : vector<1x1x256xbf16> to vector<1x256xbf16>
    %193 = arith.extf %192 : vector<1x256xbf16> to vector<1x256xf32>
    %194 = vector.broadcast %193 : vector<1x256xf32> to vector<64x256xf32>
    %195 = arith.addf %189, %194 : vector<64x256xf32>
    %196 = arith.mulf %195, %195 : vector<64x256xf32>
    %197 = arith.mulf %195, %196 : vector<64x256xf32>
    %cst_66 = arith.constant 4.471500e-02 : f32
    %198 = vector.broadcast %cst_66 : f32 to vector<64x256xf32>
    %199 = arith.mulf %198, %197 : vector<64x256xf32>
    %200 = arith.addf %195, %199 : vector<64x256xf32>
    %cst_67 = arith.constant 0.797884583 : f32
    %201 = vector.broadcast %cst_67 : f32 to vector<64x256xf32>
    %202 = arith.mulf %201, %200 : vector<64x256xf32>
    %203 = math.tanh %202 : vector<64x256xf32>
    %cst_68 = arith.constant 1.000000e+00 : f32
    %204 = vector.broadcast %cst_68 : f32 to vector<64x256xf32>
    %205 = arith.addf %204, %203 : vector<64x256xf32>
    %cst_69 = arith.constant 5.000000e-01 : f32
    %206 = vector.broadcast %cst_69 : f32 to vector<64x256xf32>
    %207 = arith.mulf %206, %205 : vector<64x256xf32>
    %208 = arith.mulf %195, %207 : vector<64x256xf32>
    %209 = arith.truncf %208 : vector<64x256xf32> to vector<64x256xbf16>
    %210 = arith.index_cast %arg1 : i32 to index
    %c0_70 = arith.constant 0 : index
    %c0_71 = arith.constant 0 : index
    %211 = vector.load %arg14[%210, %c0_70, %c0_71] : memref<2x256x128xbf16, #tpu.memory_space<vmem>>, vector<1x256x128xbf16>
    %212 = vector.shape_cast %211 : vector<1x256x128xbf16> to vector<256x128xbf16>
    %cst_72 = arith.constant dense<0.000000e+00> : vector<64x128xf32>
    %213 = tpu.matmul %209, %212, %cst_72 {dimension_numbers = #tpu.dot_dimension_numbers<[1], [0], [0], [1], [0, 0, 1, 1], [], []>} : vector<64x256xbf16>, vector<256x128xbf16>, vector<64x128xf32> -> vector<64x128xf32>
    %214 = arith.addf %154, %213 : vector<64x128xf32>
    %215 = arith.index_cast %arg1 : i32 to index
    %c0_73 = arith.constant 0 : index
    %c0_74 = arith.constant 0 : index
    %216 = vector.load %arg15[%215, %c0_73, %c0_74] : memref<2x1x128xbf16, #tpu.memory_space<vmem>>, vector<1x1x128xbf16>
    %217 = vector.shape_cast %216 : vector<1x1x128xbf16> to vector<1x128xbf16>
    %218 = arith.extf %217 : vector<1x128xbf16> to vector<1x128xf32>
    %219 = vector.broadcast %218 : vector<1x128xf32> to vector<64x128xf32>
    %220 = arith.addf %214, %219 : vector<64x128xf32>
    %c0_75 = arith.constant 0 : index
    %c0_76 = arith.constant 0 : index
    %221 = vector.load %arg20[%c0_75, %c0_76] : memref<64x128xf32, #tpu.memory_space<vmem>>, vector<64x128xf32>
    tpu.vector_store %arg20[%c0_75, %c0_76], %220 {strides = array<i32>} : memref<64x128xf32, #tpu.memory_space<vmem>>, vector<64x128xf32>,
    %c1_i32 = arith.constant 1 : i32
    %222 = arith.cmpi eq, %arg1, %c1_i32 : i32
    %223 = arith.extui %222 : i1 to i32
    %c0_i32_77 = arith.constant 0 : i32
    %224 = arith.cmpi ne, %223, %c0_i32_77 : i32
    scf.if %224 {
      %c0_78 = arith.constant 0 : index
      %225 = memref.load %arg23[%c0_78] : memref<2xi32, #tpu.memory_space<smem>>
      %c0_i32_79 = arith.constant 0 : i32
      %226 = arith.addi %c0_i32_79, %225 : i32
      %c1_i32_80 = arith.constant 1 : i32
      %227 = arith.subi %226, %c1_i32_80 : i32
      %228 = arith.index_cast %227 : i32 to index
      %c0_81 = arith.constant 0 : index
      %229 = vector.load %arg20[%228, %c0_81] : memref<64x128xf32, #tpu.memory_space<vmem>>, vector<1x128xf32>
      %c1 = arith.constant 1 : index
      %230 = memref.load %arg23[%c1] : memref<2xi32, #tpu.memory_space<smem>>
      %c32_i32 = arith.constant 32 : i32
      %231 = arith.addi %c32_i32, %230 : i32
      %c1_i32_82 = arith.constant 1 : i32
      %232 = arith.subi %231, %c1_i32_82 : i32
      %233 = arith.index_cast %232 : i32 to index
      %c0_83 = arith.constant 0 : index
      %234 = vector.load %arg20[%233, %c0_83] : memref<64x128xf32, #tpu.memory_space<vmem>>, vector<1x128xf32>
      %235 = tpu.concatenate %229, %234 in 0 : vector<1x128xf32>, vector<1x128xf32> -> vector<2x128xf32>
      %236 = arith.truncf %235 : vector<2x128xf32> to vector<2x128xbf16>
      %c0_84 = arith.constant 0 : index
      %c0_85 = arith.constant 0 : index
      %237 = vector.load %arg16[%c0_84, %c0_85] : memref<128x256xbf16, #tpu.memory_space<vmem>>, vector<128x256xbf16>
      %cst_86 = arith.constant dense<0.000000e+00> : vector<2x256xf32>
      %238 = tpu.matmul %236, %237, %cst_86 {dimension_numbers = #tpu.dot_dimension_numbers<[1], [0], [0], [1], [0, 0, 1, 1], [], []>} : vector<2x128xbf16>, vector<128x256xbf16>, vector<2x256xf32> -> vector<2x256xf32>
      %239 = tpu.iota {dimensions = array<i32: 1>} : vector<2x256xi32>
      %cst_87 = arith.constant dense<0xFF800000> : vector<2xf32>
      %240 = vector.multi_reduction <maximumf>, %238, %cst_87 [1] : vector<2x256xf32> to vector<2xf32>
      %241 = vector.shape_cast %240 : vector<2xf32> to vector<2x1xf32>
      %242 = vector.broadcast %241 : vector<2x1xf32> to vector<2x256xf32>
      %243 = arith.cmpf oeq, %238, %242 : vector<2x256xf32>
      %c256_i32 = arith.constant 256 : i32
      %244 = vector.broadcast %c256_i32 : i32 to vector<2x256xi32>
      %245 = arith.select %243, %239, %244 : vector<2x256xi1>, vector<2x256xi32>
      %cst_88 = arith.constant dense<2147483647> : vector<2xi32>
      %246 = vector.multi_reduction <minsi>, %245, %cst_88 [1] : vector<2x256xi32> to vector<2xi32>
      %247 = vector.shape_cast %246 : vector<2xi32> to vector<2x1xi32>
      %248 = vector.broadcast %247 : vector<2x1xi32> to vector<2x256xi32>
      %249 = arith.cmpi eq, %239, %248 : vector<2x256xi32>
      %250 = arith.extui %249 : vector<2x256xi1> to vector<2x256xi32>
      %251 = arith.sitofp %250 : vector<2x256xi32> to vector<2x256xf32>
      %252 = arith.truncf %251 : vector<2x256xf32> to vector<2x256xbf16>
      %c0_89 = arith.constant 0 : index
      %c0_90 = arith.constant 0 : index
      %253 = vector.load %arg17[%c0_89, %c0_90] : memref<256x128xbf16, #tpu.memory_space<vmem>>, vector<256x128xbf16>
      %cst_91 = arith.constant dense<0.000000e+00> : vector<2x128xf32>
      %254 = tpu.matmul %252, %253, %cst_91 {dimension_numbers = #tpu.dot_dimension_numbers<[1], [0], [0], [1], [0, 0, 1, 1], [], []>} : vector<2x256xbf16>, vector<256x128xbf16>, vector<2x128xf32> -> vector<2x128xf32>
      %255 = arith.truncf %254 : vector<2x128xf32> to vector<2x128xbf16>
      %256 = arith.extf %255 : vector<2x128xbf16> to vector<2x128xf32>
      %257 = tpu.iota {dimensions = array<i32: 0>} : vector<64x1xi32>
      %c0_92 = arith.constant 0 : index
      %c0_93 = arith.constant 0 : index
      %258 = vector.load %arg19[%c0_92, %c0_93] : memref<64x128xf32, #tpu.memory_space<vmem>>, vector<64x128xf32>
      %c0_94 = arith.constant 0 : index
      %259 = memref.load %arg23[%c0_94] : memref<2xi32, #tpu.memory_space<smem>>
      %c0_i32_95 = arith.constant 0 : i32
      %260 = arith.addi %c0_i32_95, %259 : i32
      %261 = vector.broadcast %260 : i32 to vector<64x1xi32>
      %262 = arith.cmpi eq, %257, %261 : vector<64x1xi32>
      %263 = vector.extract_strided_slice %256 {offsets = [0, 0], sizes = [1, 128], strides = [1, 1]} : vector<2x128xf32> to vector<1x128xf32>
      %264 = vector.shape_cast %262 : vector<64x1xi1> to vector<64x1xi1>
      %265 = vector.broadcast %264 : vector<64x1xi1> to vector<64x128xi1>
      %266 = vector.shape_cast %263 : vector<1x128xf32> to vector<1x128xf32>
      %267 = vector.broadcast %266 : vector<1x128xf32> to vector<64x128xf32>
      %268 = arith.select %265, %267, %258 : vector<64x128xi1>, vector<64x128xf32>
      %c1_96 = arith.constant 1 : index
      %269 = memref.load %arg23[%c1_96] : memref<2xi32, #tpu.memory_space<smem>>
      %c32_i32_97 = arith.constant 32 : i32
      %270 = arith.addi %c32_i32_97, %269 : i32
      %271 = vector.broadcast %270 : i32 to vector<64x1xi32>
      %272 = arith.cmpi eq, %257, %271 : vector<64x1xi32>
      %273 = vector.extract_strided_slice %256 {offsets = [1, 0], sizes = [1, 128], strides = [1, 1]} : vector<2x128xf32> to vector<1x128xf32>
      %274 = vector.shape_cast %272 : vector<64x1xi1> to vector<64x1xi1>
      %275 = vector.broadcast %274 : vector<64x1xi1> to vector<64x128xi1>
      %276 = vector.shape_cast %273 : vector<1x128xf32> to vector<1x128xf32>
      %277 = vector.broadcast %276 : vector<1x128xf32> to vector<64x128xf32>
      %278 = arith.select %275, %277, %268 : vector<64x128xi1>, vector<64x128xf32>
      %c0_98 = arith.constant 0 : index
      %c0_99 = arith.constant 0 : index
      %279 = vector.load %arg19[%c0_98, %c0_99] : memref<64x128xf32, #tpu.memory_space<vmem>>, vector<64x128xf32>
      tpu.vector_store %arg19[%c0_98, %c0_99], %278 {strides = array<i32>} : memref<64x128xf32, #tpu.memory_space<vmem>>, vector<64x128xf32>,
      %c0_100 = arith.constant 0 : index
      %280 = memref.load %arg23[%c0_100] : memref<2xi32, #tpu.memory_space<smem>>
      %c1_i32_101 = arith.constant 1 : i32
      %281 = arith.addi %280, %c1_i32_101 : i32
      %c0_102 = arith.constant 0 : index
      %282 = memref.load %arg23[%c0_102] : memref<2xi32, #tpu.memory_space<smem>>
      memref.store %281, %arg23[%c0_102] : memref<2xi32, #tpu.memory_space<smem>>
      %c1_103 = arith.constant 1 : index
      %283 = memref.load %arg23[%c1_103] : memref<2xi32, #tpu.memory_space<smem>>
      %c1_i32_104 = arith.constant 1 : i32
      %284 = arith.addi %283, %c1_i32_104 : i32
      %c1_105 = arith.constant 1 : index
      %285 = memref.load %arg23[%c1_105] : memref<2xi32, #tpu.memory_space<smem>>
      memref.store %284, %arg23[%c1_105] : memref<2xi32, #tpu.memory_space<smem>>
      %286 = tpu.iota {dimensions = array<i32: 1>} : vector<2x4xi32>
      %287 = vector.broadcast %arg0 : i32 to vector<2x4xi32>
      %288 = arith.cmpi eq, %286, %287 : vector<2x4xi32>
      %c0_106 = arith.constant 0 : index
      %c0_107 = arith.constant 0 : index
      %289 = vector.load %arg18[%c0_106, %c0_107] : memref<2x4xi32, #tpu.memory_space<vmem>>, vector<2x4xi32>
      %290 = vector.shape_cast %247 : vector<2x1xi32> to vector<2x1xi32>
      %291 = vector.broadcast %290 : vector<2x1xi32> to vector<2x4xi32>
      %292 = arith.select %288, %291, %289 : vector<2x4xi1>, vector<2x4xi32>
      %c0_108 = arith.constant 0 : index
      %c0_109 = arith.constant 0 : index
      %293 = vector.load %arg18[%c0_108, %c0_109] : memref<2x4xi32, #tpu.memory_space<vmem>>, vector<2x4xi32>
      tpu.vector_store %arg18[%c0_108, %c0_109], %292 {strides = array<i32>} : memref<2x4xi32, #tpu.memory_space<vmem>>, vector<2x4xi32>,
    } else {
    }
    return
  }
  func.func @transform_0(%arg0: i32, %arg1: i32, %arg2: memref<2xi32, #tpu.memory_space<smem>>) -> (i32, i32, i32) {
    %c0_i32 = arith.constant 0 : i32
    %c0_i32_0 = arith.constant 0 : i32
    %c0_i32_1 = arith.constant 0 : i32
    %c0_i32_2 = arith.constant 0 : i32
    return %c0_i32, %c0_i32_0, %c0_i32_1 : i32, i32, i32
  }
  func.func @transform_1(%arg0: i32, %arg1: i32, %arg2: memref<2xi32, #tpu.memory_space<smem>>) -> (i32, i32, i32) {
    %c0_i32 = arith.constant 0 : i32
    %c0_i32_0 = arith.constant 0 : i32
    %c0_i32_1 = arith.constant 0 : i32
    %c0_i32_2 = arith.constant 0 : i32
    return %c0_i32, %c0_i32_0, %c0_i32_1 : i32, i32, i32
  }
  func.func @transform_2(%arg0: i32, %arg1: i32, %arg2: memref<2xi32, #tpu.memory_space<smem>>) -> (i32, i32, i32) {
    %c0_i32 = arith.constant 0 : i32
    %c0_i32_0 = arith.constant 0 : i32
    %c0_i32_1 = arith.constant 0 : i32
    %c0_i32_2 = arith.constant 0 : i32
    return %c0_i32, %c0_i32_0, %c0_i32_1 : i32, i32, i32
  }
  func.func @transform_3(%arg0: i32, %arg1: i32, %arg2: memref<2xi32, #tpu.memory_space<smem>>) -> (i32, i32, i32) {
    %c0_i32 = arith.constant 0 : i32
    %c0_i32_0 = arith.constant 0 : i32
    %c0_i32_1 = arith.constant 0 : i32
    %c0_i32_2 = arith.constant 0 : i32
    return %c0_i32, %c0_i32_0, %c0_i32_1 : i32, i32, i32
  }
  func.func @transform_4(%arg0: i32, %arg1: i32, %arg2: memref<2xi32, #tpu.memory_space<smem>>) -> (i32, i32, i32) {
    %c0_i32 = arith.constant 0 : i32
    %c0_i32_0 = arith.constant 0 : i32
    %c0_i32_1 = arith.constant 0 : i32
    %c0_i32_2 = arith.constant 0 : i32
    return %c0_i32, %c0_i32_0, %c0_i32_1 : i32, i32, i32
  }
  func.func @transform_5(%arg0: i32, %arg1: i32, %arg2: memref<2xi32, #tpu.memory_space<smem>>) -> (i32, i32, i32) {
    %c0_i32 = arith.constant 0 : i32
    %c0_i32_0 = arith.constant 0 : i32
    %c0_i32_1 = arith.constant 0 : i32
    %c0_i32_2 = arith.constant 0 : i32
    return %c0_i32, %c0_i32_0, %c0_i32_1 : i32, i32, i32
  }
  func.func @transform_6(%arg0: i32, %arg1: i32, %arg2: memref<2xi32, #tpu.memory_space<smem>>) -> (i32, i32, i32) {
    %c0_i32 = arith.constant 0 : i32
    %c0_i32_0 = arith.constant 0 : i32
    %c0_i32_1 = arith.constant 0 : i32
    %c0_i32_2 = arith.constant 0 : i32
    return %c0_i32, %c0_i32_0, %c0_i32_1 : i32, i32, i32
  }
  func.func @transform_7(%arg0: i32, %arg1: i32, %arg2: memref<2xi32, #tpu.memory_space<smem>>) -> (i32, i32, i32) {
    %c0_i32 = arith.constant 0 : i32
    %c0_i32_0 = arith.constant 0 : i32
    %c0_i32_1 = arith.constant 0 : i32
    %c0_i32_2 = arith.constant 0 : i32
    return %c0_i32, %c0_i32_0, %c0_i32_1 : i32, i32, i32
  }
  func.func @transform_8(%arg0: i32, %arg1: i32, %arg2: memref<2xi32, #tpu.memory_space<smem>>) -> (i32, i32, i32) {
    %c0_i32 = arith.constant 0 : i32
    %c0_i32_0 = arith.constant 0 : i32
    %c0_i32_1 = arith.constant 0 : i32
    %c0_i32_2 = arith.constant 0 : i32
    return %c0_i32, %c0_i32_0, %c0_i32_1 : i32, i32, i32
  }
  func.func @transform_9(%arg0: i32, %arg1: i32, %arg2: memref<2xi32, #tpu.memory_space<smem>>) -> (i32, i32, i32) {
    %c0_i32 = arith.constant 0 : i32
    %c0_i32_0 = arith.constant 0 : i32
    %c0_i32_1 = arith.constant 0 : i32
    %c0_i32_2 = arith.constant 0 : i32
    return %c0_i32, %c0_i32_0, %c0_i32_1 : i32, i32, i32
  }
  func.func @transform_10(%arg0: i32, %arg1: i32, %arg2: memref<2xi32, #tpu.memory_space<smem>>) -> (i32, i32, i32) {
    %c0_i32 = arith.constant 0 : i32
    %c0_i32_0 = arith.constant 0 : i32
    %c0_i32_1 = arith.constant 0 : i32
    %c0_i32_2 = arith.constant 0 : i32
    return %c0_i32, %c0_i32_0, %c0_i32_1 : i32, i32, i32
  }
  func.func @transform_11(%arg0: i32, %arg1: i32, %arg2: memref<2xi32, #tpu.memory_space<smem>>) -> (i32, i32, i32) {
    %c0_i32 = arith.constant 0 : i32
    %c0_i32_0 = arith.constant 0 : i32
    %c0_i32_1 = arith.constant 0 : i32
    %c0_i32_2 = arith.constant 0 : i32
    return %c0_i32, %c0_i32_0, %c0_i32_1 : i32, i32, i32
  }
  func.func @transform_12(%arg0: i32, %arg1: i32, %arg2: memref<2xi32, #tpu.memory_space<smem>>) -> (i32, i32, i32) {
    %c0_i32 = arith.constant 0 : i32
    %c0_i32_0 = arith.constant 0 : i32
    %c0_i32_1 = arith.constant 0 : i32
    %c0_i32_2 = arith.constant 0 : i32
    return %c0_i32, %c0_i32_0, %c0_i32_1 : i32, i32, i32
  }
  func.func @transform_13(%arg0: i32, %arg1: i32, %arg2: memref<2xi32, #tpu.memory_space<smem>>) -> (i32, i32) {
    %c0_i32 = arith.constant 0 : i32
    %c0_i32_0 = arith.constant 0 : i32
    %c0_i32_1 = arith.constant 0 : i32
    return %c0_i32, %c0_i32_0 : i32, i32
  }
  func.func @transform_14(%arg0: i32, %arg1: i32, %arg2: memref<2xi32, #tpu.memory_space<smem>>) -> (i32, i32) {
    %c0_i32 = arith.constant 0 : i32
    %c0_i32_0 = arith.constant 0 : i32
    %c0_i32_1 = arith.constant 0 : i32
    return %c0_i32, %c0_i32_0 : i32, i32
  }
  func.func @transform_15(%arg0: i32, %arg1: i32, %arg2: memref<2xi32, #tpu.memory_space<smem>>) -> (i32, i32) {
    %c0_i32 = arith.constant 0 : i32
    %c0_i32_0 = arith.constant 0 : i32
    %c0_i32_1 = arith.constant 0 : i32
    return %c0_i32, %c0_i32_0 : i32, i32
  }
}

</mosaic_0001>

<bundles_post_ra>
// kernel: vlm_forward.1
= control target key start
LH: loop header
LB: loop body
LE: loop exit
PB: predicated region body
PF: predicated region fallthrough
CT: control target
= control target key end

     0   :  { %s6311_s0 = inlined_call_operand.vmem [shape: s32[2], index: 0, kind: input, shape index: {}]   ;;  %s6312_s1 = inlined_call_operand.vmem [shape: bf16[2,32,128], index: 1, kind: input, shape index: {}]   ;;  %s6313_s2 = inlined_call_operand.vmem [shape: bf16[2,1,128], index: 2, kind: input, shape index: {}]   ;;  %s6314_s3 = inlined_call_operand.vmem [shape: bf16[2,1,128], index: 3, kind: input, shape index: {}]   ;;  %s6315_s4 = inlined_call_operand.vmem [shape: bf16[2,128,384], index: 4, kind: input, shape index: {}]   ;;  %s6316_s5 = inlined_call_operand.vmem [shape: bf16[2,1,384], index: 5, kind: input, shape index: {}]   ;;  %s6317_s6 = inlined_call_operand.vmem [shape: bf16[2,128,128], index: 6, kind: input, shape index: {}]   ;;  %s6318_s7 = inlined_call_operand.vmem [shape: bf16[2,1,128], index: 7, kind: input, shape index: {}]   ;;  %s6319_s8 = inlined_call_operand.vmem [shape: bf16[2,1,128], index: 8, kind: input, shape index: {}]   ;;  %s6320_s9 = inlined_call_operand.vmem [shape: bf16[2,1,128], index: 9, kind: input, shape index: {}]   ;;  %s6321_s10 = inlined_call_operand.vmem [shape: bf16[2,128,256], index: 10, kind: input, shape index: {}]   ;;  %s6322_s11 = inlined_call_operand.vmem [shape: bf16[2,1,256], index: 11, kind: input, shape index: {}]   ;;  %s6323_s12 = inlined_call_operand.vmem [shape: bf16[2,256,128], index: 12, kind: input, shape index: {}]   ;;  %s6324_s13 = inlined_call_operand.vmem [shape: bf16[2,1,128], index: 13, kind: input, shape index: {}]   ;;  %s6325_s14 = inlined_call_operand.vmem [shape: bf16[128,256], index: 14, kind: input, shape index: {}]   ;;  %s6326_s15 = inlined_call_operand.vmem [shape: bf16[256,128], index: 15, kind: input, shape index: {}]   ;;  %s6327_s16 = inlined_call_operand.hbm [shape: s32[2,4], index: 16, kind: output, shape index: {}]  }
   0x1   :  { %6328 = sst [smem:[#allocation13_spill]] %s6311_s0 }
   0x2   :  { %6329 = sst [smem:[#allocation14_spill]] %s6312_s1  ;;  %s6332_s23 = sld [smem:[#allocation13_spill]] }
   0x3   :  { %6330 = sst [smem:[#allocation15_spill]] %s6313_s2 }
   0x4   :  { %6331 = sst [smem:[#allocation16_spill]] %s6320_s9 }
   0x8   :  { %s21_s9 = sshll.u32 %s6332_s23, 4  ;;  %s22_s9 = int_to_ptr.vmem [resolvable:$true] %s21_s9 }
   0x9   :  { %s4816_s24 = scalar_lea.vmem %s22_s9, 16  ;;  %p4821_p1 = scmp.lt.s32.totalorder %s22_s9, %s22_s9 }
   0xa   :  { %p4817_p0 = scmp.ne.s32.totalorder %s22_s9, %s4816_s24  ;;  %p4822_p2 = scmp.lt.s32.totalorder %s4816_s24, %s4816_s24 }
   0xc   :  { %p4823_p3 = por %p4822_p2, %p4821_p1 }
   0xe   :  { %p4824_p4 = pnand %p4823_p3, %p4817_p0 }
  0x10   :  { %4827 = shalt.err (!%p4824_p4)  }
  0x11   :  { %s4900_s25 = smov [#allocation8]  }
  0x12   :  { %24 = dma.vmem_to_smem %s22_s9, 16, %s4900_s25, [#allocation7] }
  0x13   :  { %4874 = dma.done.wait [#allocation7], 16 }
  0x14   :  { %4875 = vsyncadd [#allocation7], 4294967280 }
  0x15   :  { %26 = sfence }
  0x16   :  { %27 = vsyncpa [#allocation10], 0  ;;  %s4998_s26 = smov 0   ;;  %s5000_s27 = smov 0  }
  0x17   :  { %s5002_s28 = smov 0   ;;  %s5004_s29 = smov 0  }
  0x18   :  { %s5006_s30 = smov 0  }
  0x19 LB: > { %s42_s0 = sadd.s32 1, %s4890_s28  ;;  %s45_s17 = sadd.s32 1, %s4894_s29  ;;  %s4898_s30 = sphi %s5006_s30, %s33_s30   ;;  %s4894_s29 = sphi %s5004_s29, %s6347_s29   ;;  %s4890_s28 = sphi %s5002_s28, %s6346_s28   ;;  %s4886_s27 = sphi %s5000_s27, %s6345_s27   ;;  %s4882_s26 = sphi %s4998_s26, %s6344_s26  }
  0x1a   : > { %p43_p5 = scmp.ge.s32.totalorder %s42_s0, 2  ;;  %p3909_p6 = scmp.ge.s32.totalorder %s4898_s30, 1 }
  0x1b   : > { %p442_p7 = scmp.lt.s32.totalorder %s4898_s30, 9 }
  0x1c   : > { %s6349_s0 = smov (%p43_p5, %s42_s0), 0  ;;  %s6351_s17 = smov (!%p43_p5, %s45_s17), %s4894_s29 }
  0x1d   : > { %p443_p8 = pnand %p3909_p6, %p442_p7  ;;  %p47_p9 = scmp.ge.s32.totalorder %s6351_s17, 4 }
  0x1e   : > { %p481_p10 = scmp.eq.s32.totalorder (!%p443_p8), %s4886_s27, 0  ;;  %p482_p11 = scmp.eq.s32.totalorder (!%p443_p8), %s4882_s26, 0 }
  0x1f   : > { %s6353_s17 = smov (%p47_p9, %s6351_s17), 0  ;;  %446 = sbr.rel (%p443_p8) target bundleno = 4948 (0x1354), region = 80 }
  0x20   : > { %p483_p12 = pnand (!%p443_p8), %p482_p11, %p481_p10 }
  0x26   : > { %486 = sbr.rel (%p483_p12) target bundleno = 51 (0x33), region = 84  ;;  %s6333_s1 = sld [smem:[#allocation14_spill]] (!%p483_p12)  ;;  %vm511_vm0 = vcmask (!%p483_p12), 25600   ;;  %v4901_v8 = vmov (!%p483_p12), 0  }
  0x27   : > { %512 = vst.msk [vmem:[#allocation9] sm:$0x3] (!%p483_p12), %vm511_vm0, %v4901_v8  ;;  %s513_s18 = sld [smem:[#allocation8]] (!%p483_p12)  ;;  %s3910_s19 = sld [smem:[#allocation8 + $0x1]] (!%p483_p12) }
  0x2c   : > { %v4072_v0 = vld [vmem:[%s6333_s1] sm:$0xff] (!%p483_p12)   ;;  %v4087_v1 = vld [vmem:[%s6333_s1 + $0x8] sm:$0xff] (!%p483_p12)   ;;  %v4088_v2 = vld [vmem:[%s6333_s1 + $0x10] sm:$0xff] (!%p483_p12)  }
  0x2d   : > { %v4073_v3 = vunpack.c.l.bf16 %v4072_v0  ;;  %v4074_v4 = vunpack.c.h.bf16 %v4072_v0  ;;  %v4077_v5 = vunpack.c.l.bf16 %v4087_v1  ;;  %v4078_v6 = vunpack.c.h.bf16 %v4087_v1  ;;  %v4089_v7 = vld [vmem:[%s6333_s1 + $0x18] sm:$0xff]   ;;  %515 = sst [smem:[#allocation6]] %s513_s18 }
  0x2e   : > { %v4081_v9 = vunpack.c.l.bf16 %v4088_v2  ;;  %v4082_v10 = vunpack.c.h.bf16 %v4088_v2  ;;  %v4085_v11 = vunpack.c.l.bf16 %v4089_v7  ;;  %v4086_v12 = vunpack.c.h.bf16 %v4089_v7  ;;  %518 = sst [smem:[#allocation6 + $0x1]] %s3910_s19 }
  0x2f   : > { %503 = vst [vmem:[#allocation2] sm:$0xff] %v4073_v3  ;;  %504 = vst [vmem:[#allocation2 + $0x8] sm:$0xff] %v4074_v4 }
  0x30   : > { %505 = vst [vmem:[#allocation2 + $0x10] sm:$0xff] %v4077_v5  ;;  %506 = vst [vmem:[#allocation2 + $0x18] sm:$0xff] %v4078_v6 }
  0x31   : > { %507 = vst [vmem:[#allocation2 + $0x20] sm:$0xff] %v4081_v9  ;;  %508 = vst [vmem:[#allocation2 + $0x28] sm:$0xff] %v4082_v10 }
  0x32   : > { %509 = vst [vmem:[#allocation2 + $0x30] sm:$0xff] %v4085_v11  ;;  %510 = vst [vmem:[#allocation2 + $0x38] sm:$0xff] %v4086_v12 }
  0x33 PF: > { %p3911_p13 = scmp.ne.s32.totalorder %s4882_s26, 0 }
  0x34   : > { %v538_v16 = vlaneseq (!%p3911_p13)  ;;  %s600_s20 = sld [smem:[#allocation6]] (!%p3911_p13)  ;;  %s3912_s21 = sld [smem:[#allocation6 + $0x1]] (!%p3911_p13)  ;;  %vm682_vm9 = vcmask (!%p3911_p13), 523264   ;;  %v4902_v32 = vmov (!%p3911_p13), -1e+09  }
  0x35   : > { %521 = sbr.rel (%p3911_p13) target bundleno = 78 (0x4e), region = 88 }
  0x36   : > { %v522_v13 = vld [vmem:[#allocation2] sm:$0xff] (!%p3911_p13)  ;;  %v523_v14 = vld [vmem:[#allocation2 + $0x8] sm:$0xff] (!%p3911_p13)  ;;  %v539_v22 = vshrl.u32 (!%p3911_p13), %v538_v16, 7  ;;  %v548_v23 = vand.u32 (!%p3911_p13), 127, %v538_v16 }
  0x37   : > { %v524_v15 = vld [vmem:[#allocation2 + $0x10] sm:$0xff] (!%p3911_p13)  ;;  %530 = vst [vmem:[#allocation3] sm:$0xff] (!%p3911_p13), %v522_v13  ;;  %531 = vst [vmem:[#allocation3 + $0x8] sm:$0xff] (!%p3911_p13), %v523_v14  ;;  %v525_v17 = vld [vmem:[#allocation2 + $0x18] sm:$0xff] (!%p3911_p13) }
  0x38   : > { %532 = vst [vmem:[#allocation3 + $0x10] sm:$0xff] (!%p3911_p13), %v524_v15  ;;  %v526_v18 = vld [vmem:[#allocation2 + $0x20] sm:$0xff] (!%p3911_p13)  ;;  %v527_v19 = vld [vmem:[#allocation2 + $0x28] sm:$0xff] (!%p3911_p13)  ;;  %533 = vst [vmem:[#allocation3 + $0x18] sm:$0xff] (!%p3911_p13), %v525_v17  ;;  %vm574_vm1 = vcmp.lt.s32.totalorder (!%p3911_p13), %v548_v23, 32  ;;  %vm584_vm2 = vcmp.ge.s32.totalorder (!%p3911_p13), %v539_v22, %v548_v23  ;;  %v540_v24 = vadd.s32 (!%p3911_p13), 8, %v539_v22 }
  0x39   : > { %534 = vst [vmem:[#allocation3 + $0x20] sm:$0xff] (!%p3911_p13), %v526_v18  ;;  %535 = vst [vmem:[#allocation3 + $0x28] sm:$0xff] (!%p3911_p13), %v527_v19  ;;  %v528_v20 = vld [vmem:[#allocation2 + $0x30] sm:$0xff] (!%p3911_p13)  ;;  %v529_v21 = vld [vmem:[#allocation2 + $0x38] sm:$0xff] (!%p3911_p13)  ;;  %v541_v25 = vadd.s32 (!%p3911_p13), 16, %v539_v22  ;;  %v542_v27 = vadd.s32 (!%p3911_p13), 24, %v539_v22 }
  0x3a   : > { %536 = vst [vmem:[#allocation3 + $0x30] sm:$0xff] (!%p3911_p13), %v528_v20  ;;  %537 = vst [vmem:[#allocation3 + $0x38] sm:$0xff] (!%p3911_p13), %v529_v21  ;;  %vm643_vm4 = vcmp.ge.s32.totalorder (!%p3911_p13), %v548_v23, 32  ;;  %vm644_vm5 = vcmp.lt.s32.totalorder (!%p3911_p13), %v548_v23, 64  ;;  %v601_v28 = vstv (!%p3911_p13), %s600_s20  ;;  %vm585_vm6 = vcmp.ge.s32.totalorder (!%p3911_p13), %v540_v24, %v548_v23  ;;  %s663_s22 = sadd.s32 (!%p3911_p13), 32, %s3912_s21 }
  0x3b   : > { %vm5049_vm3 = vmand (!%p3911_p13), %vm574_vm1, %vm584_vm2  ;;  %vm5057_vm8 = vcmp.lt.s32.totalorder (!%p3911_p13), %v548_v23, %v601_v28  ;;  %vm586_vm11 = vcmp.ge.s32.totalorder (!%p3911_p13), %v541_v25, %v548_v23  ;;  %v543_v31 = vadd.s32 (!%p3911_p13), 32, %v539_v22  ;;  %vm587_vm14 = vcmp.ge.s32.totalorder (!%p3911_p13), %v542_v27, %v548_v23 }
  0x3c   : > { %vm5053_vm7 = vmand %vm643_vm4, %vm644_vm5  ;;  %v664_v34 = vstv %s663_s22  ;;  %v544_v35 = vadd.s32 40, %v539_v22  ;;  %v545_v37 = vadd.s32 48, %v539_v22  ;;  %v546_v39 = vadd.s32 56, %v539_v22 }
  0x3d   : > { %vm593_vm10 = vmand %vm574_vm1, %vm585_vm6  ;;  %vm588_vm2 = vcmp.ge.s32.totalorder %v543_v31, %v548_v23  ;;  %vm665_vm4 = vcmp.lt.s32.totalorder %v548_v23, %v664_v34 }
  0x3e   : > { %vm603_vm12 = vmand %vm5049_vm3, %vm5057_vm8  ;;  %vm589_vm6 = vcmp.ge.s32.totalorder %v544_v35, %v548_v23 }
  0x3f   : > { %v611_v33 = vsel %vm603_vm12, 0.0, %v4902_v32  ;;  %vm604_vm13 = vmand %vm593_vm10, %vm5057_vm8  ;;  %vm590_vm12 = vcmp.ge.s32.totalorder %v545_v37, %v548_v23 }
  0x40   : > { %683 = vst.msk [vmem:[#allocation4] sm:$0xff] %vm682_vm9, %v611_v33  ;;  %v612_v36 = vsel %vm604_vm13, 0.0, %v4902_v32  ;;  %vm594_vm15 = vmand %vm574_vm1, %vm586_vm11 }
  0x41   : > { %684 = vst.msk [vmem:[#allocation4 + $0x8] sm:$0xff] %vm682_vm9, %v612_v36  ;;  %vm605_vm0 = vmand %vm594_vm15, %vm5057_vm8 }
  0x42   : > { %v613_v38 = vsel %vm605_vm0, 0.0, %v4902_v32  ;;  %vm595_vm3 = vmand %vm574_vm1, %vm587_vm14 }
  0x43   : > { %685 = vst.msk [vmem:[#allocation4 + $0x10] sm:$0xff] %vm682_vm9, %v613_v38  ;;  %vm606_vm5 = vmand %vm595_vm3, %vm5057_vm8  ;;  %vm591_vm8 = vcmp.ge.s32.totalorder %v546_v39, %v548_v23 }
  0x44   : > { %v614_v40 = vsel %vm606_vm5, 0.0, %v4902_v32  ;;  %vm658_vm10 = vmand %vm5053_vm7, %vm588_vm2 }
  0x45   : > { %686 = vst.msk [vmem:[#allocation4 + $0x18] sm:$0xff] %vm682_vm9, %v614_v40  ;;  %vm670_vm11 = vmand %vm658_vm10, %vm665_vm4 }
  0x46   : > { %v678_v41 = vsel %vm670_vm11, 0.0, %v4902_v32  ;;  %vm659_vm1 = vmand %vm5053_vm7, %vm589_vm6 }
  0x47   : > { %687 = vst.msk [vmem:[#allocation4 + $0x20] sm:$0xff] %vm682_vm9, %v678_v41  ;;  %vm671_vm13 = vmand %vm659_vm1, %vm665_vm4 }
  0x48   : > { %v679_v42 = vsel %vm671_vm13, 0.0, %v4902_v32  ;;  %vm660_vm14 = vmand %vm5053_vm7, %vm590_vm12 }
  0x49   : > { %688 = vst.msk [vmem:[#allocation4 + $0x28] sm:$0xff] %vm682_vm9, %v679_v42  ;;  %vm672_vm15 = vmand %vm660_vm14, %vm665_vm4 }
  0x4a   : > { %v680_v43 = vsel %vm672_vm15, 0.0, %v4902_v32  ;;  %vm661_vm0 = vmand %vm5053_vm7, %vm591_vm8 }
  0x4b   : > { %689 = vst.msk [vmem:[#allocation4 + $0x30] sm:$0xff] %vm682_vm9, %v680_v43  ;;  %vm673_vm2 = vmand %vm661_vm0, %vm665_vm4 }
  0x4c   : > { %v681_v44 = vsel %vm673_vm2, 0.0, %v4902_v32 }
  0x4d   : > { %690 = vst.msk [vmem:[#allocation4 + $0x38] sm:$0xff] %vm682_vm9, %v681_v44 }
  0x4e PF: > { %s4064_s23 = smul.u32 192, %s4882_s26  ;;  %v4903_v44 = vmov 0   ;;  %s6340_s2 = sld [smem:[#allocation15_spill]]  ;;  %vm1175_vm7 = vcmask 261120   ;;  %vm1281_vm9 = vcmask 523264   ;;  %vm1805_vm3 = vcmask 523520  }
  0x4f   : > { %1057 = vmatprep.mubr.bf16.mxu0 %v4903_v44  ;;  %s710_s24 = scalar_lea.vmem %s6314_s3, %s4882_s26  ;;  %s865_s25 = smul.u32 3, %s4882_s26  ;;  %vm2148_vm4 = vcmask 785920   ;;  %vm2491_vm5 = vcmask 1048320  }
  0x50   : > { %v691_v45 = vld [vmem:[#allocation3] sm:$0xff]  ;;  %v692_v47 = vld [vmem:[#allocation3 + $0x8] sm:$0xff]  ;;  %s5098_s18 = scalar_lea.vmem %s6315_s4, %s4064_s23  ;;  %s4905_s22 = smov 64  }
  0x51   : > { %v693_v46 = vld [vmem:[#allocation3 + $0x10] sm:$0xff]  ;;  %713 = vadd.xlane.f32.xlu0 %v691_v45  ;;  %v694_v48 = vld [vmem:[#allocation3 + $0x18] sm:$0xff]  ;;  %v4490_v54 = vld [vmem:[%s5098_s18] ss:$12 sps:$4 sm:$0xff]   ;;  %s866_s20 = scalar_lea.vmem %s6316_s5, %s865_s25  ;;  %s4906_s23 = smov 32  }
  0x52   : > { %717 = vadd.xlane.f32.xlu1 %v693_v46  ;;  %v695_v49 = vld [vmem:[#allocation3 + $0x20] sm:$0xff]  ;;  %v696_v50 = vld [vmem:[#allocation3 + $0x28] sm:$0xff]  ;;  %v4498_v28 = vld [vmem:[%s5098_s18 + $0x30] ss:$12 sps:$4 sm:$0xff]   ;;  %p4016_p0 = scmp.ne.s32.totalorder %s4882_s26, 1 }
  0x53   : > { %v697_v51 = vld [vmem:[#allocation3 + $0x30] sm:$0xff]  ;;  %v698_v52 = vld [vmem:[#allocation3 + $0x38] sm:$0xff]  ;;  %v4497_v27 = vld [vmem:[%s5098_s18 + $0x20] ss:$12 sps:$4 sm:$0xff]   ;;  %vm3377_vm6 = vcmask (!%p4016_p0), 1040384   ;;  %vm3520_vm10 = vcmask (!%p4016_p0), 1041408  }
  0x54   : > { %v4488_v53 = vld [vmem:[%s5098_s18 + $0x4] ss:$12 sps:$4 sm:$0xff]   ;;  %v4491_v55 = vld [vmem:[%s5098_s18 + $0x1c] ss:$12 sps:$4 sm:$0xff]   ;;  %v4495_v26 = vld [vmem:[%s5098_s18 + $0x34] ss:$12 sps:$4 sm:$0xff]   ;;  %s707_s21 = scalar_lea.vmem %s6340_s2, %s4882_s26 }
  0x55   : > { %715 = vadd.xlane.f32.xlu0 %v692_v47  ;;  %1025 = vmatprep.subr.bf16.mxu0 %v4488_v53  ;;  %v4493_v56 = vld [vmem:[%s5098_s18 + $0x8] ss:$12 sps:$4 sm:$0xff]   ;;  %v4494_v25 = vld [vmem:[%s5098_s18 + $0x18] ss:$12 sps:$4 sm:$0xff]   ;;  %v4505_v33 = vld [vmem:[%s5098_s18 + $0x50] ss:$12 sps:$4 sm:$0xff]  }
  0x56   : > { %719 = vadd.xlane.f32.xlu1 %v694_v48  ;;  %1026 = vmatpush1.bf16.msra.mxu0 %v4490_v54  ;;  %v4499_v29 = vld [vmem:[%s5098_s18 + $0x4c] ss:$12 sps:$4 sm:$0xff]   ;;  %v4502_v31 = vld [vmem:[%s5098_s18 + $0x48] ss:$12 sps:$4 sm:$0xff]   ;;  %v4503_v32 = vld [vmem:[%s5098_s18 + $0x64] ss:$12 sps:$4 sm:$0xff]  }
  0x57   : > { %1027 = vmatprep.subr.bf16.mxu0 %v4491_v55  ;;  %4240 = vmatprep.subr.bf16.mxu1 %v4493_v56  ;;  %v4501_v30 = vld [vmem:[%s5098_s18 + $0x38] ss:$12 sps:$4 sm:$0xff]   ;;  %v4506_v34 = vld [vmem:[%s5098_s18 + $0x60] ss:$12 sps:$4 sm:$0xff]   ;;  %v4507_v35 = vld [vmem:[%s5098_s18 + $0x7c] ss:$12 sps:$4 sm:$0xff]  }
  0x58   : > { %4241 = vmatpush3.bf16.msra.mxu1 %v4493_v56  ;;  %v4509_v36 = vld [vmem:[%s5098_s18 + $0x68] ss:$12 sps:$4 sm:$0xff]   ;;  %v4510_v37 = vld [vmem:[%s5098_s18 + $0x78] ss:$12 sps:$4 sm:$0xff]   ;;  %v4513_v39 = vld [vmem:[%s5098_s18 + $0x80] ss:$12 sps:$4 sm:$0xff]  }
  0x59   : > { %721 = vadd.xlane.f32.xlu0 %v695_v49  ;;  %4242 = vmatprep.subr.bf16.mxu1 %v4497_v27  ;;  %v4511_v38 = vld [vmem:[%s5098_s18 + $0x94] ss:$12 sps:$4 sm:$0xff]   ;;  %v4514_v40 = vld [vmem:[%s5098_s18 + $0x90] ss:$12 sps:$4 sm:$0xff]   ;;  %v4515_v41 = vld [vmem:[%s5098_s18 + $0xac] ss:$12 sps:$4 sm:$0xff]  }
  0x5a   : > { %723 = vadd.xlane.f32.xlu1 %v696_v50  ;;  %1028 = vmatpush1.bf16.msra.mxu0 %v4494_v25  ;;  %v4517_v42 = vld [vmem:[%s5098_s18 + $0x98] ss:$12 sps:$4 sm:$0xff]   ;;  %v4518_v43 = vld [vmem:[%s5098_s18 + $0xa8] ss:$12 sps:$4 sm:$0xff]   ;;  %vm3838_vm14 = vcmask (!%p4016_p0), 25600  }
  0x5b   : > { %1029 = vmatprep.subr.bf16.mxu0 %v4495_v26 }
  0x5c   : > { %4243 = vmatpush3.bf16.msra.mxu1 %v4497_v27 }
  0x5d   : > { %725 = vadd.xlane.f32.xlu0 %v697_v51  ;;  %4244 = vmatprep.subr.bf16.mxu1 %v4501_v30 }
  0x5e   : > { %727 = vadd.xlane.f32.xlu1 %v698_v52  ;;  %1030 = vmatpush1.bf16.msra.mxu0 %v4498_v28 }
  0x5f   : > { %1031 = vmatprep.subr.bf16.mxu0 %v4499_v29 }
  0x60   : > { %4245 = vmatpush3.bf16.msra.mxu1 %v4501_v30 }
  0x61   : > { %4246 = vmatprep.subr.bf16.mxu1 %v4505_v33 }
  0x62   : > { %1032 = vmatpush1.bf16.msra.mxu0 %v4502_v31 }
  0x63   : > { %1033 = vmatprep.subr.bf16.mxu0 %v4503_v32 }
  0x64   : > { %4247 = vmatpush3.bf16.msra.mxu1 %v4505_v33 }
  0x65   : > { %4248 = vmatprep.subr.bf16.mxu1 %v4509_v36 }
  0x66   : > { %1034 = vmatpush1.bf16.msra.mxu0 %v4506_v34 }
  0x67   : > { %1035 = vmatprep.subr.bf16.mxu0 %v4507_v35 }
  0x68   : > { %4249 = vmatpush3.bf16.msra.mxu1 %v4509_v36 }
  0x69   : > { %4250 = vmatprep.subr.bf16.mxu1 %v4513_v39 }
  0x6a   : > { %1036 = vmatpush1.bf16.msra.mxu0 %v4510_v37 }
  0x6b   : > { %1037 = vmatprep.subr.bf16.mxu0 %v4511_v38 }
  0x6c   : > { %4251 = vmatpush3.bf16.msra.mxu1 %v4513_v39 }
  0x6d   : > { %4252 = vmatprep.subr.bf16.mxu1 %v4517_v42 }
  0x6e   : > { %1038 = vmatpush1.bf16.msra.mxu0 %v4514_v40 }
  0x6f   : > { %1039 = vmatprep.subr.bf16.mxu0 %v4515_v41 }
  0x70   : > { %4253 = vmatpush3.bf16.msra.mxu1 %v4517_v42 }
  0x72   : > { %1040 = vmatpush1.bf16.msra.mxu0 %v4518_v43 }
  0xde   : > { %v714_v57 = vpop.xlane.xlu0 %713 }
  0xdf   : > { %v718_v58 = vpop.xlane.xlu1 %717  ;;  %v730_v59 = vmul.f32 0.0078125, %v714_v57 }
  0xe0   : > { %v732_v60 = vmul.f32 0.0078125, %v718_v58 }
  0xe1   : > { %v5104_v61 = vsub.f32 %v691_v45, %v730_v59  ;;  %v4519_v45 = vld [vmem:[%s5098_s18 + $0xb0] ss:$12 sps:$4 sm:$0xff]  }
  0xe2   : > { %v5106_v62 = vsub.f32 %v693_v46, %v732_v60  ;;  %v716_v63 = vpop.xlane.xlu0 %715  ;;  %4254 = vmatprep.subr.bf16.mxu1 %v4519_v45 }
  0xe3   : > { %v720_v0 = vpop.xlane.xlu1 %719  ;;  %v731_v1 = vmul.f32 0.0078125, %v716_v63  ;;  %v746_v2 = vmul.f32 %v5104_v61, %v5104_v61  ;;  %4255 = vmatpush3.bf16.msra.mxu1 %v4519_v45  ;;  %v708_v63 = vld [vmem:[%s707_s21] sm:$0x1]  ;;  %s4904_s21 = smov 96  }
  0xe4   : > { %v733_v3 = vmul.f32 0.0078125, %v720_v0  ;;  %v748_v4 = vmul.f32 %v5106_v62, %v5106_v62 }
  0xe5   : > { %754 = vadd.xlane.f32.xlu0 %v746_v2  ;;  %v5112_v5 = vsub.f32 %v692_v47, %v731_v1 }
  0xe6   : > { %v5114_v6 = vsub.f32 %v694_v48, %v733_v3  ;;  %v722_v7 = vpop.xlane.xlu0 %721 }
  0xe7   : > { %v724_v8 = vpop.xlane.xlu1 %723  ;;  %v734_v9 = vmul.f32 0.0078125, %v722_v7  ;;  %v747_v10 = vmul.f32 %v5112_v5, %v5112_v5 }
  0xe8   : > { %v735_v11 = vmul.f32 0.0078125, %v724_v8  ;;  %v749_v12 = vmul.f32 %v5114_v6, %v5114_v6 }
  0xe9   : > { %758 = vadd.xlane.f32.xlu0 %v748_v4  ;;  %756 = vadd.xlane.f32.xlu1 %v747_v10  ;;  %v5120_v13 = vsub.f32 %v695_v49, %v734_v9  ;;  %v709_v4 = vunpack.c.l.bf16 %v708_v63  ;;  %v711_v10 = vld [vmem:[%s710_s24] sm:$0x1]  ;;  %s4065_s24 = sshll.u32 %s4882_s26, 6 }
  0xea   : > { %v5122_v14 = vsub.f32 %v696_v50, %v735_v11  ;;  %v726_v15 = vpop.xlane.xlu0 %725  ;;  %s2514_s19 = scalar_lea.vmem %s6317_s6, %s4065_s24  ;;  %s2667_s24 = scalar_lea.vmem %s6319_s8, %s4882_s26 }
  0xeb   : > { %v728_v16 = vpop.xlane.xlu1 %727  ;;  %v736_v17 = vmul.f32 0.0078125, %v726_v15  ;;  %v750_v18 = vmul.f32 %v5120_v13, %v5120_v13 }
  0xec   : > { %v737_v19 = vmul.f32 0.0078125, %v728_v16  ;;  %v751_v20 = vmul.f32 %v5122_v14, %v5122_v14 }
  0xed   : > { %760 = vadd.xlane.f32.xlu1 %v749_v12  ;;  %762 = vadd.xlane.f32.xlu0 %v750_v18  ;;  %v5128_v21 = vsub.f32 %v697_v51, %v736_v17  ;;  %v802_v51 = vlaneseq  ;;  %v712_v17 = vunpack.c.l.bf16 %v711_v10 }
  0xee   : > { %v5130_v22 = vsub.f32 %v698_v52, %v737_v19 }
  0xef   : > { %v752_v23 = vmul.f32 %v5128_v21, %v5128_v21  ;;  %v5162_v58 = vshrl.u32 %v802_v51, 7 }
  0xf0   : > { %v753_v24 = vmul.f32 %v5130_v22, %v5130_v22 }
  0xf1   : > { %764 = vadd.xlane.f32.xlu1 %v751_v20  ;;  %766 = vadd.xlane.f32.xlu0 %v752_v23  ;;  %v5169_v7 = vsub.s32 0, %v5162_v58 }
  0xf3   : > { %v805_v19 = vrot.slane %v709_v4, %v5169_v7  ;;  %v817_v28 = vrot.slane %v712_v17, %v5169_v7 }
  0xf5   : > { %768 = vadd.xlane.f32.xlu1 %v753_v24 }
 0x172   : > { %v755_v46 = vpop.xlane.xlu0 %754 }
 0x173   : > { %v770_v47 = vmul.f32 0.0078125, %v755_v46 }
 0x175   : > { %v778_v48 = vadd.f32 1e-05, %v770_v47 }
 0x176   : > { %v757_v49 = vpop.xlane.xlu1 %756  ;;  %v759_v50 = vpop.xlane.xlu0 %758 }
 0x177   : > { %4568 = vrsqrt.f32 %v778_v48  ;;  %v771_v52 = vmul.f32 0.0078125, %v757_v49  ;;  %v772_v53 = vmul.f32 0.0078125, %v759_v50 }
 0x179   : > { %v779_v54 = vadd.f32 1e-05, %v771_v52  ;;  %v780_v55 = vadd.f32 1e-05, %v772_v53 }
 0x17a   : > { %v761_v56 = vpop.xlane.xlu1 %760  ;;  %v763_v57 = vpop.xlane.xlu0 %762 }
 0x17b   : > { %4570 = vrsqrt.f32 %v779_v54  ;;  %v773_v59 = vmul.f32 0.0078125, %v761_v56  ;;  %v774_v60 = vmul.f32 0.0078125, %v763_v57  ;;  %v880_v57 = vsub.s32 4, %v5162_v58 }
 0x17c   : > { %4572 = vrsqrt.f32 %v780_v55  ;;  %v876_v55 = vsub.s32 2, %v5162_v58 }
 0x17d   : > { %v781_v0 = vadd.f32 1e-05, %v773_v59  ;;  %v782_v1 = vadd.f32 1e-05, %v774_v60 }
 0x17e   : > { %v765_v2 = vpop.xlane.xlu1 %764  ;;  %v767_v3 = vpop.xlane.xlu0 %766 }
 0x17f   : > { %4574 = vrsqrt.f32 %v781_v0  ;;  %v775_v8 = vmul.f32 0.0078125, %v765_v2  ;;  %v776_v9 = vmul.f32 0.0078125, %v767_v3 }
 0x180   : > { %4576 = vrsqrt.f32 %v782_v1 }
 0x181   : > { %v4569_v11 = vpop.eup %4568  ;;  %v783_v12 = vadd.f32 1e-05, %v775_v8  ;;  %v784_v15 = vadd.f32 1e-05, %v776_v9 }
 0x182   : > { %v769_v16 = vpop.xlane.xlu1 %768  ;;  %v794_v18 = vmul.f32 %v4569_v11, %v5104_v61 }
 0x183   : > { %4578 = vrsqrt.f32 %v783_v12  ;;  %v777_v20 = vmul.f32 0.0078125, %v769_v16 }
 0x184   : > { %4580 = vrsqrt.f32 %v784_v15  ;;  %v806_v27 = vmul.f32 %v805_v19, %v794_v18 }
 0x185   : > { %v4571_v23 = vpop.eup %4570  ;;  %v785_v24 = vadd.f32 1e-05, %v777_v20 }
 0x186   : > { %v4573_v25 = vpop.eup %4572  ;;  %v795_v26 = vmul.f32 %v4571_v23, %v5112_v5  ;;  %v818_v33 = vadd.f32 %v817_v28, %v806_v27 }
 0x187   : > { %4582 = vrsqrt.f32 %v785_v24  ;;  %v796_v29 = vmul.f32 %v4573_v25, %v5106_v62 }
 0x188   : > { %v807_v30 = vmul.f32 %v805_v19, %v795_v26 }
 0x189   : > { %v4575_v31 = vpop.eup %4574  ;;  %v808_v32 = vmul.f32 %v805_v19, %v796_v29 }
 0x18a   : > { %v4577_v61 = vpop.eup %4576  ;;  %v819_v34 = vadd.f32 %v817_v28, %v807_v30  ;;  %v797_v35 = vmul.f32 %v4575_v31, %v5114_v6 }
 0x18b   : > { %v798_v36 = vmul.f32 %v4577_v61, %v5120_v13  ;;  %v820_v5 = vadd.f32 %v817_v28, %v808_v32 }
 0x18c   : > { %v826_v37 = vpack.c.bf16 %v819_v34, %v818_v33  ;;  %v809_v38 = vmul.f32 %v805_v19, %v797_v35 }
 0x18d   : > { %v4579_v39 = vpop.eup %4578  ;;  %v810_v42 = vmul.f32 %v805_v19, %v798_v36 }
 0x18e   : > { %v4581_v40 = vpop.eup %4580  ;;  %1058 = vmatmul.mubr.bf16.vlgmr.msra.gmra.mrb[0].mxu0 %v826_v37  ;;  %4256 = vmatprep.mubr.bf16.mxu1 %v826_v37  ;;  %v821_v41 = vadd.f32 %v817_v28, %v809_v38  ;;  %v799_v62 = vmul.f32 %v4579_v39, %v5122_v14 }
 0x18f   : > { %1067 = vmatprep.mubr.bf16.mxu0 %v4903_v44  ;;  %v800_v43 = vmul.f32 %v4581_v40, %v5128_v21  ;;  %v822_v13 = vadd.f32 %v817_v28, %v810_v42  ;;  %v867_v21 = vld [vmem:[%s866_s20] sm:$0x7] }
 0x190   : > { %v827_v45 = vpack.c.bf16 %v821_v41, %v820_v5  ;;  %v811_v46 = vmul.f32 %v805_v19, %v799_v62 }
 0x191   : > { %v4583_v6 = vpop.eup %4582  ;;  %v812_v49 = vmul.f32 %v805_v19, %v800_v43 }
 0x192   : > { %4257 = vmatmul.mubr.bf16.vlgmr.msra.gmra.mrb[0].mxu1 %v827_v45  ;;  %v823_v47 = vadd.f32 %v817_v28, %v811_v46  ;;  %v801_v48 = vmul.f32 %v4583_v6, %v5130_v22  ;;  %v868_v22 = vunpack.c.l.bf16 %v867_v21 }
 0x193   : > { %v824_v14 = vadd.f32 %v817_v28, %v812_v49 }
 0x194   : > { %v828_v50 = vpack.c.bf16 %v823_v47, %v822_v13  ;;  %v813_v52 = vmul.f32 %v805_v19, %v801_v48  ;;  %v873_v56 = vrot.slane %v868_v22, %v5169_v7  ;;  %v877_v59 = vrot.slane %v868_v22, %v876_v55 }
 0x195   : > { %v881_v63 = vrot.slane %v868_v22, %v880_v57 }
 0x196   : > { %1068 = vmatmul.mubr.bf16.gmra.mrb[4].mxu0 %v827_v45  ;;  %4260 = vmatprep.mubr.bf16.mxu1 %v828_v50  ;;  %v825_v53 = vadd.f32 %v817_v28, %v813_v52  ;;  %v5194_v60 = vrot.slane %v873_v56, %v5169_v7  ;;  %v5197_v1 = vrot.slane %v877_v59, %v5169_v7 }
 0x197   : > { %1077 = vmatprep.mubr.bf16.mxu0 %v4903_v44  ;;  %v896_v10 = vrot.slane %v881_v63, %v5169_v7 }
 0x198   : > { %v829_v54 = vpack.c.bf16 %v825_v53, %v824_v14 }
 0x19a   : > { %4261 = vmatmul.mubr.bf16.gmra.mrb[4].mxu1 %v829_v54 }
 0x19e   : > { %1078 = vmatmul.mubr.bf16.gmra.mrb[8].mxu0 %v828_v50 }
 0x19f   : > { %1087 = vmatprep.mubr.bf16.mxu0 %v4903_v44 }
 0x1a6   : > { %1088 = vmatmul.mubr.bf16.gmra.mrb[12].mxu0 %v829_v54 }
 0x261   : > { %v1059_v0 = vpop.f32.mrb[0].mxu0 }
 0x262   : > { %v1061_v2 = vpop.f32.mrb[1].mxu0  ;;  %v1060_v4 = vadd.f32 %v1059_v0, %v5194_v60 }
 0x263   : > { %v1063_v3 = vpop.f32.mrb[2].mxu0  ;;  %v1062_v11 = vadd.f32 %v1061_v2, %v5197_v1 }
 0x264   : > { %v1064_v8 = vadd.f32 %v1063_v3, %v5194_v60  ;;  %v1065_v9 = vpop.f32.mrb[3].mxu0 }
 0x265   : > { %v1066_v12 = vadd.f32 %v1065_v9, %v5197_v1  ;;  %v4258_v15 = vpop.f32.mrb[0].mxu1 }
 0x266   : > { %v5204_v16 = vpack.c.bf16 %v1064_v8, %v1060_v4  ;;  %v1132_v17 = vpop.f32.mrb[1].mxu1  ;;  %v1141_v20 = vadd.f32 %v4258_v15, %v896_v10 }
 0x267   : > { %v5206_v18 = vpack.c.bf16 %v1066_v12, %v1062_v11  ;;  %v4259_v19 = vpop.f32.mrb[2].mxu1  ;;  %v1133_v25 = vadd.f32 %v1132_v17, %v896_v10  ;;  %v5272_v12 = vld [vmem:[#allocation4] sm:$0xff] }
 0x268   : > { %v1144_v23 = vadd.f32 %v4259_v19, %v896_v10  ;;  %v1135_v24 = vpop.f32.mrb[3].mxu1  ;;  %4272 = vmatprep.mubr.msk.bf16.mxu0 %vm1175_vm7, %v5204_v16 }
 0x269   : > { %v1136_v26 = vadd.f32 %v1135_v24, %v896_v10  ;;  %v1069_v27 = vpop.f32.mrb[4].mxu0  ;;  %4416 = vmatprep.subr.msk.bf16.mxu0 %vm1175_vm7, %v5206_v18  ;;  %v1189_v28 = vsel %vm1175_vm7, %v5206_v18, 0 }
 0x26a   : > { %v5214_v29 = vpack.c.bf16 %v1144_v23, %v1141_v20  ;;  %v1071_v30 = vpop.f32.mrb[5].mxu0  ;;  %4265 = vmatpush3.bf16.xpose.msra.mxu0 %v1189_v28  ;;  %v1070_v61 = vadd.f32 %v1069_v27, %v5194_v60  ;;  %v5274_v20 = vld [vmem:[#allocation4 + $0x18] sm:$0xff]  ;;  %v5279_v28 = vld [vmem:[#allocation4 + $0x8] sm:$0xff] }
 0x26b   : > { %v5216_v31 = vpack.c.bf16 %v1136_v26, %v1133_v25  ;;  %v1073_v32 = vpop.f32.mrb[6].mxu0  ;;  %v1072_v35 = vadd.f32 %v1071_v30, %v5197_v1  ;;  %v5276_v25 = vld [vmem:[#allocation4 + $0x10] sm:$0xff] }
 0x26c   : > { %v1074_v33 = vadd.f32 %v1073_v32, %v5194_v60  ;;  %v1075_v34 = vpop.f32.mrb[7].mxu0 }
 0x26d   : > { %v1076_v36 = vadd.f32 %v1075_v34, %v5197_v1  ;;  %v4262_v37 = vpop.f32.mrb[4].mxu1  ;;  %4280 = vmatprep.subr.bf16.mxu1 %v5216_v31 }
 0x26e   : > { %v5223_v38 = vpack.c.bf16 %v1074_v33, %v1070_v61  ;;  %v1148_v39 = vpop.f32.mrb[5].mxu1  ;;  %4281 = vmatpush3.bf16.msra.mxu1 %v5216_v31  ;;  %v1157_v41 = vadd.f32 %v4262_v37, %v896_v10  ;;  %v5286_v37 = vld [vmem:[#allocation4 + $0x20] sm:$0xff] }
 0x26f   : > { %v5226_v5 = vpack.c.bf16 %v1076_v36, %v1072_v35  ;;  %v4263_v40 = vpop.f32.mrb[6].mxu1  ;;  %4282 = vmatprep.subr.bf16.mxu1 %v5214_v29  ;;  %v1149_v43 = vadd.f32 %v1148_v39, %v896_v10  ;;  %v5288_v39 = vld [vmem:[#allocation4 + $0x38] sm:$0xff] }
 0x270   : > { %v1160_v62 = vadd.f32 %v4263_v40, %v896_v10  ;;  %v1151_v42 = vpop.f32.mrb[7].mxu1 }
 0x271   : > { %v1152_v45 = vadd.f32 %v1151_v42, %v896_v10  ;;  %v1079_v46 = vpop.f32.mrb[8].mxu0  ;;  %4417 = vmatprep.subr.msk.bf16.mxu0 %vm1175_vm7, %v5226_v5  ;;  %v1192_v6 = vsel %vm1175_vm7, %v5226_v5, 0 }
 0x272   : > { %v5233_v13 = vpack.c.bf16 %v1160_v62, %v1157_v41  ;;  %v1081_v47 = vpop.f32.mrb[9].mxu0  ;;  %4267 = vmatpush3.bf16.xpose.msra.mxu0 %v1192_v6  ;;  %4283 = vmatpush3.bf16.msra.mxu1 %v5214_v29  ;;  %v1080_v50 = vadd.f32 %v1079_v46, %v5194_v60  ;;  %v5292_v6 = vld [vmem:[#allocation4 + $0x30] sm:$0xff] }
 0x273   : > { %v5236_v48 = vpack.c.bf16 %v1152_v45, %v1149_v43  ;;  %v1083_v49 = vpop.f32.mrb[10].mxu0  ;;  %v1082_v53 = vadd.f32 %v1081_v47, %v5197_v1 }
 0x274   : > { %v1084_v52 = vadd.f32 %v1083_v49, %v5194_v60  ;;  %v1085_v14 = vpop.f32.mrb[11].mxu0 }
 0x275   : > { %v1086_v54 = vadd.f32 %v1085_v14, %v5197_v1  ;;  %4284 = vmatprep.subr.bf16.mxu1 %v5236_v48 }
 0x276   : > { %v5243_v21 = vpack.c.bf16 %v1084_v52, %v1080_v50  ;;  %4285 = vmatpush3.bf16.msra.mxu1 %v5236_v48  ;;  %v5295_v50 = vld [vmem:[#allocation4 + $0x28] sm:$0xff] }
 0x277   : > { %v5246_v22 = vpack.c.bf16 %v1086_v54, %v1082_v53  ;;  %4286 = vmatprep.subr.bf16.mxu1 %v5233_v13 }
 0x279   : > { %v1089_v56 = vpop.f32.mrb[12].mxu0  ;;  %4418 = vmatprep.subr.msk.bf16.mxu0 %vm1175_vm7, %v5246_v22  ;;  %v1195_v57 = vsel %vm1175_vm7, %v5246_v22, 0 }
 0x27a   : > { %v1091_v59 = vpop.f32.mrb[13].mxu0  ;;  %4269 = vmatpush3.bf16.xpose.msra.mxu0 %v1195_v57  ;;  %4287 = vmatpush3.bf16.msra.mxu1 %v5233_v13  ;;  %v1090_v0 = vadd.f32 %v1089_v56, %v5194_v60 }
 0x27b   : > { %v1093_v63 = vpop.f32.mrb[14].mxu0  ;;  %v1092_v4 = vadd.f32 %v1091_v59, %v5197_v1 }
 0x27c   : > { %v1094_v2 = vadd.f32 %v1093_v63, %v5194_v60  ;;  %v1095_v3 = vpop.f32.mrb[15].mxu0 }
 0x27d   : > { %v1096_v8 = vadd.f32 %v1095_v3, %v5197_v1 }
 0x27e   : > { %v5258_v9 = vpack.c.bf16 %v1094_v2, %v1090_v0 }
 0x27f   : > { %v5260_v10 = vpack.c.bf16 %v1096_v8, %v1092_v4 }
 0x281   : > { %4419 = vmatprep.subr.msk.bf16.mxu0 %vm1175_vm7, %v5260_v10  ;;  %v1198_v11 = vsel %vm1175_vm7, %v5260_v10, 0 }
 0x282   : > { %4271 = vmatpush3.bf16.xpose.msra.mxu0 %v1198_v11 }
 0x289   : > { %4273 = vmatmul.mubr.msk.bf16.vlgmr.msra.gmra.mrb[16].mxu0 %vm1175_vm7, %v5223_v38 }
 0x28a   : > { %4276 = vmatprep.mubr.msk.bf16.mxu0 %vm1175_vm7, %v5243_v21 }
 0x291   : > { %4277 = vmatmul.mubr.msk.bf16.gmra.mrb[20].mxu0 %vm1175_vm7, %v5258_v9 }
 0x35c   : > { %v4274_v60 = vpop.f32.mrb[16].mxu0 }
 0x35d   : > { %v1234_v1 = vpop.f32.mrb[17].mxu0  ;;  %v1267_v15 = vmul.f32 0.17677669, %v4274_v60 }
 0x35e   : > { %v1265_v17 = vmul.f32 0.17677669, %v1234_v1  ;;  %v4275_v19 = vpop.f32.mrb[18].mxu0 }
 0x35f   : > { %v1268_v23 = vmul.f32 0.17677669, %v4275_v19  ;;  %v1237_v24 = vpop.f32.mrb[19].mxu0  ;;  %v1275_v61 = vadd.f32 %v1267_v15, %v5276_v25 }
 0x360   : > { %v1266_v26 = vmul.f32 0.17677669, %v1237_v24  ;;  %v1273_v27 = vadd.f32 %v1265_v17, %v5272_v12 }
 0x361   : > { %v1276_v30 = vadd.f32 %v1268_v23, %v5274_v20  ;;  %v1288_v42 = vsel %vm1281_vm9, %v1275_v61, -inf }
 0x362   : > { %v1282_v32 = vsel %vm1281_vm9, %v1273_v27, -inf  ;;  %v1274_v34 = vadd.f32 %v1266_v26, %v5279_v28 }
 0x363   : > { %1283 = vmax.xlane.f32.xlu0 %v1282_v32  ;;  %v1291_v33 = vsel %vm1281_vm9, %v1276_v30, -inf }
 0x364   : > { %1292 = vmax.xlane.f32.xlu1 %v1291_v33  ;;  %v4278_v35 = vpop.f32.mrb[20].mxu0  ;;  %v1285_v46 = vsel %vm1281_vm9, %v1274_v34, -inf }
 0x365   : > { %v1250_v36 = vpop.f32.mrb[21].mxu0  ;;  %v1271_v40 = vmul.f32 0.17677669, %v4278_v35 }
 0x366   : > { %v1269_v41 = vmul.f32 0.17677669, %v1250_v36  ;;  %v4279_v62 = vpop.f32.mrb[22].mxu0 }
 0x367   : > { %v1272_v43 = vmul.f32 0.17677669, %v4279_v62  ;;  %1289 = vmax.xlane.f32.xlu0 %v1288_v42  ;;  %v1253_v45 = vpop.f32.mrb[23].mxu0  ;;  %v1279_v53 = vadd.f32 %v1271_v40, %v5292_v6 }
 0x368   : > { %v1270_v47 = vmul.f32 0.17677669, %v1253_v45  ;;  %1286 = vmax.xlane.f32.xlu1 %v1285_v46  ;;  %v1277_v49 = vadd.f32 %v1269_v41, %v5286_v37 }
 0x369   : > { %v1280_v52 = vadd.f32 %v1272_v43, %v5288_v39  ;;  %v1300_v57 = vsel %vm1281_vm9, %v1279_v53, -inf }
 0x36a   : > { %v1294_v14 = vsel %vm1281_vm9, %v1277_v49, -inf  ;;  %v1278_v56 = vadd.f32 %v1270_v47, %v5295_v50 }
 0x36b   : > { %1295 = vmax.xlane.f32.xlu0 %v1294_v14  ;;  %v1303_v54 = vsel %vm1281_vm9, %v1280_v52, -inf }
 0x36c   : > { %1304 = vmax.xlane.f32.xlu1 %v1303_v54  ;;  %v1297_v59 = vsel %vm1281_vm9, %v1278_v56, -inf }
 0x36f   : > { %1301 = vmax.xlane.f32.xlu0 %v1300_v57 }
 0x370   : > { %1298 = vmax.xlane.f32.xlu1 %v1297_v59 }
 0x381   : > { %1477 = vrot.lane.b32.xlu1 %v5226_v5, %s4904_s21 }
 0x385   : > { %1479 = vrot.lane.b32.xlu1 %v5246_v22, %s4904_s21 }
 0x3f0   : > { %v1284_v63 = vpop.xlane.xlu0 %1283 }
 0x3f1   : > { %v1293_v0 = vpop.xlane.xlu1 %1292  ;;  %v1306_v3 = vsub.f32 %v1273_v27, %v1284_v63 }
 0x3f2   : > { %v1309_v2 = vsub.f32 %v1276_v30, %v1293_v0 }
 0x3f3   : > { %v1314_v15 = vmul.f32 1.442695, %v1306_v3 }
 0x3f4   : > { %v1320_v4 = vmul.f32 1.442695, %v1309_v2  ;;  %v1290_v8 = vpop.xlane.xlu0 %1289 }
 0x3f5   : > { %v1308_v11 = vsub.f32 %v1275_v61, %v1290_v8  ;;  %v1287_v60 = vpop.xlane.xlu1 %1286 }
 0x3f6   : > { %4584 = vpow2.f32 %v1320_v4  ;;  %v1307_v1 = vsub.f32 %v1274_v34, %v1287_v60 }
 0x3f7   : > { %v1318_v17 = vmul.f32 1.442695, %v1308_v11 }
 0x3f8   : > { %v1316_v19 = vmul.f32 1.442695, %v1307_v1  ;;  %v1296_v34 = vpop.xlane.xlu0 %1295 }
 0x3f9   : > { %4586 = vpow2.f32 %v1318_v17  ;;  %v1305_v35 = vpop.xlane.xlu1 %1304  ;;  %v1310_v45 = vsub.f32 %v1277_v49, %v1296_v34 }
 0x3fa   : > { %4588 = vpow2.f32 %v1316_v19  ;;  %v1313_v36 = vsub.f32 %v1280_v52, %v1305_v35 }
 0x3fb   : > { %4590 = vpow2.f32 %v1314_v15  ;;  %v1322_v14 = vmul.f32 1.442695, %v1310_v45 }
 0x3fc   : > { %v1302_v40 = vpop.xlane.xlu0 %1301  ;;  %v1328_v42 = vmul.f32 1.442695, %v1313_v36 }
 0x3fd   : > { %v1299_v41 = vpop.xlane.xlu1 %1298  ;;  %v1312_v62 = vsub.f32 %v1279_v53, %v1302_v40 }
 0x3fe   : > { %v1311_v43 = vsub.f32 %v1278_v56, %v1299_v41  ;;  %4592 = vpow2.f32 %v1328_v42 }
 0x3ff   : > { %v1326_v46 = vmul.f32 1.442695, %v1312_v62 }
 0x400   : > { %v5308_v23 = vpop.eup %4584  ;;  %v1324_v47 = vmul.f32 1.442695, %v1311_v43 }
 0x401   : > { %v1339_v24 = vsel %vm1281_vm9, %v5308_v23, 0.0  ;;  %4594 = vpow2.f32 %v1326_v46  ;;  %v1478_v0 = vpop.permute.xlu1 %1477 }
 0x402   : > { %1340 = vadd.xlane.f32.xlu1 %v1339_v24  ;;  %4596 = vpow2.f32 %v1324_v47  ;;  %v1499_v62 = vsel %vm1175_vm7, %v1478_v0, 0 }
 0x403   : > { %v5312_v26 = vpop.eup %4586  ;;  %4598 = vpow2.f32 %v1322_v14 }
 0x404   : > { %v5314_v27 = vpop.eup %4588  ;;  %v1336_v30 = vsel %vm1281_vm9, %v5312_v26, 0.0 }
 0x405   : > { %v5318_v32 = vpop.eup %4590  ;;  %1337 = vadd.xlane.f32.xlu0 %v1336_v30  ;;  %v1333_v61 = vsel %vm1281_vm9, %v5314_v27, 0.0  ;;  %v1480_v2 = vpop.permute.xlu1 %1479 }
 0x406   : > { %1334 = vadd.xlane.f32.xlu1 %v1333_v61  ;;  %v1330_v33 = vsel %vm1281_vm9, %v5318_v32, 0.0 }
 0x408   : > { %v5328_v54 = vpop.eup %4592 }
 0x409   : > { %1331 = vadd.xlane.f32.xlu0 %v1330_v33  ;;  %v1351_v52 = vsel %vm1281_vm9, %v5328_v54, 0.0 }
 0x40b   : > { %v5330_v57 = vpop.eup %4594 }
 0x40c   : > { %v5334_v59 = vpop.eup %4596  ;;  %v1348_v49 = vsel %vm1281_vm9, %v5330_v57, 0.0 }
 0x40d   : > { %v5338_v53 = vpop.eup %4598  ;;  %v1345_v56 = vsel %vm1281_vm9, %v5334_v59, 0.0 }
 0x40e   : > { %v1342_v63 = vsel %vm1281_vm9, %v5338_v53, 0.0 }
 0x417   : > { %1822 = vrot.lane.b32.xlu1 %v5206_v18, %s4905_s22 }
 0x41f   : > { %1475 = vrot.lane.b32.xlu0 %v5206_v18, %s4904_s21 }
 0x43b   : > { %1352 = vadd.xlane.f32.xlu1 %v1351_v52 }
 0x43e   : > { %1349 = vadd.xlane.f32.xlu0 %v1348_v49 }
 0x43f   : > { %1346 = vadd.xlane.f32.xlu1 %v1345_v56 }
 0x442   : > { %1343 = vadd.xlane.f32.xlu0 %v1342_v63 }
 0x450   : > { %1824 = vrot.lane.b32.xlu1 %v5226_v5, %s4905_s22 }
 0x454   : > { %1465 = vrot.lane.b32.xlu1 %v5223_v38, %s4904_s21 }
 0x458   : > { %1481 = vrot.lane.b32.xlu0 %v5260_v10, %s4904_s21  ;;  %1467 = vrot.lane.b32.xlu1 %v5243_v21, %s4904_s21 }
 0x45c   : > { %1463 = vrot.lane.b32.xlu0 %v5204_v16, %s4904_s21  ;;  %1828 = vrot.lane.b32.xlu1 %v5260_v10, %s4905_s22 }
 0x460   : > { %1826 = vrot.lane.b32.xlu0 %v5246_v22, %s4905_s22  ;;  %1816 = vrot.lane.b32.xlu1 %v5223_v38, %s4905_s22 }
 0x464   : > { %1469 = vrot.lane.b32.xlu0 %v5258_v9, %s4904_s21  ;;  %1820 = vrot.lane.b32.xlu1 %v5258_v9, %s4905_s22 }
 0x468   : > { %1814 = vrot.lane.b32.xlu0 %v5204_v16, %s4905_s22 }
 0x46c   : > { %1818 = vrot.lane.b32.xlu0 %v5243_v21, %s4905_s22 }
 0x48f   : > { %v1341_v3 = vpop.xlane.xlu1 %1340 }
 0x492   : > { %v1338_v4 = vpop.xlane.xlu0 %1337 }
 0x493   : > { %v1335_v8 = vpop.xlane.xlu1 %1334  ;;  %4600 = vrcp.f32 %v1338_v4 }
 0x494   : > { %4602 = vrcp.f32 %v1335_v8 }
 0x495   : > { %4604 = vrcp.f32 %v1341_v3 }
 0x496   : > { %v1332_v11 = vpop.xlane.xlu0 %1331 }
 0x497   : > { %4606 = vrcp.f32 %v1332_v11  ;;  %v1823_v60 = vpop.permute.xlu1 %1822 }
 0x498   : > { %4424 = vmatprep.subr.msk.bf16.mxu0 %vm1175_vm7, %v1823_v60  ;;  %v1843_v1 = vsel %vm1175_vm7, %v1823_v60, 0 }
 0x499   : > { %4329 = vmatpush3.bf16.xpose.msra.mxu0 %v1843_v1 }
 0x49a   : > { %v1476_v15 = vpop.permute.xlu0 %1475 }
 0x49b   : > { %4420 = vmatprep.subr.msk.bf16.mxu1 %vm1175_vm7, %v1476_v15  ;;  %v1496_v41 = vsel %vm1175_vm7, %v1476_v15, 0 }
 0x49d   : > { %v4601_v17 = vpop.eup %4600 }
 0x49e   : > { %v4603_v19 = vpop.eup %4602  ;;  %v1359_v61 = vmul.f32 %v4601_v17, %v5312_v26  ;;  %v1502_v26 = vsel %vm1175_vm7, %v1480_v2, 0 }
 0x49f   : > { %v4605_v24 = vpop.eup %4604  ;;  %v1357_v34 = vmul.f32 %v4603_v19, %v5314_v27 }
 0x4a0   : > { %v1361_v35 = vmul.f32 %v4605_v24, %v5308_v23 }
 0x4a1   : > { %v4607_v30 = vpop.eup %4606 }
 0x4a2   : > { %v1355_v33 = vmul.f32 %v4607_v30, %v5318_v32  ;;  %v1371_v40 = vpack.c.bf16 %v1361_v35, %v1359_v61 }
 0x4a4   : > { %v1370_v36 = vpack.c.bf16 %v1357_v34, %v1355_v33 }
 0x4a6   : > { %4288 = vmatprep.mubr.msk.bf16.mxu1 %vm1281_vm9, %v1370_v36 }
 0x4a7   : > { %4289 = vmatmul.mubr.msk.bf16.vlgmr.msra.gmra.mrb[8].mxu1 %vm1281_vm9, %v1371_v40 }
 0x4a8   : > { %4297 = vmatpush3.bf16.xpose.msra.mxu1 %v1496_v41 }
 0x4a9   : > { %4421 = vmatprep.subr.msk.bf16.mxu1 %vm1175_vm7, %v1478_v0 }
 0x4b0   : > { %4299 = vmatpush3.bf16.xpose.msra.mxu1 %v1499_v62 }
 0x4b1   : > { %4422 = vmatprep.subr.msk.bf16.mxu1 %vm1175_vm7, %v1480_v2 }
 0x4b8   : > { %4301 = vmatpush3.bf16.xpose.msra.mxu1 %v1502_v26 }
 0x4c8   : > { %v1353_v23 = vpop.xlane.xlu1 %1352 }
 0x4cb   : > { %v1350_v27 = vpop.xlane.xlu0 %1349 }
 0x4cc   : > { %v1347_v32 = vpop.xlane.xlu1 %1346  ;;  %4608 = vrcp.f32 %v1350_v27 }
 0x4cd   : > { %4610 = vrcp.f32 %v1347_v32 }
 0x4ce   : > { %4612 = vrcp.f32 %v1353_v23 }
 0x4cf   : > { %v1344_v42 = vpop.xlane.xlu0 %1343 }
 0x4d0   : > { %4614 = vrcp.f32 %v1344_v42  ;;  %v1825_v43 = vpop.permute.xlu1 %1824 }
 0x4d1   : > { %4425 = vmatprep.subr.msk.bf16.mxu0 %vm1175_vm7, %v1825_v43  ;;  %v1846_v45 = vsel %vm1175_vm7, %v1825_v43, 0 }
 0x4d2   : > { %4331 = vmatpush3.bf16.xpose.msra.mxu0 %v1846_v45 }
 0x4d3   : > { %v1482_v46 = vpop.permute.xlu0 %1481 }
 0x4d4   : > { %4423 = vmatprep.subr.msk.bf16.mxu1 %vm1175_vm7, %v1482_v46  ;;  %v1466_v47 = vpop.permute.xlu1 %1465  ;;  %v1505_v14 = vsel %vm1175_vm7, %v1482_v46, 0 }
 0x4d5   : > { %4303 = vmatpush3.bf16.xpose.msra.mxu1 %v1505_v14 }
 0x4d6   : > { %v4609_v52 = vpop.eup %4608 }
 0x4d7   : > { %v1464_v49 = vpop.permute.xlu0 %1463  ;;  %v4611_v56 = vpop.eup %4610  ;;  %v1367_v3 = vmul.f32 %v4609_v52, %v5330_v57 }
 0x4d8   : > { %v1468_v63 = vpop.permute.xlu1 %1467  ;;  %v4613_v0 = vpop.eup %4612  ;;  %v1365_v11 = vmul.f32 %v4611_v56, %v5334_v59 }
 0x4d9   : > { %v1369_v15 = vmul.f32 %v4613_v0, %v5328_v54 }
 0x4da   : > { %v4615_v2 = vpop.eup %4614 }
 0x4db   : > { %v1827_v4 = vpop.permute.xlu0 %1826  ;;  %v1363_v8 = vmul.f32 %v4615_v2, %v5338_v53  ;;  %v1373_v19 = vpack.c.bf16 %v1369_v15, %v1367_v3 }
 0x4dc   : > { %4426 = vmatprep.subr.msk.bf16.mxu0 %vm1175_vm7, %v1827_v4  ;;  %v1829_v60 = vpop.permute.xlu1 %1828  ;;  %v1849_v1 = vsel %vm1175_vm7, %v1827_v4, 0 }
 0x4dd   : > { %4333 = vmatpush3.bf16.xpose.msra.mxu0 %v1849_v1  ;;  %v1372_v17 = vpack.c.bf16 %v1365_v11, %v1363_v8  ;;  %v1852_v59 = vsel %vm1175_vm7, %v1829_v60, 0 }
 0x4de   : > { %4427 = vmatprep.subr.msk.bf16.mxu0 %vm1175_vm7, %v1829_v60 }
 0x4df   : > { %v1470_v24 = vpop.permute.xlu0 %1469  ;;  %4292 = vmatprep.mubr.msk.bf16.mxu1 %vm1281_vm9, %v1372_v17 }
 0x4e0   : > { %4293 = vmatmul.mubr.msk.bf16.gmra.mrb[12].mxu1 %vm1281_vm9, %v1373_v19  ;;  %v1817_v54 = vpop.permute.xlu1 %1816 }
 0x4e1   : > { %4304 = vmatprep.mubr.msk.bf16.mxu1 %vm1175_vm7, %v1464_v49 }
 0x4e3   : > { %v1815_v57 = vpop.permute.xlu0 %1814 }
 0x4e4   : > { %4336 = vmatprep.mubr.msk.bf16.mxu0 %vm1175_vm7, %v1815_v57  ;;  %v1821_v30 = vpop.permute.xlu1 %1820 }
 0x4e5   : > { %4335 = vmatpush3.bf16.xpose.msra.mxu0 %v1852_v59 }
 0x4e7   : > { %v1819_v53 = vpop.permute.xlu0 %1818 }
 0x4e8   : > { %4305 = vmatmul.mubr.msk.bf16.vlgmr.msra.gmra.mrb[16].mxu1 %vm1175_vm7, %v1466_v47 }
 0x4e9   : > { %4308 = vmatprep.mubr.msk.bf16.mxu1 %vm1175_vm7, %v1468_v63 }
 0x4ec   : > { %4337 = vmatmul.mubr.msk.bf16.vlgmr.msra.gmra.mrb[24].mxu0 %vm1175_vm7, %v1817_v54 }
 0x4ed   : > { %4340 = vmatprep.mubr.msk.bf16.mxu0 %vm1175_vm7, %v1819_v53 }
 0x4f0   : > { %4309 = vmatmul.mubr.msk.bf16.gmra.mrb[20].mxu1 %vm1175_vm7, %v1470_v24 }
 0x4f4   : > { %4341 = vmatmul.mubr.msk.bf16.gmra.mrb[28].mxu0 %vm1175_vm7, %v1821_v30 }
 0x57a   : > { %v4290_v61 = vpop.f32.mrb[8].mxu1 }
 0x57b   : > { %1453 = vst.msk [vmem:[#allocation5 + $0x10] sm:$0xff] %vm1175_vm7, %v4290_v61  ;;  %v1420_v33 = vpop.f32.mrb[9].mxu1 }
 0x57c   : > { %1451 = vst.msk [vmem:[#allocation5] sm:$0xff] %vm1175_vm7, %v1420_v33  ;;  %v4291_v34 = vpop.f32.mrb[10].mxu1 }
 0x57d   : > { %1454 = vst.msk [vmem:[#allocation5 + $0x18] sm:$0xff] %vm1175_vm7, %v4291_v34  ;;  %v1423_v35 = vpop.f32.mrb[11].mxu1 }
 0x57e   : > { %1452 = vst.msk [vmem:[#allocation5 + $0x8] sm:$0xff] %vm1175_vm7, %v1423_v35 }
 0x5b3   : > { %v4294_v36 = vpop.f32.mrb[12].mxu1 }
 0x5b4   : > { %1457 = vst.msk [vmem:[#allocation5 + $0x30] sm:$0xff] %vm1175_vm7, %v4294_v36  ;;  %v1436_v40 = vpop.f32.mrb[13].mxu1 }
 0x5b5   : > { %1455 = vst.msk [vmem:[#allocation5 + $0x20] sm:$0xff] %vm1175_vm7, %v1436_v40  ;;  %v4295_v41 = vpop.f32.mrb[14].mxu1 }
 0x5b6   : > { %1458 = vst.msk [vmem:[#allocation5 + $0x38] sm:$0xff] %vm1175_vm7, %v4295_v41  ;;  %v1439_v62 = vpop.f32.mrb[15].mxu1 }
 0x5b7   : > { %1456 = vst.msk [vmem:[#allocation5 + $0x28] sm:$0xff] %vm1175_vm7, %v1439_v62 }
 0x5bb   : > { %v4306_v26 = vpop.f32.mrb[16].mxu1 }
 0x5bc   : > { %v1541_v23 = vpop.f32.mrb[17].mxu1 }
 0x5bd   : > { %v4307_v27 = vpop.f32.mrb[18].mxu1 }
 0x5be   : > { %v1544_v32 = vpop.f32.mrb[19].mxu1 }
 0x5bf   : > { %v4338_v42 = vpop.f32.mrb[24].mxu0 }
 0x5c0   : > { %v1888_v43 = vpop.f32.mrb[25].mxu0  ;;  %v1921_v45 = vmul.f32 0.17677669, %v4338_v42 }
 0x5c1   : > { %v1919_v46 = vmul.f32 0.17677669, %v1888_v43  ;;  %v4339_v47 = vpop.f32.mrb[26].mxu0  ;;  %v1574_v43 = vmul.f32 0.17677669, %v4306_v26 }
 0x5c2   : > { %v1891_v14 = vpop.f32.mrb[27].mxu0  ;;  %v1922_v52 = vmul.f32 0.17677669, %v4339_v47  ;;  %v5423_v8 = vadd.f32 %v1921_v45, %v5276_v25  ;;  %v1573_v45 = vmul.f32 0.17677669, %v1544_v32 }
 0x5c3   : > { %v1920_v49 = vmul.f32 0.17677669, %v1891_v14  ;;  %v4310_v56 = vpop.f32.mrb[20].mxu1  ;;  %v5413_v63 = vadd.f32 %v1919_v46, %v5272_v12  ;;  %v1572_v46 = vmul.f32 0.17677669, %v1541_v23  ;;  %v5461_v47 = vadd.f32 %v1574_v43, %v5276_v25 }
 0x5c4   : > { %v1557_v0 = vpop.f32.mrb[21].mxu1  ;;  %v5430_v15 = vadd.f32 %v1922_v52, %v5274_v20  ;;  %v1941_v59 = vsel %vm1281_vm9, %v5423_v8, -inf  ;;  %v5464_v14 = vadd.f32 %v1573_v45, %v5279_v28  ;;  %v1575_v52 = vmul.f32 0.17677669, %v4307_v27 }
 0x5c5   : > { %v5415_v2 = vpop.f32.mrb[22].mxu1  ;;  %v1935_v3 = vsel %vm1281_vm9, %v5413_v63, -inf  ;;  %v5420_v4 = vadd.f32 %v1920_v49, %v5279_v28  ;;  %v1594_v49 = vsel %vm1281_vm9, %v5461_v47, -inf  ;;  %v1578_v26 = vmul.f32 0.17677669, %v4310_v56 }
 0x5c6   : > { %v5425_v11 = vpop.f32.mrb[23].mxu1  ;;  %1936 = vmax.xlane.f32.xlu0 %v1935_v3  ;;  %v1944_v61 = vsel %vm1281_vm9, %v5430_v15, -inf  ;;  %v5469_v3 = vadd.f32 %v1572_v46, %v5272_v12  ;;  %v5476_v23 = vadd.f32 %v1575_v52, %v5274_v20  ;;  %v1576_v28 = vmul.f32 0.17677669, %v1557_v0 }
 0x5c7   : > { %v4342_v60 = vpop.f32.mrb[28].mxu0  ;;  %v1938_v1 = vsel %vm1281_vm9, %v5420_v4, -inf  ;;  %v5481_v12 = vadd.f32 %v1578_v26, %v5292_v6  ;;  %v1577_v26 = vmul.f32 0.17677669, %v5425_v11 }
 0x5c8   : > { %1939 = vmax.xlane.f32.xlu1 %v1938_v1  ;;  %v1904_v17 = vpop.f32.mrb[29].mxu0  ;;  %v1925_v19 = vmul.f32 0.17677669, %v4342_v60  ;;  %v1591_v60 = vsel %vm1281_vm9, %v5464_v14, -inf  ;;  %v1588_v25 = vsel %vm1281_vm9, %v5469_v3, -inf  ;;  %v1597_v27 = vsel %vm1281_vm9, %v5476_v23, -inf }
 0x5c9   : > { %v1923_v24 = vmul.f32 0.17677669, %v1904_v17  ;;  %v4343_v57 = vpop.f32.mrb[30].mxu0  ;;  %v1606_v32 = vsel %vm1281_vm9, %v5481_v12, -inf  ;;  %v5486_v56 = vadd.f32 %v1576_v28, %v5286_v37 }
 0x5ca   : > { %1942 = vmax.xlane.f32.xlu0 %v1941_v59  ;;  %v1907_v54 = vpop.f32.mrb[31].mxu0  ;;  %v1926_v53 = vmul.f32 0.17677669, %v4343_v57  ;;  %v5445_v36 = vadd.f32 %v1925_v19, %v5292_v6 }
 0x5cb   : > { %v1924_v30 = vmul.f32 0.17677669, %v1907_v54  ;;  %v5437_v33 = vadd.f32 %v1923_v24, %v5286_v37  ;;  %v1600_v20 = vsel %vm1281_vm9, %v5486_v56, -inf }
 0x5cc   : > { %1945 = vmax.xlane.f32.xlu1 %v1944_v61  ;;  %v5450_v41 = vadd.f32 %v1926_v53, %v5288_v39  ;;  %v1953_v62 = vsel %vm1281_vm9, %v5445_v36, -inf }
 0x5cd   : > { %v1947_v34 = vsel %vm1281_vm9, %v5437_v33, -inf  ;;  %v5442_v35 = vadd.f32 %v1924_v30, %v5295_v50 }
 0x5ce   : > { %1948 = vmax.xlane.f32.xlu0 %v1947_v34  ;;  %v1956_v42 = vsel %vm1281_vm9, %v5450_v41, -inf }
 0x5cf   : > { %v1950_v40 = vsel %vm1281_vm9, %v5442_v35, -inf }
 0x5d0   : > { %1951 = vmax.xlane.f32.xlu1 %v1950_v40 }
 0x5d2   : > { %1954 = vmax.xlane.f32.xlu0 %v1953_v62 }
 0x5d4   : > { %1957 = vmax.xlane.f32.xlu1 %v1956_v42 }
 0x5e5   : > { %1686 = vrot.lane.b32.xlu1 %v5214_v29, %s4904_s21 }
 0x5e8   : > { %1684 = vrot.lane.b32.xlu0 %v5216_v31, %s4904_s21 }
 0x607   : > { %1595 = vmax.xlane.f32.xlu0 %v1594_v49 }
 0x609   : > { %1592 = vmax.xlane.f32.xlu1 %v1591_v60  ;;  %v1579_v60 = vmul.f32 0.17677669, %v5415_v2 }
 0x60b   : > { %1589 = vmax.xlane.f32.xlu0 %v1588_v25  ;;  %v5525_v28 = vadd.f32 %v1579_v60, %v5288_v39 }
 0x60f   : > { %1598 = vmax.xlane.f32.xlu0 %v1597_v27 }
 0x613   : > { %1607 = vmax.xlane.f32.xlu0 %v1606_v32 }
 0x617   : > { %1601 = vmax.xlane.f32.xlu0 %v1600_v20 }
 0x62d   : > { %1688 = vrot.lane.b32.xlu0 %v5236_v48, %s4904_s21 }
 0x653   : > { %v1937_v0 = vpop.xlane.xlu0 %1936 }
 0x654   : > { %v1959_v1 = vsub.f32 %v5413_v63, %v1937_v0  ;;  %v1609_v0 = vsel %vm1281_vm9, %v5525_v28, -inf }
 0x655   : > { %v1940_v6 = vpop.xlane.xlu1 %1939 }
 0x656   : > { %v1967_v17 = vmul.f32 1.442695, %v1959_v1  ;;  %v1960_v19 = vsub.f32 %v5420_v4, %v1940_v6  ;;  %v5531_v1 = vadd.f32 %v1577_v26, %v5295_v50 }
 0x657   : > { %v1943_v24 = vpop.xlane.xlu0 %1942 }
 0x658   : > { %4616 = vpow2.f32 %v1967_v17  ;;  %v1969_v57 = vmul.f32 1.442695, %v1960_v19  ;;  %v1961_v37 = vsub.f32 %v5423_v8, %v1943_v24  ;;  %v1603_v39 = vsel %vm1281_vm9, %v5531_v1, -inf }
 0x659   : > { %v1946_v59 = vpop.xlane.xlu1 %1945 }
 0x65a   : > { %4618 = vpow2.f32 %v1969_v57  ;;  %v1971_v54 = vmul.f32 1.442695, %v1961_v37  ;;  %v1962_v53 = vsub.f32 %v5430_v15, %v1946_v59 }
 0x65b   : > { %v5496_v30 = vpop.xlane.xlu0 %1948 }
 0x65c   : > { %4620 = vpow2.f32 %v1971_v54  ;;  %v1973_v61 = vmul.f32 1.442695, %v1962_v53 }
 0x65d   : > { %v5498_v34 = vpop.xlane.xlu1 %1951 }
 0x65e   : > { %4622 = vpow2.f32 %v1973_v61 }
 0x65f   : > { %v5500_v63 = vpop.xlane.xlu0 %1954 }
 0x661   : > { %v5502_v4 = vpop.xlane.xlu1 %1957 }
 0x662   : > { %v5504_v40 = vpop.eup %4616  ;;  %v1966_v60 = vsub.f32 %v5450_v41, %v5502_v4 }
 0x663   : > { %v1685_v62 = vpop.permute.xlu0 %1684  ;;  %v1983_v8 = vsel %vm1281_vm9, %v5504_v40, 0.0 }
 0x664   : > { %v5508_v42 = vpop.eup %4618  ;;  %4312 = vmatprep.subr.bf16.mxu1 %v1685_v62  ;;  %1984 = vadd.xlane.f32.xlu1 %v1983_v8 }
 0x665   : > { %4313 = vmatpush3.bf16.msra.mxu1 %v1685_v62  ;;  %v1687_v15 = vpop.permute.xlu1 %1686  ;;  %v1986_v43 = vsel %vm1281_vm9, %v5508_v42, 0.0 }
 0x666   : > { %v5512_v45 = vpop.eup %4620  ;;  %1987 = vadd.xlane.f32.xlu0 %v1986_v43  ;;  %4314 = vmatprep.subr.bf16.mxu1 %v1687_v15  ;;  %v1963_v43 = vsub.f32 %v5437_v33, %v5496_v30  ;;  %v1981_v33 = vmul.f32 1.442695, %v1966_v60 }
 0x667   : > { %v1989_v46 = vsel %vm1281_vm9, %v5512_v45, 0.0 }
 0x668   : > { %v5516_v52 = vpop.eup %4622 }
 0x669   : > { %4315 = vmatpush3.bf16.msra.mxu1 %v1687_v15  ;;  %v1992_v49 = vsel %vm1281_vm9, %v5516_v52, 0.0 }
 0x66a   : > { %1990 = vadd.xlane.f32.xlu0 %v1989_v46 }
 0x66e   : > { %1993 = vadd.xlane.f32.xlu0 %v1992_v49  ;;  %v1975_v49 = vmul.f32 1.442695, %v1963_v43 }
 0x675   : > { %1690 = vrot.lane.b32.xlu1 %v5233_v13, %s4904_s21 }
 0x694   : > { %v1596_v25 = vpop.xlane.xlu0 %1595 }
 0x695   : > { %v1614_v27 = vsub.f32 %v5461_v47, %v1596_v25 }
 0x696   : > { %v1593_v59 = vpop.xlane.xlu1 %1592 }
 0x697   : > { %v1624_v32 = vmul.f32 1.442695, %v1614_v27  ;;  %v1613_v54 = vsub.f32 %v5464_v14, %v1593_v59 }
 0x698   : > { %v1590_v20 = vpop.xlane.xlu0 %1589 }
 0x699   : > { %4624 = vpow2.f32 %v1624_v32  ;;  %v1612_v6 = vsub.f32 %v5469_v3, %v1590_v20  ;;  %1610 = vmax.xlane.f32.xlu1 %v1609_v0  ;;  %v1622_v62 = vmul.f32 1.442695, %v1613_v54 }
 0x69b   : > { %v1620_v2 = vmul.f32 1.442695, %v1612_v6 }
 0x69c   : > { %v1599_v11 = vpop.xlane.xlu0 %1598 }
 0x69d   : > { %4626 = vpow2.f32 %v1620_v2  ;;  %1604 = vmax.xlane.f32.xlu1 %v1603_v39  ;;  %v1615_v37 = vsub.f32 %v5476_v23, %v1599_v11  ;;  %v1965_v23 = vsub.f32 %v5445_v36, %v5500_v63 }
 0x69f   : > { %v1626_v53 = vmul.f32 1.442695, %v1615_v37 }
 0x6a0   : > { %v1608_v47 = vpop.xlane.xlu0 %1607 }
 0x6a1   : > { %v1618_v61 = vsub.f32 %v5481_v12, %v1608_v47  ;;  %4628 = vpow2.f32 %v1626_v53  ;;  %v1979_v12 = vmul.f32 1.442695, %v1965_v23 }
 0x6a2   : > { %4630 = vpow2.f32 %v1622_v62 }
 0x6a3   : > { %v5536_v17 = vpop.eup %4624  ;;  %v1632_v15 = vmul.f32 1.442695, %v1618_v61 }
 0x6a4   : > { %v1602_v19 = vpop.xlane.xlu0 %1601  ;;  %v1642_v24 = vsel %vm1281_vm9, %v5536_v17, 0.0 }
 0x6a5   : > { %1643 = vadd.xlane.f32.xlu0 %v1642_v24  ;;  %v1616_v8 = vsub.f32 %v5486_v56, %v1602_v19  ;;  %4632 = vpow2.f32 %v1632_v15 }
 0x6a7   : > { %v5540_v50 = vpop.eup %4626  ;;  %v1628_v46 = vmul.f32 1.442695, %v1616_v8 }
 0x6a8   : > { %v1689_v57 = vpop.permute.xlu0 %1688  ;;  %v1636_v3 = vsel %vm1281_vm9, %v5540_v50, 0.0 }
 0x6a9   : > { %1637 = vadd.xlane.f32.xlu0 %v1636_v3  ;;  %4316 = vmatprep.subr.bf16.mxu1 %v1689_v57  ;;  %4634 = vpow2.f32 %v1628_v46 }
 0x6aa   : > { %4317 = vmatpush3.bf16.msra.mxu1 %v1689_v57  ;;  %4636 = vpow2.f32 %v1975_v49 }
 0x6ab   : > { %v5558_v14 = vpop.eup %4628  ;;  %4638 = vpow2.f32 %v1979_v12  ;;  %v1964_v12 = vsub.f32 %v5442_v35, %v5498_v34 }
 0x6ac   : > { %v1645_v56 = vsel %vm1281_vm9, %v5558_v14, 0.0  ;;  %v5564_v26 = vpop.eup %4630  ;;  %4640 = vpow2.f32 %v1981_v33 }
 0x6ad   : > { %v1639_v36 = vsel %vm1281_vm9, %v5564_v26, 0.0  ;;  %v1977_v60 = vmul.f32 1.442695, %v1964_v12 }
 0x6ae   : > { %2029 = vrot.lane.b32.xlu1 %v5214_v29, %s4905_s22 }
 0x6af   : > { %v5566_v30 = vpop.eup %4632 }
 0x6b0   : > { %v1654_v4 = vsel %vm1281_vm9, %v5566_v30, 0.0 }
 0x6b2   : > { %2031 = vrot.lane.b32.xlu1 %v5236_v48, %s4905_s22 }
 0x6b3   : > { %v5570_v63 = vpop.eup %4634 }
 0x6b4   : > { %v1648_v41 = vsel %vm1281_vm9, %v5570_v63, 0.0  ;;  %v5576_v25 = vpop.eup %4636 }
 0x6b5   : > { %v1995_v27 = vsel %vm1281_vm9, %v5576_v25, 0.0  ;;  %v5580_v32 = vpop.eup %4638 }
 0x6b6   : > { %v2001_v20 = vsel %vm1281_vm9, %v5580_v32, 0.0  ;;  %v5584_v0 = vpop.eup %4640 }
 0x6b7   : > { %v2004_v6 = vsel %vm1281_vm9, %v5584_v0, 0.0 }
 0x6bf   : > { %2027 = vrot.lane.b32.xlu0 %v5216_v31, %s4905_s22 }
 0x6d6   : > { %1646 = vadd.xlane.f32.xlu1 %v1645_v56 }
 0x6da   : > { %1640 = vadd.xlane.f32.xlu1 %v1639_v36 }
 0x6de   : > { %1649 = vadd.xlane.f32.xlu0 %v1648_v41  ;;  %1655 = vadd.xlane.f32.xlu1 %v1654_v4 }
 0x6e2   : > { %1996 = vadd.xlane.f32.xlu0 %v1995_v27 }
 0x6e6   : > { %2002 = vadd.xlane.f32.xlu0 %v2001_v20 }
 0x6ea   : > { %2005 = vadd.xlane.f32.xlu0 %v2004_v6 }
 0x6f1   : > { %v1985_v2 = vpop.xlane.xlu1 %1984 }
 0x6f2   : > { %4642 = vrcp.f32 %v1985_v2 }
 0x6f3   : > { %v1988_v11 = vpop.xlane.xlu0 %1987 }
 0x6f4   : > { %4644 = vrcp.f32 %v1988_v11 }
 0x6f5   : > { %v1691_v39 = vpop.permute.xlu1 %1690 }
 0x6f6   : > { %4318 = vmatprep.subr.bf16.mxu1 %v1691_v39 }
 0x6f7   : > { %v1991_v47 = vpop.xlane.xlu0 %1990  ;;  %4319 = vmatpush3.bf16.msra.mxu1 %v1691_v39 }
 0x6f8   : > { %4646 = vrcp.f32 %v1991_v47 }
 0x6fb   : > { %v1994_v19 = vpop.xlane.xlu0 %1993 }
 0x6fc   : > { %v4643_v24 = vpop.eup %4642  ;;  %4648 = vrcp.f32 %v1994_v19 }
 0x6fd   : > { %v5589_v3 = vmul.f32 %v4643_v24, %v5504_v40 }
 0x6fe   : > { %v4645_v57 = vpop.eup %4644 }
 0x6ff   : > { %v5592_v37 = vmul.f32 %v4645_v57, %v5508_v42 }
 0x700   : > { %2165 = vrot.lane.b32.xlu0 %v5206_v18, %s4906_s23 }
 0x701   : > { %v2023_v59 = vpack.c.bf16 %v5592_v37, %v5589_v3 }
 0x702   : > { %v4647_v54 = vpop.eup %4646 }
 0x703   : > { %v5601_v61 = vmul.f32 %v4647_v54, %v5512_v45 }
 0x704   : > { %2157 = vrot.lane.b32.xlu0 %v5204_v16, %s4906_s23 }
 0x706   : > { %v4649_v53 = vpop.eup %4648 }
 0x707   : > { %v5604_v40 = vmul.f32 %v4649_v53, %v5516_v52 }
 0x708   : > { %2161 = vrot.lane.b32.xlu0 %v5243_v21, %s4906_s23 }
 0x709   : > { %v2024_v18 = vpack.c.bf16 %v5604_v40, %v5601_v61 }
 0x726   : > { %v1611_v42 = vpop.xlane.xlu1 %1610 }
 0x727   : > { %v1619_v62 = vsub.f32 %v5525_v28, %v1611_v42 }
 0x729   : > { %v1634_v8 = vmul.f32 1.442695, %v1619_v62 }
 0x72a   : > { %v1605_v15 = vpop.xlane.xlu1 %1604 }
 0x72b   : > { %4650 = vpow2.f32 %v1634_v8  ;;  %v1617_v16 = vsub.f32 %v5531_v1, %v1605_v15 }
 0x72d   : > { %v1630_v43 = vmul.f32 1.442695, %v1617_v16 }
 0x72e   : > { %v2030_v1 = vpop.permute.xlu1 %2029 }
 0x72f   : > { %4652 = vpow2.f32 %v1630_v43 }
 0x730   : > { %4654 = vpow2.f32 %v1977_v60 }
 0x732   : > { %v1644_v45 = vpop.xlane.xlu0 %1643  ;;  %v2032_v56 = vpop.permute.xlu1 %2031 }
 0x735   : > { %v5612_v46 = vpop.eup %4650 }
 0x736   : > { %v1638_v52 = vpop.xlane.xlu0 %1637  ;;  %v1657_v21 = vsel %vm1281_vm9, %v5612_v46, 0.0 }
 0x737   : > { %1658 = vadd.xlane.f32.xlu1 %v1657_v21 }
 0x739   : > { %v5616_v49 = vpop.eup %4652 }
 0x73a   : > { %v2028_v23 = vpop.permute.xlu0 %2027  ;;  %v1651_v28 = vsel %vm1281_vm9, %v5616_v49, 0.0  ;;  %v5624_v41 = vpop.eup %4654 }
 0x73b   : > { %4344 = vmatprep.subr.bf16.mxu1 %v2028_v23  ;;  %1652 = vadd.xlane.f32.xlu1 %v1651_v28  ;;  %v1998_v27 = vsel %vm1281_vm9, %v5624_v41, 0.0 }
 0x74c   : > { %2033 = vrot.lane.b32.xlu1 %v5233_v13, %s4905_s22 }
 0x763   : > { %v1647_v33 = vpop.xlane.xlu1 %1646 }
 0x764   : > { %4656 = vrcp.f32 %v1647_v33 }
 0x765   : > { %4658 = vrcp.f32 %v1638_v52 }
 0x766   : > { %4660 = vrcp.f32 %v1644_v45 }
 0x767   : > { %v1641_v36 = vpop.xlane.xlu1 %1640 }
 0x768   : > { %4662 = vrcp.f32 %v1641_v36 }
 0x76e   : > { %v4657_v4 = vpop.eup %4656 }
 0x76f   : > { %v4659_v20 = vpop.eup %4658  ;;  %v1667_v35 = vmul.f32 %v4657_v4, %v5558_v14  ;;  %v1656_v14 = vpop.xlane.xlu1 %1655 }
 0x770   : > { %1999 = vadd.xlane.f32.xlu1 %v1998_v27  ;;  %v4661_v6 = vpop.eup %4660  ;;  %v1661_v34 = vmul.f32 %v4659_v20, %v5540_v50 }
 0x771   : > { %v1665_v39 = vmul.f32 %v4661_v6, %v5536_v17  ;;  %v1650_v17 = vpop.xlane.xlu0 %1649 }
 0x772   : > { %v4663_v2 = vpop.eup %4662 }
 0x773   : > { %v1663_v11 = vmul.f32 %v4663_v2, %v5564_v26  ;;  %v1677_v19 = vpack.c.bf16 %v1667_v35, %v1665_v39 }
 0x775   : > { %v1676_v47 = vpack.c.bf16 %v1663_v11, %v1661_v34  ;;  %v1997_v50 = vpop.xlane.xlu0 %1996 }
 0x777   : > { %4320 = vmatprep.mubr.msk.bf16.mxu1 %vm1281_vm9, %v1676_v47 }
 0x778   : > { %4321 = vmatmul.mubr.msk.bf16.vlgmr.msra.gmra.mrb[24].mxu1 %vm1281_vm9, %v1677_v19 }
 0x779   : > { %4345 = vmatpush3.bf16.msra.mxu1 %v2028_v23  ;;  %v2003_v26 = vpop.xlane.xlu0 %2002 }
 0x77a   : > { %4346 = vmatprep.subr.bf16.mxu1 %v2030_v1 }
 0x77d   : > { %4347 = vmatpush3.bf16.msra.mxu1 %v2030_v1 }
 0x77e   : > { %4348 = vmatprep.subr.bf16.mxu1 %v2032_v56 }
 0x781   : > { %4349 = vmatpush3.bf16.msra.mxu1 %v2032_v56  ;;  %2167 = vrot.lane.b32.xlu1 %v5226_v5, %s4906_s23  ;;  %v2006_v5 = vpop.xlane.xlu0 %2005 }
 0x785   : > { %2169 = vrot.lane.b32.xlu1 %v5246_v22, %s4906_s23 }
 0x789   : > { %2171 = vrot.lane.b32.xlu1 %v5260_v10, %s4906_s23  ;;  %v2166_v10 = vpop.permute.xlu0 %2165 }
 0x78a   : > { %v2186_v45 = vsel %vm1175_vm7, %v2166_v10, 0 }
 0x78d   : > { %2159 = vrot.lane.b32.xlu1 %v5223_v38, %s4906_s23  ;;  %v2158_v60 = vpop.permute.xlu0 %2157 }
 0x791   : > { %2163 = vrot.lane.b32.xlu1 %v5258_v9, %s4906_s23  ;;  %v2162_v56 = vpop.permute.xlu0 %2161 }
 0x7c4   : > { %v1659_v24 = vpop.xlane.xlu1 %1658 }
 0x7c5   : > { %4664 = vrcp.f32 %v1659_v24 }
 0x7c6   : > { %4666 = vrcp.f32 %v1650_v17 }
 0x7c7   : > { %4668 = vrcp.f32 %v1656_v14 }
 0x7c8   : > { %v1653_v57 = vpop.xlane.xlu1 %1652 }
 0x7c9   : > { %4670 = vrcp.f32 %v1653_v57 }
 0x7ca   : > { %4672 = vrcp.f32 %v2006_v5 }
 0x7cb   : > { %4674 = vrcp.f32 %v1997_v50 }
 0x7cc   : > { %v2034_v22 = vpop.permute.xlu1 %2033  ;;  %4676 = vrcp.f32 %v2003_v26 }
 0x7cd   : > { %4350 = vmatprep.subr.bf16.mxu1 %v2034_v22 }
 0x7ce   : > { %4351 = vmatpush3.bf16.msra.mxu1 %v2034_v22 }
 0x7cf   : > { %4428 = vmatprep.subr.msk.bf16.mxu1 %vm1175_vm7, %v2166_v10  ;;  %v4665_v38 = vpop.eup %4664 }
 0x7d0   : > { %v4667_v54 = vpop.eup %4666  ;;  %v1675_v42 = vmul.f32 %v4665_v38, %v5612_v46  ;;  %v4760_v38 = vld [vmem:[#allocation4] sm:$0xff] }
 0x7d1   : > { %v4669_v9 = vpop.eup %4668  ;;  %v1669_v62 = vmul.f32 %v4667_v54, %v5570_v63 }
 0x7d2   : > { %v1673_v15 = vmul.f32 %v4669_v9, %v5566_v30 }
 0x7d3   : > { %v4671_v53 = vpop.eup %4670 }
 0x7d4   : > { %v1671_v8 = vmul.f32 %v4671_v53, %v5616_v49  ;;  %v1679_v43 = vpack.c.bf16 %v1675_v42, %v1673_v15  ;;  %v4673_v3 = vpop.eup %4672  ;;  %v4761_v53 = vld [vmem:[#allocation4 + $0x8] sm:$0xff] }
 0x7d6   : > { %v1678_v16 = vpack.c.bf16 %v1671_v8, %v1669_v62  ;;  %v4762_v8 = vld [vmem:[#allocation4 + $0x10] sm:$0xff] }
 0x7d8   : > { %4324 = vmatprep.mubr.msk.bf16.mxu1 %vm1281_vm9, %v1678_v16 }
 0x7d9   : > { %4325 = vmatmul.mubr.msk.bf16.gmra.mrb[28].mxu1 %vm1281_vm9, %v1679_v43 }
 0x7da   : > { %4352 = vmatprep.mubr.msk.bf16.mxu1 %vm1281_vm9, %v2023_v59  ;;  %v4675_v59 = vpop.eup %4674 }
 0x7db   : > { %v4677_v61 = vpop.eup %4676  ;;  %v2016_v52 = vmul.f32 %v4675_v59, %v5576_v25 }
 0x7dc   : > { %v2020_v23 = vmul.f32 %v4677_v61, %v5580_v32 }
 0x7e1   : > { %4353 = vmatmul.mubr.msk.bf16.vlgmr.msra.gmra.mrb[32].mxu1 %vm1281_vm9, %v2024_v18  ;;  %v2022_v18 = vmul.f32 %v4673_v3, %v5584_v0 }
 0x7e2   : > { %4361 = vmatpush3.bf16.xpose.msra.mxu1 %v2186_v45 }
 0x7e3   : > { %v2026_v12 = vpack.c.bf16 %v2022_v18, %v2020_v23 }
 0x7fd   : > { %v2000_v30 = vpop.xlane.xlu1 %1999 }
 0x7fe   : > { %4678 = vrcp.f32 %v2000_v30  ;;  %v4763_v30 = vld [vmem:[#allocation4 + $0x18] sm:$0xff] }
 0x801   : > { %v2168_v63 = vpop.permute.xlu1 %2167 }
 0x802   : > { %v2189_v46 = vsel %vm1175_vm7, %v2168_v63, 0  ;;  %4429 = vmatprep.subr.msk.bf16.mxu1 %vm1175_vm7, %v2168_v63 }
 0x803   : > { %4363 = vmatpush3.bf16.xpose.msra.mxu1 %v2189_v46 }
 0x805   : > { %v2170_v37 = vpop.permute.xlu1 %2169 }
 0x806   : > { %4430 = vmatprep.subr.msk.bf16.mxu1 %vm1175_vm7, %v2170_v37  ;;  %v2192_v49 = vsel %vm1175_vm7, %v2170_v37, 0 }
 0x808   : > { %v4679_v40 = vpop.eup %4678 }
 0x809   : > { %v2018_v21 = vmul.f32 %v4679_v40, %v5624_v41  ;;  %v2172_v28 = vpop.permute.xlu1 %2171 }
 0x80a   : > { %v2195_v25 = vsel %vm1175_vm7, %v2172_v28, 0 }
 0x80b   : > { %4365 = vmatpush3.bf16.xpose.msra.mxu1 %v2192_v49  ;;  %v2025_v1 = vpack.c.bf16 %v2018_v21, %v2016_v52  ;;  %v4764_v52 = vld [vmem:[#allocation4 + $0x20] sm:$0xff]  ;;  %v4765_v49 = vld [vmem:[#allocation4 + $0x28] sm:$0xff] }
 0x80c   : > { %4431 = vmatprep.subr.msk.bf16.mxu1 %vm1175_vm7, %v2172_v28 }
 0x80d   : > { %4356 = vmatprep.mubr.msk.bf16.mxu1 %vm1281_vm9, %v2025_v1  ;;  %v2160_v0 = vpop.permute.xlu1 %2159  ;;  %v4766_v1 = vld [vmem:[#allocation4 + $0x38] sm:$0xff] }
 0x80e   : > { %4357 = vmatmul.mubr.msk.bf16.gmra.mrb[36].mxu1 %vm1281_vm9, %v2026_v12 }
 0x80f   : > { %4368 = vmatprep.mubr.msk.bf16.mxu1 %vm1175_vm7, %v2158_v60 }
 0x811   : > { %v2164_v32 = vpop.permute.xlu1 %2163 }
 0x813   : > { %4367 = vmatpush3.bf16.xpose.msra.mxu1 %v2195_v25  ;;  %v4767_v25 = vld [vmem:[#allocation4 + $0x30] sm:$0xff] }
 0x81a   : > { %4369 = vmatmul.mubr.msk.bf16.vlgmr.msra.gmra.mrb[40].mxu1 %vm1175_vm7, %v2160_v0 }
 0x81b   : > { %4372 = vmatprep.mubr.msk.bf16.mxu1 %vm1175_vm7, %v2162_v56 }
 0x822   : > { %4373 = vmatmul.mubr.msk.bf16.gmra.mrb[44].mxu1 %vm1175_vm7, %v2164_v32 }
 0x823   : > { %2943 = vmatprep.mubr.bf16.mxu1 %v4903_v44 }
 0x84b   : > { %v5677_v33 = vpop.f32.mrb[24].mxu1 }
 0x84c   : > { %v5679_v36 = vpop.f32.mrb[25].mxu1 }
 0x84d   : > { %v5681_v41 = vpop.f32.mrb[26].mxu1 }
 0x84e   : > { %v5683_v4 = vpop.f32.mrb[27].mxu1 }
 0x8ac   : > { %v5685_v27 = vpop.f32.mrb[28].mxu1 }
 0x8ad   : > { %v5687_v20 = vpop.f32.mrb[29].mxu1 }
 0x8ae   : > { %v5689_v6 = vpop.f32.mrb[30].mxu1 }
 0x8af   : > { %v5691_v2 = vpop.f32.mrb[31].mxu1 }
 0x8b4   : > { %v5693_v35 = vpop.f32.mrb[32].mxu1 }
 0x8b5   : > { %v5695_v34 = vpop.f32.mrb[33].mxu1 }
 0x8b6   : > { %v5697_v11 = vpop.f32.mrb[34].mxu1 }
 0x8b7   : > { %v5699_v39 = vpop.f32.mrb[35].mxu1 }
 0x8e1   : > { %v5701_v47 = vpop.f32.mrb[36].mxu1 }
 0x8e2   : > { %v5703_v19 = vpop.f32.mrb[37].mxu1 }
 0x8e3   : > { %v5705_v17 = vpop.f32.mrb[38].mxu1 }
 0x8e4   : > { %v5707_v50 = vpop.f32.mrb[39].mxu1 }
 0x8ed   : > { %v4370_v14 = vpop.f32.mrb[40].mxu1 }
 0x8ee   : > { %v2231_v26 = vpop.f32.mrb[41].mxu1  ;;  %v2264_v24 = vmul.f32 0.17677669, %v4370_v14 }
 0x8ef   : > { %v2262_v5 = vmul.f32 0.17677669, %v2231_v26  ;;  %v4371_v57 = vpop.f32.mrb[42].mxu1 }
 0x8f0   : > { %v2234_v22 = vpop.f32.mrb[43].mxu1  ;;  %v2265_v9 = vmul.f32 0.17677669, %v4371_v57  ;;  %v2272_v15 = vadd.f32 %v4762_v8, %v2264_v24 }
 0x8f1   : > { %v2263_v10 = vmul.f32 0.17677669, %v2234_v22  ;;  %v2270_v54 = vadd.f32 %v4760_v38, %v2262_v5 }
 0x8f2   : > { %v2273_v63 = vadd.f32 %v4763_v30, %v2265_v9  ;;  %v2284_v37 = vsel %vm1281_vm9, %v2272_v15, -inf }
 0x8f3   : > { %v2271_v42 = vadd.f32 %v4761_v53, %v2263_v10  ;;  %v2278_v62 = vsel %vm1281_vm9, %v2270_v54, -inf }
 0x8f4   : > { %2279 = vmax.xlane.f32.xlu0 %v2278_v62  ;;  %v2287_v28 = vsel %vm1281_vm9, %v2273_v63, -inf }
 0x8f5   : > { %v4374_v16 = vpop.f32.mrb[44].mxu1  ;;  %v2281_v43 = vsel %vm1281_vm9, %v2271_v42, -inf }
 0x8f6   : > { %2282 = vmax.xlane.f32.xlu1 %v2281_v43  ;;  %v2247_v45 = vpop.f32.mrb[45].mxu1  ;;  %v2268_v18 = vmul.f32 0.17677669, %v4374_v16 }
 0x8f7   : > { %v2266_v46 = vmul.f32 0.17677669, %v2247_v45  ;;  %v4375_v3 = vpop.f32.mrb[46].mxu1 }
 0x8f8   : > { %2285 = vmax.xlane.f32.xlu0 %v2284_v37  ;;  %v2250_v59 = vpop.f32.mrb[47].mxu1  ;;  %v2269_v61 = vmul.f32 0.17677669, %v4375_v3  ;;  %v2276_v0 = vadd.f32 %v4767_v25, %v2268_v18 }
 0x8f9   : > { %v2267_v40 = vmul.f32 0.17677669, %v2250_v59  ;;  %v2274_v21 = vadd.f32 %v4764_v52, %v2266_v46 }
 0x8fa   : > { %v2277_v12 = vadd.f32 %v4766_v1, %v2269_v61  ;;  %v2296_v14 = vsel %vm1281_vm9, %v2276_v0, -inf }
 0x8fb   : > { %v2275_v23 = vadd.f32 %v4765_v49, %v2267_v40  ;;  %v2290_v56 = vsel %vm1281_vm9, %v2274_v21, -inf }
 0x8fc   : > { %2288 = vmax.xlane.f32.xlu0 %v2287_v28  ;;  %v2299_v32 = vsel %vm1281_vm9, %v2277_v12, -inf }
 0x8fd   : > { %v2293_v60 = vsel %vm1281_vm9, %v2275_v23, -inf }
 0x8fe   : > { %2294 = vmax.xlane.f32.xlu1 %v2293_v60 }
 0x900   : > { %2291 = vmax.xlane.f32.xlu0 %v2290_v56 }
 0x902   : > { %2300 = vmax.xlane.f32.xlu1 %v2299_v32 }
 0x904   : > { %2297 = vmax.xlane.f32.xlu0 %v2296_v14 }
 0x91a   : > { %2370 = vrot.lane.b32.xlu0 %v5216_v31, %s4906_s23 }
 0x981   : > { %v2280_v26 = vpop.xlane.xlu0 %2279 }
 0x982   : > { %v2302_v24 = vsub.f32 %v2270_v54, %v2280_v26 }
 0x983   : > { %v2283_v5 = vpop.xlane.xlu1 %2282 }
 0x984   : > { %v2310_v10 = vmul.f32 1.442695, %v2302_v24  ;;  %v2303_v38 = vsub.f32 %v2271_v42, %v2283_v5 }
 0x985   : > { %v2286_v57 = vpop.xlane.xlu0 %2285 }
 0x986   : > { %v2304_v22 = vsub.f32 %v2272_v15, %v2286_v57  ;;  %v2312_v16 = vmul.f32 1.442695, %v2303_v38 }
 0x988   : > { %v2314_v9 = vmul.f32 1.442695, %v2304_v22 }
 0x989   : > { %v2289_v53 = vpop.xlane.xlu0 %2288 }
 0x98a   : > { %4680 = vpow2.f32 %v2314_v9  ;;  %v2305_v62 = vsub.f32 %v2273_v63, %v2289_v53 }
 0x98b   : > { %v2295_v8 = vpop.xlane.xlu1 %2294  ;;  %4682 = vpow2.f32 %v2310_v10 }
 0x98c   : > { %v2316_v43 = vmul.f32 1.442695, %v2305_v62  ;;  %v2307_v18 = vsub.f32 %v2275_v23, %v2295_v8 }
 0x98d   : > { %v2292_v45 = vpop.xlane.xlu0 %2291 }
 0x98e   : > { %4684 = vpow2.f32 %v2316_v43  ;;  %v2306_v30 = vsub.f32 %v2274_v21, %v2292_v45  ;;  %v2320_v1 = vmul.f32 1.442695, %v2307_v18 }
 0x98f   : > { %4686 = vpow2.f32 %v2312_v16  ;;  %v2301_v31 = vpop.xlane.xlu1 %2300 }
 0x990   : > { %v2318_v15 = vmul.f32 1.442695, %v2306_v30  ;;  %v2309_v37 = vsub.f32 %v2277_v12, %v2301_v31 }
 0x991   : > { %v2298_v46 = vpop.xlane.xlu0 %2297 }
 0x992   : > { %v2308_v54 = vsub.f32 %v2276_v0, %v2298_v46  ;;  %v2324_v52 = vmul.f32 1.442695, %v2309_v37 }
 0x994   : > { %v5719_v3 = vpop.eup %4680  ;;  %v2322_v42 = vmul.f32 1.442695, %v2308_v54 }
 0x995   : > { %v2371_v59 = vpop.permute.xlu0 %2370  ;;  %v2332_v63 = vsel %vm1281_vm9, %v5719_v3, 0.0  ;;  %v4683_v61 = vpop.eup %4682 }
 0x996   : > { %4688 = vpow2.f32 %v2322_v42  ;;  %2333 = vadd.xlane.f32.xlu0 %v2332_v63  ;;  %4376 = vmatprep.subr.bf16.mxu0 %v2371_v59  ;;  %v2326_v21 = vsel %vm1281_vm9, %v4683_v61, 0.0 }
 0x997   : > { %4377 = vmatpush3.bf16.msra.mxu0 %v2371_v59  ;;  %4690 = vpow2.f32 %v2318_v15 }
 0x998   : > { %v5723_v40 = vpop.eup %4684  ;;  %4692 = vpow2.f32 %v2324_v52 }
 0x999   : > { %v2335_v49 = vsel %vm1281_vm9, %v5723_v40, 0.0  ;;  %v4687_v28 = vpop.eup %4686  ;;  %4694 = vpow2.f32 %v2320_v1  ;;  %v4522_v1 = vld [vmem:[%s2514_s19 + $0x10] sm:$0xff]  }
 0x99a   : > { %2327 = vadd.xlane.f32.xlu0 %v2326_v21  ;;  %2336 = vadd.xlane.f32.xlu1 %v2335_v49  ;;  %v2329_v12 = vsel %vm1281_vm9, %v4687_v28, 0.0  ;;  %v4520_v49 = vld [vmem:[%s2514_s19] sm:$0xff]  }
 0x99e   : > { %2330 = vadd.xlane.f32.xlu1 %v2329_v12  ;;  %v4523_v12 = vld [vmem:[%s2514_s19 + $0x18] sm:$0xff]  }
 0x9a0   : > { %v5729_v60 = vpop.eup %4688 }
 0x9a1   : > { %v2344_v23 = vsel %vm1281_vm9, %v5729_v60, 0.0  ;;  %v5733_v25 = vpop.eup %4690 }
 0x9a2   : > { %2345 = vadd.xlane.f32.xlu1 %v2344_v23  ;;  %v2338_v0 = vsel %vm1281_vm9, %v5733_v25, 0.0  ;;  %v5737_v56 = vpop.eup %4692  ;;  %v4525_v23 = vld [vmem:[%s2514_s19 + $0x28] sm:$0xff]  }
 0x9a3   : > { %v2347_v32 = vsel %vm1281_vm9, %v5737_v56, 0.0  ;;  %v5741_v14 = vpop.eup %4694 }
 0x9a4   : > { %v2341_v26 = vsel %vm1281_vm9, %v5741_v14, 0.0 }
 0x9a6   : > { %2339 = vadd.xlane.f32.xlu1 %v2338_v0 }
 0x9aa   : > { %2348 = vadd.xlane.f32.xlu1 %v2347_v32 }
 0x9ae   : > { %2342 = vadd.xlane.f32.xlu1 %v2341_v26 }
 0x9b0   : > { %2374 = vrot.lane.b32.xlu0 %v5236_v48, %s4906_s23 }
 0x9b4   : > { %2376 = vrot.lane.b32.xlu0 %v5233_v13, %s4906_s23 }
 0x9b8   : > { %1781 = vrot.lane.b32.xlu0 %v5679_v36, %s4906_s23 }
 0x9bc   : > { %1785 = vrot.lane.b32.xlu0 %v5677_v33, %s4906_s23 }
 0x9bf   : > { %2372 = vrot.lane.b32.xlu1 %v5214_v29, %s4906_s23 }
 0x9c0   : > { %2124 = vrot.lane.b32.xlu0 %v5695_v34, %s4905_s22 }
 0x9c3   : > { %1783 = vrot.lane.b32.xlu1 %v5683_v4, %s4906_s23 }
 0x9c4   : > { %2128 = vrot.lane.b32.xlu0 %v5693_v35, %s4905_s22 }
 0x9c7   : > { %1787 = vrot.lane.b32.xlu1 %v5681_v41, %s4906_s23 }
 0x9c8   : > { %1789 = vrot.lane.b32.xlu0 %v5687_v20, %s4906_s23 }
 0x9cb   : > { %2126 = vrot.lane.b32.xlu1 %v5699_v39, %s4905_s22 }
 0x9cf   : > { %2130 = vrot.lane.b32.xlu1 %v5697_v11, %s4905_s22 }
 0x9d3   : > { %1791 = vrot.lane.b32.xlu1 %v5691_v2, %s4906_s23 }
 0xa23   : > { %v2334_v29 = vpop.xlane.xlu0 %2333 }
 0xa27   : > { %v2328_v13 = vpop.xlane.xlu0 %2327  ;;  %v2337_v48 = vpop.xlane.xlu1 %2336 }
 0xa28   : > { %4696 = vrcp.f32 %v2328_v13 }
 0xa2b   : > { %v2375_v33 = vpop.permute.xlu0 %2374  ;;  %v2331_v36 = vpop.xlane.xlu1 %2330 }
 0xa2c   : > { %4698 = vrcp.f32 %v2331_v36 }
 0xa2d   : > { %4700 = vrcp.f32 %v2337_v48 }
 0xa2e   : > { %4702 = vrcp.f32 %v2334_v29 }
 0xa2f   : > { %v2377_v41 = vpop.permute.xlu0 %2376  ;;  %v2346_v4 = vpop.xlane.xlu1 %2345 }
 0xa32   : > { %v4697_v34 = vpop.eup %4696 }
 0xa33   : > { %v1782_v20 = vpop.permute.xlu0 %1781  ;;  %v2340_v35 = vpop.xlane.xlu1 %2339  ;;  %v2351_v5 = vmul.f32 %v4697_v34, %v4683_v61 }
 0xa34   : > { %1806 = vst.msk [vmem:[#allocation5] sm:$0xff] %vm1805_vm3, %v1782_v20  ;;  %4704 = vrcp.f32 %v2340_v35 }
 0xa36   : > { %v4699_v39 = vpop.eup %4698 }
 0xa37   : > { %v1786_v11 = vpop.permute.xlu0 %1785  ;;  %v2349_v24 = vpop.xlane.xlu1 %2348  ;;  %v2353_v2 = vmul.f32 %v4699_v39, %v4687_v28  ;;  %v4521_v28 = vld [vmem:[%s2514_s19 + $0x8] sm:$0xff]  }
 0xa38   : > { %1808 = vst.msk [vmem:[#allocation5 + $0x10] sm:$0xff] %vm1805_vm3, %v1786_v11  ;;  %v4701_v53 = vpop.eup %4700 }
 0xa39   : > { %v2366_v57 = vpack.c.bf16 %v2353_v2, %v2351_v5  ;;  %v4703_v16 = vpop.eup %4702  ;;  %v2357_v30 = vmul.f32 %v4701_v53, %v5723_v40 }
 0xa3a   : > { %v2355_v54 = vmul.f32 %v4703_v16, %v5719_v3 }
 0xa3b   : > { %v2125_v22 = vpop.permute.xlu0 %2124  ;;  %4384 = vmatprep.mubr.msk.bf16.mxu0 %vm1281_vm9, %v2366_v57  ;;  %v2343_v10 = vpop.xlane.xlu1 %2342 }
 0xa3c   : > { %2149 = vst.msk [vmem:[#allocation5] sm:$0xff] %vm2148_vm4, %v2125_v22  ;;  %4706 = vrcp.f32 %v2343_v10  ;;  %v2367_v37 = vpack.c.bf16 %v2357_v30, %v2355_v54  ;;  %v4768_v54 = vld [vmem:[#allocation3] sm:$0xff] }
 0xa3d   : > { %4708 = vrcp.f32 %v2349_v24 }
 0xa3e   : > { %4710 = vrcp.f32 %v2346_v4  ;;  %v4705_v43 = vpop.eup %4704 }
 0xa3f   : > { %v2129_v38 = vpop.permute.xlu0 %2128  ;;  %v2373_v9 = vpop.permute.xlu1 %2372  ;;  %v2359_v15 = vmul.f32 %v4705_v43, %v5733_v25  ;;  %v4526_v25 = vld [vmem:[%s2514_s19 + $0x30] sm:$0xff]  }
 0xa40   : > { %2151 = vst.msk [vmem:[#allocation5 + $0x10] sm:$0xff] %vm2148_vm4, %v2129_v38  ;;  %4378 = vmatprep.subr.bf16.mxu0 %v2373_v9 }
 0xa41   : > { %4379 = vmatpush3.bf16.msra.mxu0 %v2373_v9 }
 0xa42   : > { %4380 = vmatprep.subr.bf16.mxu0 %v2375_v33 }
 0xa43   : > { %v1790_v62 = vpop.permute.xlu0 %1789  ;;  %v1784_v8 = vpop.permute.xlu1 %1783 }
 0xa44   : > { %1810 = vst.msk [vmem:[#allocation5 + $0x20] sm:$0xff] %vm1805_vm3, %v1790_v62  ;;  %1807 = vst.msk [vmem:[#allocation5 + $0x8] sm:$0xff] %vm1805_vm3, %v1784_v8 }
 0xa45   : > { %4381 = vmatpush3.bf16.msra.mxu0 %v2375_v33 }
 0xa46   : > { %v4707_v45 = vpop.eup %4706  ;;  %4382 = vmatprep.subr.bf16.mxu0 %v2377_v41 }
 0xa47   : > { %v1788_v31 = vpop.permute.xlu1 %1787  ;;  %v2361_v46 = vmul.f32 %v4707_v45, %v5741_v14  ;;  %v4709_v42 = vpop.eup %4708 }
 0xa48   : > { %1809 = vst.msk [vmem:[#allocation5 + $0x18] sm:$0xff] %vm1805_vm3, %v1788_v31  ;;  %v4711_v61 = vpop.eup %4710  ;;  %v2365_v40 = vmul.f32 %v4709_v42, %v5737_v56  ;;  %v4527_v56 = vld [vmem:[%s2514_s19 + $0x38] sm:$0xff]  }
 0xa49   : > { %4383 = vmatpush3.bf16.msra.mxu0 %v2377_v41  ;;  %v2368_v63 = vpack.c.bf16 %v2361_v46, %v2359_v15  ;;  %v2363_v18 = vmul.f32 %v4711_v61, %v5729_v60  ;;  %v4524_v60 = vld [vmem:[%s2514_s19 + $0x20] sm:$0xff]   ;;  %s6341_s19 = sld [smem:[#allocation16_spill]] }
 0xa4a   : > { %4392 = vmatprep.subr.bf16.mxu0 %v4520_v49 }
 0xa4b   : > { %v2127_v59 = vpop.permute.xlu1 %2126  ;;  %v2369_v52 = vpack.c.bf16 %v2365_v40, %v2363_v18  ;;  %v4770_v40 = vld [vmem:[#allocation3 + $0x8] sm:$0xff] }
 0xa4c   : > { %2150 = vst.msk [vmem:[#allocation5 + $0x8] sm:$0xff] %vm2148_vm4, %v2127_v59  ;;  %4385 = vmatmul.mubr.msk.bf16.vlgmr.msra.gmra.mrb[32].mxu0 %vm1281_vm9, %v2367_v37  ;;  %v4769_v59 = vld [vmem:[#allocation3 + $0x10] sm:$0xff] }
 0xa4d   : > { %4388 = vmatprep.mubr.msk.bf16.mxu0 %vm1281_vm9, %v2368_v63  ;;  %4393 = vmatpush3.bf16.msra.mxu0 %v4520_v49 }
 0xa4e   : > { %4394 = vmatprep.subr.bf16.mxu0 %v4521_v28 }
 0xa4f   : > { %v2131_v3 = vpop.permute.xlu1 %2130  ;;  %s2670_s20 = scalar_lea.vmem %s6341_s19, %s4882_s26  ;;  %s3339_s19 = scalar_lea.vmem %s6324_s13, %s4882_s26 }
 0xa50   : > { %2152 = vst.msk [vmem:[#allocation5 + $0x18] sm:$0xff] %vm2148_vm4, %v2131_v3 }
 0xa51   : > { %4395 = vmatpush3.bf16.msra.mxu0 %v4521_v28 }
 0xa52   : > { %4396 = vmatprep.subr.bf16.mxu0 %v4522_v1 }
 0xa53   : > { %v1792_v21 = vpop.permute.xlu1 %1791 }
 0xa54   : > { %1811 = vst.msk [vmem:[#allocation5 + $0x28] sm:$0xff] %vm1805_vm3, %v1792_v21  ;;  %4389 = vmatmul.mubr.msk.bf16.gmra.mrb[36].mxu0 %vm1281_vm9, %v2369_v52  ;;  %v4771_v21 = vld [vmem:[#allocation3 + $0x18] sm:$0xff] }
 0xa55   : > { %4397 = vmatpush3.bf16.msra.mxu0 %v4522_v1 }
 0xa56   : > { %4398 = vmatprep.subr.bf16.mxu0 %v4523_v12 }
 0xa59   : > { %4399 = vmatpush3.bf16.msra.mxu0 %v4523_v12 }
 0xa5a   : > { %4400 = vmatprep.subr.bf16.mxu0 %v4524_v60 }
 0xa5d   : > { %4401 = vmatpush3.bf16.msra.mxu0 %v4524_v60  ;;  %v4772_v60 = vld [vmem:[#allocation3 + $0x20] sm:$0xff] }
 0xa5e   : > { %4402 = vmatprep.subr.bf16.mxu0 %v4525_v23 }
 0xa61   : > { %4403 = vmatpush3.bf16.msra.mxu0 %v4525_v23 }
 0xa62   : > { %4404 = vmatprep.subr.bf16.mxu0 %v4526_v25 }
 0xa65   : > { %4405 = vmatpush3.bf16.msra.mxu0 %v4526_v25 }
 0xa66   : > { %4406 = vmatprep.subr.bf16.mxu0 %v4527_v56 }
 0xa69   : > { %4407 = vmatpush3.bf16.msra.mxu0 %v4527_v56  ;;  %v4773_v56 = vld [vmem:[#allocation3 + $0x30] sm:$0xff] }
 0xb1f   : > { %v4386_v0 = vpop.f32.mrb[32].mxu0 }
 0xb20   : > { %2471 = vrot.lane.b32.xlu0 %v4386_v0, %s4904_s21  ;;  %v2428_v32 = vpop.f32.mrb[33].mxu0 }
 0xb21   : > { %v4387_v14 = vpop.f32.mrb[34].mxu0 }
 0xb22   : > { %2473 = vrot.lane.b32.xlu1 %v4387_v14, %s4904_s21  ;;  %v2431_v26 = vpop.f32.mrb[35].mxu0 }
 0xb24   : > { %2467 = vrot.lane.b32.xlu0 %v2428_v32, %s4904_s21 }
 0xb26   : > { %2469 = vrot.lane.b32.xlu1 %v2431_v26, %s4904_s21  ;;  %v4774_v26 = vld [vmem:[#allocation3 + $0x28] sm:$0xff] }
 0xb27   : > { %v4390_v29 = vpop.f32.mrb[36].mxu0 }
 0xb28   : > { %1793 = vrot.lane.b32.xlu0 %v5685_v27, %s4906_s23  ;;  %v2444_v13 = vpop.f32.mrb[37].mxu0 }
 0xb29   : > { %v4391_v48 = vpop.f32.mrb[38].mxu0 }
 0xb2a   : > { %1795 = vrot.lane.b32.xlu1 %v5689_v6, %s4906_s23  ;;  %v2447_v33 = vpop.f32.mrb[39].mxu0  ;;  %s4066_s23 = sshll.u32 %s4882_s26, 7 }
 0xb2b   : > { %s5862_s18 = scalar_lea.vmem %s6321_s10, %s4066_s23 }
 0xb2c   : > { %2132 = vrot.lane.b32.xlu0 %v5703_v19, %s4905_s22 }
 0xb2e   : > { %2134 = vrot.lane.b32.xlu1 %v5707_v50, %s4905_s22 }
 0xb30   : > { %2136 = vrot.lane.b32.xlu0 %v5701_v47, %s4905_s22 }
 0xb32   : > { %2138 = vrot.lane.b32.xlu1 %v5705_v17, %s4905_s22  ;;  %s2652_s22 = scalar_lea.vmem %s6318_s7, %s4882_s26 }
 0xb33   : > { %v2653_v43 = vld [vmem:[%s2652_s22] sm:$0x1]  ;;  %s3982_s22 = sshll.u32 %s4882_s26, 1 }
 0xb34   : > { %2475 = vrot.lane.b32.xlu0 %v2444_v13, %s4904_s21  ;;  %v2654_v45 = vunpack.c.l.bf16 %v2653_v43  ;;  %v4775_v13 = vld [vmem:[#allocation3 + $0x38] sm:$0xff]  ;;  %s2809_s25 = scalar_lea.vmem %s6322_s11, %s3982_s22 }
 0xb36   : > { %2477 = vrot.lane.b32.xlu1 %v2447_v33, %s4904_s21  ;;  %v2658_v31 = vrot.slane %v2654_v45, %v5169_v7 }
 0xb38   : > { %2479 = vrot.lane.b32.xlu0 %v4390_v29, %s4904_s21 }
 0xb3a   : > { %2481 = vrot.lane.b32.xlu1 %v4391_v48, %s4904_s21  ;;  %s5871_s21 = scalar_lea.vmem %s6323_s12, %s4066_s23  ;;  %s6134_s23 = sld [smem:[#allocation6 + $0x1]] (!%p4016_p0) }
 0xb40   : > { %s3882_s22 = scalar_lea.vmem (!%p4016_p0), [#allocation3], %s6134_s23 }
 0xb92   : > { %v2472_v27 = vpop.permute.xlu0 %2471 }
 0xb93   : > { %2494 = vst.msk [vmem:[#allocation5 + $0x10] sm:$0xff] %vm2491_vm5, %v2472_v27 }
 0xb94   : > { %v2474_v6 = vpop.permute.xlu1 %2473 }
 0xb95   : > { %2495 = vst.msk [vmem:[#allocation5 + $0x18] sm:$0xff] %vm2491_vm5, %v2474_v6 }
 0xb96   : > { %v2468_v19 = vpop.permute.xlu0 %2467 }
 0xb97   : > { %2492 = vst.msk [vmem:[#allocation5] sm:$0xff] %vm2491_vm5, %v2468_v19  ;;  %v4528_v19 = vld [vmem:[%s5862_s18] ss:$8 sps:$4 sm:$0xff]  }
 0xb98   : > { %v2470_v47 = vpop.permute.xlu1 %2469 }
 0xb99   : > { %2493 = vst.msk [vmem:[#allocation5 + $0x8] sm:$0xff] %vm2491_vm5, %v2470_v47  ;;  %v4530_v47 = vld [vmem:[%s5862_s18 + $0x4] ss:$8 sps:$4 sm:$0xff]  }
 0xb9a   : > { %v1794_v17 = vpop.permute.xlu0 %1793  ;;  %v2502_v39 = vld [vmem:[#allocation5 + $0x10] sm:$0xff]  ;;  %2911 = vmatprep.subr.bf16.mxu1 %v4530_v47 }
 0xb9b   : > { %1812 = vst.msk [vmem:[#allocation5 + $0x30] sm:$0xff] %vm1805_vm3, %v1794_v17  ;;  %v4531_v17 = vld [vmem:[%s5862_s18 + $0x10] ss:$8 sps:$4 sm:$0xff]   ;;  %2912 = vmatpush1.bf16.msra.mxu1 %v4528_v19 }
 0xb9c   : > { %v1796_v50 = vpop.permute.xlu1 %1795  ;;  %v2503_v41 = vld [vmem:[#allocation5 + $0x18] sm:$0xff] }
 0xb9d   : > { %1813 = vst.msk [vmem:[#allocation5 + $0x38] sm:$0xff] %vm1805_vm3, %v1796_v50  ;;  %v2509_v24 = vpack.c.bf16 %v2503_v41, %v2502_v39  ;;  %v4533_v50 = vld [vmem:[%s5862_s18 + $0x14] ss:$8 sps:$4 sm:$0xff]  }
 0xb9e   : > { %v2133_v36 = vpop.permute.xlu0 %2132  ;;  %v2500_v20 = vld [vmem:[#allocation5] sm:$0xff]  ;;  %2913 = vmatprep.subr.bf16.mxu1 %v4533_v50 }
 0xb9f   : > { %2153 = vst.msk [vmem:[#allocation5 + $0x20] sm:$0xff] %vm2148_vm4, %v2133_v36  ;;  %2914 = vmatpush1.bf16.msra.mxu1 %v4531_v17 }
 0xba0   : > { %v2135_v4 = vpop.permute.xlu1 %2134  ;;  %v2501_v35 = vld [vmem:[#allocation5 + $0x8] sm:$0xff] }
 0xba1   : > { %2154 = vst.msk [vmem:[#allocation5 + $0x28] sm:$0xff] %vm2148_vm4, %v2135_v4  ;;  %v2508_v34 = vpack.c.bf16 %v2501_v35, %v2500_v20 }
 0xba2   : > { %v2137_v11 = vpop.permute.xlu0 %2136 }
 0xba3   : > { %2155 = vst.msk [vmem:[#allocation5 + $0x30] sm:$0xff] %vm2148_vm4, %v2137_v11  ;;  %4408 = vmatprep.mubr.bf16.mxu0 %v2508_v34 }
 0xba4   : > { %4409 = vmatmul.mubr.bf16.vlgmr.msra.gmra.mrb[40].mxu0 %v2509_v24  ;;  %v2139_v5 = vpop.permute.xlu1 %2138 }
 0xba5   : > { %2156 = vst.msk [vmem:[#allocation5 + $0x38] sm:$0xff] %vm2148_vm4, %v2139_v5 }
 0xba6   : > { %v2476_v2 = vpop.permute.xlu0 %2475 }
 0xba7   : > { %2496 = vst.msk [vmem:[#allocation5 + $0x20] sm:$0xff] %vm2491_vm5, %v2476_v2 }
 0xba8   : > { %v2478_v57 = vpop.permute.xlu1 %2477 }
 0xba9   : > { %2497 = vst.msk [vmem:[#allocation5 + $0x28] sm:$0xff] %vm2491_vm5, %v2478_v57 }
 0xbaa   : > { %v2480_v22 = vpop.permute.xlu0 %2479 }
 0xbab   : > { %2498 = vst.msk [vmem:[#allocation5 + $0x30] sm:$0xff] %vm2491_vm5, %v2480_v22 }
 0xbac   : > { %v2482_v10 = vpop.permute.xlu1 %2481 }
 0xbad   : > { %2499 = vst.msk [vmem:[#allocation5 + $0x38] sm:$0xff] %vm2491_vm5, %v2482_v10 }
 0xbae   : > { %v2504_v38 = vld [vmem:[#allocation5 + $0x20] sm:$0xff] }
 0xbb0   : > { %v2505_v9 = vld [vmem:[#allocation5 + $0x28] sm:$0xff] }
 0xbb1   : > { %v2510_v53 = vpack.c.bf16 %v2505_v9, %v2504_v38 }
 0xbb2   : > { %v2506_v62 = vld [vmem:[#allocation5 + $0x30] sm:$0xff] }
 0xbb3   : > { %4412 = vmatprep.mubr.bf16.mxu0 %v2510_v53 }
 0xbb4   : > { %v2507_v8 = vld [vmem:[#allocation5 + $0x38] sm:$0xff] }
 0xbb5   : > { %v2511_v16 = vpack.c.bf16 %v2507_v8, %v2506_v62 }
 0xbb7   : > { %4413 = vmatmul.mubr.bf16.gmra.mrb[44].mxu0 %v2511_v16  ;;  %v4536_v16 = vld [vmem:[%s5862_s18 + $0x24] ss:$8 sps:$4 sm:$0xff]  }
 0xbb8   : > { %2915 = vmatprep.subr.bf16.mxu1 %v4536_v16 }
 0xc77   : > { %v4410_v30 = vpop.f32.mrb[40].mxu0 }
 0xc78   : > { %v2613_v46 = vpop.f32.mrb[41].mxu0  ;;  %v2646_v63 = vadd.f32 %v4769_v59, %v4410_v30  ;;  %v4534_v30 = vld [vmem:[%s5862_s18 + $0x20] ss:$8 sps:$4 sm:$0xff]  }
 0xc79   : > { %v2644_v15 = vadd.f32 %v4768_v54, %v2613_v46  ;;  %v4411_v37 = vpop.f32.mrb[42].mxu0  ;;  %2916 = vmatpush1.bf16.msra.mxu1 %v4534_v30 }
 0xc7a   : > { %v2616_v42 = vpop.f32.mrb[43].mxu0  ;;  %v5839_v52 = vadd.f32 %v2658_v31, %v2646_v63  ;;  %v2647_v49 = vadd.f32 %v4771_v21, %v4411_v37 }
 0xc7b   : > { %v5834_v61 = vadd.f32 %v2658_v31, %v2644_v15  ;;  %v2645_v3 = vadd.f32 %v4770_v40, %v2616_v42  ;;  %v4539_v42 = vld [vmem:[%s5862_s18 + $0x34] ss:$8 sps:$4 sm:$0xff]  }
 0xc7c   : > { %v5843_v28 = vadd.f32 %v2658_v31, %v2647_v49  ;;  %2917 = vmatprep.subr.bf16.mxu1 %v4539_v42 }
 0xc7d   : > { %v5836_v18 = vadd.f32 %v2658_v31, %v2645_v3  ;;  %2673 = vadd.xlane.f32.xlu0 %v5834_v61  ;;  %v4537_v3 = vld [vmem:[%s5862_s18 + $0x30] ss:$8 sps:$4 sm:$0xff]  }
 0xc7e   : > { %2918 = vmatpush1.bf16.msra.mxu1 %v4537_v3 }
 0xc7f   : > { %2675 = vadd.xlane.f32.xlu1 %v5836_v18 }
 0xc81   : > { %2677 = vadd.xlane.f32.xlu0 %v5839_v52 }
 0xc85   : > { %2679 = vadd.xlane.f32.xlu0 %v5843_v28 }
 0xc8a   : > { %v4414_v1 = vpop.f32.mrb[44].mxu0 }
 0xc8b   : > { %v2629_v12 = vpop.f32.mrb[45].mxu0  ;;  %v2650_v32 = vadd.f32 %v4773_v56, %v4414_v1  ;;  %v4542_v1 = vld [vmem:[%s5862_s18 + $0x44] ss:$8 sps:$4 sm:$0xff]   ;;  %v4546_v56 = vld [vmem:[%s5862_s18 + $0x60] ss:$8 sps:$4 sm:$0xff]  }
 0xc8c   : > { %v2648_v23 = vadd.f32 %v4772_v60, %v2629_v12  ;;  %v4415_v25 = vpop.f32.mrb[46].mxu0  ;;  %v4540_v60 = vld [vmem:[%s5862_s18 + $0x40] ss:$8 sps:$4 sm:$0xff]   ;;  %2919 = vmatprep.subr.bf16.mxu1 %v4542_v1 }
 0xc8d   : > { %v2632_v0 = vpop.f32.mrb[47].mxu0  ;;  %v2651_v48 = vadd.f32 %v4775_v13, %v4415_v25  ;;  %v5851_v27 = vadd.f32 %v2658_v31, %v2650_v32  ;;  %2920 = vmatpush1.bf16.msra.mxu1 %v4540_v60  ;;  %v4543_v25 = vld [vmem:[%s5862_s18 + $0x50] ss:$8 sps:$4 sm:$0xff]   ;;  %v4551_v32 = vld [vmem:[%s5862_s18 + $0x74] ss:$8 sps:$4 sm:$0xff]  }
 0xc8e   : > { %v5846_v14 = vadd.f32 %v2658_v31, %v2648_v23  ;;  %v2649_v29 = vadd.f32 %v4774_v26, %v2632_v0  ;;  %v4545_v23 = vld [vmem:[%s5862_s18 + $0x54] ss:$8 sps:$4 sm:$0xff]   ;;  %v4548_v0 = vld [vmem:[%s5862_s18 + $0x64] ss:$8 sps:$4 sm:$0xff]   ;;  %v4549_v26 = vld [vmem:[%s5862_s18 + $0x70] ss:$8 sps:$4 sm:$0xff]  }
 0xc8f   : > { %v5854_v6 = vadd.f32 %v2658_v31, %v2651_v48  ;;  %2921 = vmatprep.subr.bf16.mxu1 %v4545_v23  ;;  %s6126_s18 = sld [smem:[#allocation6]] (!%p4016_p0) }
 0xc90   : > { %v5848_v33 = vadd.f32 %v2658_v31, %v2649_v29  ;;  %2681 = vadd.xlane.f32.xlu0 %v5846_v14 }
 0xc91   : > { %2922 = vmatpush1.bf16.msra.mxu1 %v4543_v25 }
 0xc92   : > { %2683 = vadd.xlane.f32.xlu1 %v5848_v33  ;;  %2923 = vmatprep.subr.bf16.mxu1 %v4548_v0 }
 0xc94   : > { %2685 = vadd.xlane.f32.xlu0 %v5851_v27 }
 0xc95   : > { %2924 = vmatpush1.bf16.msra.mxu1 %v4546_v56  ;;  %s3827_s26 = sadd.s32 (!%p4016_p0), 1, %s6126_s18 }
 0xc96   : > { %2687 = vadd.xlane.f32.xlu1 %v5854_v6  ;;  %2925 = vmatprep.subr.bf16.mxu1 %v4551_v32  ;;  %3829 = sst [smem:[#allocation6]] (!%p4016_p0), %s3827_s26 }
 0xc99   : > { %2926 = vmatpush1.bf16.msra.mxu1 %v4549_v26 }
 0xd0a   : > { %v2674_v36 = vpop.xlane.xlu0 %2673 }
 0xd0b   : > { %v2689_v41 = vmul.f32 0.0078125, %v2674_v36 }
 0xd0c   : > { %v2676_v4 = vpop.xlane.xlu1 %2675 }
 0xd0d   : > { %v5874_v20 = vsub.f32 %v5834_v61, %v2689_v41  ;;  %v2690_v35 = vmul.f32 0.0078125, %v2676_v4  ;;  %v2668_v41 = vld [vmem:[%s2667_s24] sm:$0x1]  ;;  %s3831_s24 = sadd.s32 (!%p4016_p0), 1, %s6134_s23 }
 0xd0e   : > { %v2678_v34 = vpop.xlane.xlu0 %2677  ;;  %3833 = sst [smem:[#allocation6 + $0x1]] (!%p4016_p0), %s3831_s24 }
 0xd0f   : > { %v5877_v39 = vsub.f32 %v5836_v18, %v2690_v35  ;;  %v2691_v11 = vmul.f32 0.0078125, %v2678_v34  ;;  %v2705_v24 = vmul.f32 %v5874_v20, %v5874_v20 }
 0xd11   : > { %v5882_v5 = vsub.f32 %v5839_v52, %v2691_v11  ;;  %2713 = vadd.xlane.f32.xlu0 %v2705_v24  ;;  %v2706_v2 = vmul.f32 %v5877_v39, %v5877_v39  ;;  %v2669_v11 = vunpack.c.l.bf16 %v2668_v41  ;;  %v2671_v24 = vld [vmem:[%s2670_s20] sm:$0x1] }
 0xd12   : > { %v2680_v57 = vpop.xlane.xlu0 %2679 }
 0xd13   : > { %v2692_v22 = vmul.f32 0.0078125, %v2680_v57  ;;  %2715 = vadd.xlane.f32.xlu1 %v2706_v2  ;;  %v2707_v10 = vmul.f32 %v5882_v5, %v5882_v5  ;;  %v2672_v57 = vunpack.c.l.bf16 %v2671_v24 }
 0xd15   : > { %v5889_v38 = vsub.f32 %v5843_v28, %v2692_v22  ;;  %2717 = vadd.xlane.f32.xlu0 %v2707_v10  ;;  %v2764_v22 = vrot.slane %v2669_v11, %v5169_v7 }
 0xd17   : > { %v2708_v9 = vmul.f32 %v5889_v38, %v5889_v38 }
 0xd19   : > { %2719 = vadd.xlane.f32.xlu1 %v2708_v9 }
 0xd1d   : > { %v2682_v53 = vpop.xlane.xlu0 %2681 }
 0xd1e   : > { %v2693_v62 = vmul.f32 0.0078125, %v2682_v53 }
 0xd1f   : > { %v2684_v8 = vpop.xlane.xlu1 %2683 }
 0xd20   : > { %v5895_v43 = vsub.f32 %v5846_v14, %v2693_v62  ;;  %v2694_v45 = vmul.f32 0.0078125, %v2684_v8  ;;  %v2776_v62 = vrot.slane %v2672_v57, %v5169_v7 }
 0xd21   : > { %v2686_v31 = vpop.xlane.xlu0 %2685 }
 0xd22   : > { %v5899_v46 = vsub.f32 %v5848_v33, %v2694_v45  ;;  %v2695_v54 = vmul.f32 0.0078125, %v2686_v31  ;;  %v2709_v15 = vmul.f32 %v5895_v43, %v5895_v43 }
 0xd23   : > { %v2688_v37 = vpop.xlane.xlu1 %2687 }
 0xd24   : > { %v5905_v59 = vsub.f32 %v5851_v27, %v2695_v54  ;;  %v2696_v63 = vmul.f32 0.0078125, %v2688_v37  ;;  %2721 = vadd.xlane.f32.xlu0 %v2709_v15  ;;  %v2710_v40 = vmul.f32 %v5899_v46, %v5899_v46 }
 0xd26   : > { %v5911_v21 = vsub.f32 %v5854_v6, %v2696_v63  ;;  %2723 = vadd.xlane.f32.xlu1 %v2710_v40  ;;  %v2711_v49 = vmul.f32 %v5905_v59, %v5905_v59 }
 0xd28   : > { %2725 = vadd.xlane.f32.xlu0 %v2711_v49  ;;  %v2712_v12 = vmul.f32 %v5911_v21, %v5911_v21 }
 0xd2a   : > { %2727 = vadd.xlane.f32.xlu1 %v2712_v12 }
 0xd9e   : > { %v2714_v29 = vpop.xlane.xlu0 %2713 }
 0xd9f   : > { %v2729_v13 = vmul.f32 0.0078125, %v2714_v29 }
 0xda0   : > { %v2716_v48 = vpop.xlane.xlu1 %2715 }
 0xda1   : > { %v2737_v19 = vadd.f32 1e-05, %v2729_v13  ;;  %v2730_v47 = vmul.f32 0.0078125, %v2716_v48 }
 0xda2   : > { %v2718_v17 = vpop.xlane.xlu0 %2717 }
 0xda3   : > { %4712 = vrsqrt.f32 %v2737_v19  ;;  %v2738_v50 = vadd.f32 1e-05, %v2730_v47  ;;  %v2731_v36 = vmul.f32 0.0078125, %v2718_v17 }
 0xda5   : > { %4714 = vrsqrt.f32 %v2738_v50  ;;  %v2739_v4 = vadd.f32 1e-05, %v2731_v36 }
 0xda6   : > { %v2720_v35 = vpop.xlane.xlu1 %2719 }
 0xda7   : > { %4716 = vrsqrt.f32 %v2739_v4  ;;  %v2732_v34 = vmul.f32 0.0078125, %v2720_v35 }
 0xda9   : > { %v2740_v2 = vadd.f32 1e-05, %v2732_v34 }
 0xdab   : > { %4718 = vrsqrt.f32 %v2740_v2 }
 0xdad   : > { %v4713_v10 = vpop.eup %4712 }
 0xdae   : > { %v2753_v9 = vmul.f32 %v4713_v10, %v5874_v20 }
 0xdaf   : > { %v4715_v53 = vpop.eup %4714 }
 0xdb0   : > { %v2765_v8 = vmul.f32 %v2764_v22, %v2753_v9  ;;  %v2754_v16 = vmul.f32 %v4715_v53, %v5877_v39  ;;  %v4552_v9 = vld [vmem:[%s5871_s21 + $0x40] sm:$0xff]   ;;  %v4555_v53 = vld [vmem:[%s5871_s21 + $0x8] sm:$0xff]  }
 0xdb1   : > { %v4717_v45 = vpop.eup %4716  ;;  %v2722_v30 = vpop.xlane.xlu0 %2721  ;;  %4178 = vmatprep.subr.bf16.mxu0 %v4552_v9 }
 0xdb2   : > { %v2766_v31 = vmul.f32 %v2764_v22, %v2754_v16  ;;  %v2733_v54 = vmul.f32 0.0078125, %v2722_v30  ;;  %v2777_v37 = vadd.f32 %v2776_v62, %v2765_v8  ;;  %v2755_v3 = vmul.f32 %v4717_v45, %v5882_v5  ;;  %v4559_v8 = vld [vmem:[%s5871_s21 + $0x18] sm:$0xff]   ;;  %v4560_v16 = vld [vmem:[%s5871_s21 + $0x60] sm:$0xff]   ;;  %v4562_v30 = vld [vmem:[%s5871_s21 + $0x68] sm:$0xff]  }
 0xdb3   : > { %v2724_v15 = vpop.xlane.xlu1 %2723  ;;  %v4561_v45 = vld [vmem:[%s5871_s21 + $0x20] sm:$0xff]  }
 0xdb4   : > { %v2741_v42 = vadd.f32 1e-05, %v2733_v54  ;;  %v2734_v63 = vmul.f32 0.0078125, %v2724_v15  ;;  %v2778_v40 = vadd.f32 %v2776_v62, %v2766_v31  ;;  %v2767_v56 = vmul.f32 %v2764_v22, %v2755_v3  ;;  %v4563_v31 = vld [vmem:[%s5871_s21 + $0x28] sm:$0xff]   ;;  %v4564_v54 = vld [vmem:[%s5871_s21 + $0x70] sm:$0xff]  }
 0xdb5   : > { %v4719_v49 = vpop.eup %4718  ;;  %v2726_v1 = vpop.xlane.xlu0 %2725  ;;  %v4565_v15 = vld [vmem:[%s5871_s21 + $0x30] sm:$0xff]  }
 0xdb6   : > { %4720 = vrsqrt.f32 %v2741_v42  ;;  %v2742_v20 = vadd.f32 1e-05, %v2734_v63  ;;  %v2735_v12 = vmul.f32 0.0078125, %v2726_v1  ;;  %v2785_v60 = vpack.c.bf16 %v2778_v40, %v2777_v37  ;;  %v4566_v37 = vld [vmem:[%s5871_s21 + $0x78] sm:$0xff]   ;;  %v2810_v63 = vld [vmem:[%s2809_s25] sm:$0x3] }
 0xdb7   : > { %v2728_v23 = vpop.xlane.xlu1 %2727  ;;  %v2756_v39 = vmul.f32 %v4719_v49, %v5889_v38  ;;  %v2779_v29 = vadd.f32 %v2776_v62, %v2767_v56  ;;  %v4567_v42 = vld [vmem:[%s5871_s21 + $0x38] sm:$0xff]   ;;  %v2811_v40 = vunpack.c.l.bf16 %v2810_v63 }
 0xdb8   : > { %4722 = vrsqrt.f32 %v2742_v20  ;;  %v2743_v25 = vadd.f32 1e-05, %v2735_v12  ;;  %v2736_v0 = vmul.f32 0.0078125, %v2728_v23  ;;  %2944 = vmatmul.mubr.bf16.vlgmr.msra.gmra.mrb[48].mxu1 %v2785_v60 }
 0xdb9   : > { %2953 = vmatprep.mubr.bf16.mxu1 %v4903_v44  ;;  %v2768_v32 = vmul.f32 %v2764_v22, %v2756_v39  ;;  %v2816_v3 = vrot.slane %v2811_v40, %v5169_v7  ;;  %v2820_v49 = vrot.slane %v2811_v40, %v876_v55 }
 0xdba   : > { %4724 = vrsqrt.f32 %v2743_v25  ;;  %v2744_v26 = vadd.f32 1e-05, %v2736_v0 }
 0xdbb   : > { %v2780_v5 = vadd.f32 %v2776_v62, %v2768_v32  ;;  %v5970_v1 = vrot.slane %v2816_v3, %v5169_v7  ;;  %v5973_v20 = vrot.slane %v2820_v49, %v5169_v7 }
 0xdbc   : > { %4726 = vrsqrt.f32 %v2744_v26 }
 0xdbd   : > { %v2786_v13 = vpack.c.bf16 %v2780_v5, %v2779_v29 }
 0xdc0   : > { %v4721_v48 = vpop.eup %4720  ;;  %2954 = vmatmul.mubr.bf16.gmra.mrb[52].mxu1 %v2786_v13 }
 0xdc1   : > { %2963 = vmatprep.mubr.bf16.mxu1 %v4903_v44  ;;  %v2757_v38 = vmul.f32 %v4721_v48, %v5895_v43 }
 0xdc2   : > { %v4723_v19 = vpop.eup %4722 }
 0xdc3   : > { %v2758_v47 = vmul.f32 %v4723_v19, %v5899_v46  ;;  %v2769_v17 = vmul.f32 %v2764_v22, %v2757_v38 }
 0xdc4   : > { %v4725_v50 = vpop.eup %4724 }
 0xdc5   : > { %v2770_v36 = vmul.f32 %v2764_v22, %v2758_v47  ;;  %v2781_v4 = vadd.f32 %v2776_v62, %v2769_v17  ;;  %v2759_v34 = vmul.f32 %v4725_v50, %v5905_v59  ;;  %v4553_v59 = vld [vmem:[%s5871_s21] sm:$0xff]  }
 0xdc6   : > { %v4727_v41 = vpop.eup %4726  ;;  %4179 = vmatpush3.bf16.msra.mxu0 %v4553_v59 }
 0xdc7   : > { %v2782_v35 = vadd.f32 %v2776_v62, %v2770_v36  ;;  %v2760_v11 = vmul.f32 %v4727_v41, %v5911_v21  ;;  %v2771_v43 = vmul.f32 %v2764_v22, %v2759_v34  ;;  %v4554_v21 = vld [vmem:[%s5871_s21 + $0x48] sm:$0xff]  }
 0xdc8   : > { %4180 = vmatprep.subr.bf16.mxu0 %v4554_v21 }
 0xdc9   : > { %v2787_v24 = vpack.c.bf16 %v2782_v35, %v2781_v4  ;;  %v2772_v2 = vmul.f32 %v2764_v22, %v2760_v11  ;;  %v2783_v57 = vadd.f32 %v2776_v62, %v2771_v43  ;;  %v4556_v22 = vld [vmem:[%s5871_s21 + $0x50] sm:$0xff]  }
 0xdca   : > { %4181 = vmatpush3.bf16.msra.mxu0 %v4555_v53 }
 0xdcb   : > { %2964 = vmatmul.mubr.bf16.gmra.mrb[56].mxu1 %v2787_v24  ;;  %v2784_v46 = vadd.f32 %v2776_v62, %v2772_v2  ;;  %4182 = vmatprep.subr.bf16.mxu0 %v4556_v22  ;;  %v4558_v62 = vld [vmem:[%s5871_s21 + $0x58] sm:$0xff]  }
 0xdcc   : > { %2973 = vmatprep.mubr.bf16.mxu1 %v4903_v44  ;;  %v4557_v44 = vld [vmem:[%s5871_s21 + $0x10] sm:$0xff]   ;;  %s4068_s21 = scalar_lea.vmem (!%p4016_p0), [#allocation3], %s6126_s18 }
 0xdcd   : > { %v2788_v10 = vpack.c.bf16 %v2784_v46, %v2783_v57 }
 0xdce   : > { %4183 = vmatpush3.bf16.msra.mxu0 %v4557_v44 }
 0xdcf   : > { %4184 = vmatprep.subr.bf16.mxu0 %v4558_v62 }
 0xdd2   : > { %4185 = vmatpush3.bf16.msra.mxu0 %v4559_v8 }
 0xdd3   : > { %2974 = vmatmul.mubr.bf16.gmra.mrb[60].mxu1 %v2788_v10  ;;  %4186 = vmatprep.subr.bf16.mxu0 %v4560_v16 }
 0xdd6   : > { %4187 = vmatpush3.bf16.msra.mxu0 %v4561_v45 }
 0xdd7   : > { %4188 = vmatprep.subr.bf16.mxu0 %v4562_v30 }
 0xdda   : > { %4189 = vmatpush3.bf16.msra.mxu0 %v4563_v31 }
 0xddb   : > { %4190 = vmatprep.subr.bf16.mxu0 %v4564_v54 }
 0xdde   : > { %4191 = vmatpush3.bf16.msra.mxu0 %v4565_v15 }
 0xddf   : > { %4192 = vmatprep.subr.bf16.mxu0 %v4566_v37 }
 0xde2   : > { %4193 = vmatpush3.bf16.msra.mxu0 %v4567_v42 }
 0xe8b   : > { %v2945_v12 = vpop.f32.mrb[48].mxu1 }
 0xe8c   : > { %v5976_v60 = vadd.f32 %v2945_v12, %v5970_v1  ;;  %v2947_v23 = vpop.f32.mrb[49].mxu1 }
 0xe8d   : > { %v5979_v39 = vadd.f32 %v2947_v23, %v5973_v20  ;;  %v2949_v25 = vpop.f32.mrb[50].mxu1 }
 0xe8e   : > { %v2984_v0 = vmul.f32 %v5976_v60, %v5976_v60  ;;  %v5984_v55 = vadd.f32 %v2949_v25, %v5970_v1  ;;  %v2951_v56 = vpop.f32.mrb[51].mxu1 }
 0xe8f   : > { %v2985_v32 = vmul.f32 %v5979_v39, %v5979_v39  ;;  %v5989_v26 = vadd.f32 %v2951_v56, %v5973_v20 }
 0xe90   : > { %v3000_v5 = vmul.f32 %v2984_v0, %v5976_v60  ;;  %v2986_v29 = vmul.f32 %v5984_v55, %v5984_v55 }
 0xe91   : > { %v3001_v13 = vmul.f32 %v2985_v32, %v5979_v39  ;;  %v2987_v48 = vmul.f32 %v5989_v26, %v5989_v26 }
 0xe92   : > { %v3016_v38 = vmul.f32 0.044715, %v3000_v5  ;;  %v3002_v19 = vmul.f32 %v2986_v29, %v5984_v55 }
 0xe93   : > { %v3017_v47 = vmul.f32 0.044715, %v3001_v13  ;;  %v3003_v17 = vmul.f32 %v2987_v48, %v5989_v26  ;;  %v2955_v50 = vpop.f32.mrb[52].mxu1 }
 0xe94   : > { %v3032_v36 = vadd.f32 %v3016_v38, %v5976_v60  ;;  %v3018_v41 = vmul.f32 0.044715, %v3002_v19  ;;  %v6001_v4 = vadd.f32 %v2955_v50, %v5970_v1  ;;  %v2957_v35 = vpop.f32.mrb[53].mxu1 }
 0xe95   : > { %v3033_v34 = vadd.f32 %v3017_v47, %v5979_v39  ;;  %v3019_v11 = vmul.f32 0.044715, %v3003_v17  ;;  %v6005_v24 = vadd.f32 %v2957_v35, %v5973_v20  ;;  %v2959_v2 = vpop.f32.mrb[54].mxu1 }
 0xe96   : > { %v3048_v43 = vmul.f32 0.7978846, %v3032_v36  ;;  %v3034_v46 = vadd.f32 %v3018_v41, %v5984_v55  ;;  %v2988_v57 = vmul.f32 %v6001_v4, %v6001_v4  ;;  %v6011_v10 = vadd.f32 %v2959_v2, %v5970_v1  ;;  %v2961_v9 = vpop.f32.mrb[55].mxu1 }
 0xe97   : > { %v3049_v59 = vmul.f32 0.7978846, %v3033_v34  ;;  %v3035_v21 = vadd.f32 %v3019_v11, %v5989_v26  ;;  %v2989_v53 = vmul.f32 %v6005_v24, %v6005_v24  ;;  %v6017_v22 = vadd.f32 %v2961_v9, %v5973_v20 }
 0xe98   : > { %4728 = vtanh.f32 %v3048_v43  ;;  %v3050_v44 = vmul.f32 0.7978846, %v3034_v46  ;;  %v3004_v62 = vmul.f32 %v2988_v57, %v6001_v4  ;;  %v2990_v8 = vmul.f32 %v6011_v10, %v6011_v10 }
 0xe99   : > { %4730 = vtanh.f32 %v3049_v59  ;;  %v3051_v16 = vmul.f32 0.7978846, %v3035_v21  ;;  %v3005_v45 = vmul.f32 %v2989_v53, %v6005_v24  ;;  %v2991_v30 = vmul.f32 %v6017_v22, %v6017_v22 }
 0xe9a   : > { %4732 = vtanh.f32 %v3050_v44  ;;  %v3020_v31 = vmul.f32 0.044715, %v3004_v62  ;;  %v3006_v54 = vmul.f32 %v2990_v8, %v6011_v10 }
 0xe9b   : > { %4734 = vtanh.f32 %v3051_v16  ;;  %v3021_v15 = vmul.f32 0.044715, %v3005_v45  ;;  %v3007_v37 = vmul.f32 %v2991_v30, %v6017_v22 }
 0xe9c   : > { %v3036_v42 = vadd.f32 %v3020_v31, %v6001_v4  ;;  %v3022_v63 = vmul.f32 0.044715, %v3006_v54 }
 0xe9d   : > { %v3037_v40 = vadd.f32 %v3021_v15, %v6005_v24  ;;  %v3023_v3 = vmul.f32 0.044715, %v3007_v37 }
 0xe9e   : > { %v3052_v49 = vmul.f32 0.7978846, %v3036_v42  ;;  %v3038_v12 = vadd.f32 %v3022_v63, %v6011_v10  ;;  %v2965_v23 = vpop.f32.mrb[56].mxu1 }
 0xe9f   : > { %v3053_v25 = vmul.f32 0.7978846, %v3037_v40  ;;  %v3039_v0 = vadd.f32 %v3023_v3, %v6017_v22  ;;  %v6032_v56 = vadd.f32 %v2965_v23, %v5970_v1  ;;  %v2967_v32 = vpop.f32.mrb[57].mxu1 }
 0xea0   : > { %v3054_v5 = vmul.f32 0.7978846, %v3038_v12  ;;  %v6035_v29 = vadd.f32 %v2967_v32, %v5973_v20  ;;  %v2969_v13 = vpop.f32.mrb[58].mxu1  ;;  %4736 = vtanh.f32 %v3052_v49 }
 0xea1   : > { %v3055_v48 = vmul.f32 0.7978846, %v3039_v0  ;;  %v2992_v38 = vmul.f32 %v6032_v56, %v6032_v56  ;;  %v6040_v19 = vadd.f32 %v2969_v13, %v5970_v1  ;;  %v2971_v47 = vpop.f32.mrb[59].mxu1  ;;  %4738 = vtanh.f32 %v3053_v25 }
 0xea2   : > { %v4729_v17 = vpop.eup %4728  ;;  %v2993_v50 = vmul.f32 %v6035_v29, %v6035_v29  ;;  %v6045_v36 = vadd.f32 %v2971_v47, %v5973_v20 }
 0xea3   : > { %v4731_v41 = vpop.eup %4730  ;;  %v3080_v35 = vadd.f32 1.0, %v4729_v17  ;;  %4740 = vtanh.f32 %v3055_v48  ;;  %v3008_v34 = vmul.f32 %v2992_v38, %v6032_v56  ;;  %v2994_v11 = vmul.f32 %v6040_v19, %v6040_v19 }
 0xea4   : > { %v4733_v2 = vpop.eup %4732  ;;  %4742 = vtanh.f32 %v3054_v5  ;;  %v3009_v43 = vmul.f32 %v2993_v50, %v6035_v29  ;;  %v2995_v46 = vmul.f32 %v6045_v36, %v6045_v36  ;;  %v3081_v57 = vadd.f32 1.0, %v4731_v41 }
 0xea5   : > { %v4735_v9 = vpop.eup %4734  ;;  %v3096_v59 = vmul.f32 0.5, %v3080_v35  ;;  %v3082_v21 = vadd.f32 1.0, %v4733_v2  ;;  %v3024_v53 = vmul.f32 0.044715, %v3008_v34  ;;  %v3010_v44 = vmul.f32 %v2994_v11, %v6040_v19 }
 0xea6   : > { %v3025_v62 = vmul.f32 0.044715, %v3009_v43  ;;  %v3011_v8 = vmul.f32 %v2995_v46, %v6045_v36  ;;  %v2975_v16 = vpop.f32.mrb[60].mxu1  ;;  %v3083_v45 = vadd.f32 1.0, %v4735_v9  ;;  %v3097_v30 = vmul.f32 0.5, %v3081_v57 }
 0xea7   : > { %v3112_v31 = vmul.f32 %v3096_v59, %v5976_v60  ;;  %v3098_v54 = vmul.f32 0.5, %v3082_v21  ;;  %v3040_v15 = vadd.f32 %v3024_v53, %v6032_v56  ;;  %v3026_v37 = vmul.f32 0.044715, %v3010_v44  ;;  %v2977_v42 = vpop.f32.mrb[61].mxu1 }
 0xea8   : > { %v3041_v63 = vadd.f32 %v3025_v62, %v6035_v29  ;;  %v3027_v40 = vmul.f32 0.044715, %v3011_v8  ;;  %v6059_v3 = vadd.f32 %v2975_v16, %v5970_v1  ;;  %v6062_v49 = vadd.f32 %v2977_v42, %v5973_v20  ;;  %v2979_v12 = vpop.f32.mrb[62].mxu1 }
 0xea9   : > { %v3114_v23 = vmul.f32 %v3098_v54, %v5984_v55  ;;  %v3056_v25 = vmul.f32 0.7978846, %v3040_v15  ;;  %v3042_v60 = vadd.f32 %v3026_v37, %v6040_v19  ;;  %v6067_v0 = vadd.f32 %v2979_v12, %v5970_v1  ;;  %v2981_v32 = vpop.f32.mrb[63].mxu1 }
 0xeaa   : > { %v3057_v5 = vmul.f32 0.7978846, %v3041_v63  ;;  %v3043_v13 = vadd.f32 %v3027_v40, %v6045_v36  ;;  %v2996_v48 = vmul.f32 %v6059_v3, %v6059_v3  ;;  %v2997_v38 = vmul.f32 %v6062_v49, %v6062_v49  ;;  %v4737_v47 = vpop.eup %4736 }
 0xeab   : > { %v3128_v17 = vpack.c.bf16 %v3114_v23, %v3112_v31  ;;  %4744 = vtanh.f32 %v3056_v25  ;;  %v3058_v55 = vmul.f32 0.7978846, %v3042_v60  ;;  %v2998_v50 = vmul.f32 %v6067_v0, %v6067_v0  ;;  %v4739_v41 = vpop.eup %4738 }
 0xeac   : > { %4746 = vtanh.f32 %v3057_v5  ;;  %v3059_v1 = vmul.f32 0.7978846, %v3043_v13  ;;  %v3012_v35 = vmul.f32 %v2996_v48, %v6059_v3  ;;  %v3013_v34 = vmul.f32 %v2997_v38, %v6062_v49 }
 0xead   : > { %v4741_v11 = vpop.eup %4740  ;;  %4748 = vtanh.f32 %v3058_v55  ;;  %v3014_v2 = vmul.f32 %v2998_v50, %v6067_v0  ;;  %v6080_v43 = vadd.f32 %v2981_v32, %v5973_v20  ;;  %v3099_v46 = vmul.f32 0.5, %v3083_v45 }
 0xeae   : > { %v4743_v57 = vpop.eup %4742  ;;  %4750 = vtanh.f32 %v3059_v1  ;;  %v3028_v9 = vmul.f32 0.044715, %v3012_v35  ;;  %v3029_v59 = vmul.f32 0.044715, %v3013_v34  ;;  %v3113_v21 = vmul.f32 %v3097_v30, %v5979_v39 }
 0xeaf   : > { %v3030_v53 = vmul.f32 0.044715, %v3014_v2  ;;  %v2999_v44 = vmul.f32 %v6080_v43, %v6080_v43  ;;  %v3115_v62 = vmul.f32 %v3099_v46, %v5989_v26  ;;  %v3085_v8 = vadd.f32 1.0, %v4739_v41 }
 0xeb0   : > { %v3044_v16 = vadd.f32 %v3028_v9, %v6059_v3  ;;  %v3045_v31 = vadd.f32 %v3029_v59, %v6062_v49  ;;  %v3087_v20 = vadd.f32 1.0, %v4741_v11  ;;  %v3084_v54 = vadd.f32 1.0, %v4737_v47 }
 0xeb1   : > { %v3046_v45 = vadd.f32 %v3030_v53, %v6067_v0  ;;  %v3015_v15 = vmul.f32 %v2999_v44, %v6080_v43  ;;  %v3129_v37 = vpack.c.bf16 %v3115_v62, %v3113_v21  ;;  %v3101_v42 = vmul.f32 0.5, %v3085_v8 }
 0xeb2   : > { %v3060_v39 = vmul.f32 0.7978846, %v3044_v16  ;;  %v3061_v30 = vmul.f32 0.7978846, %v3045_v31  ;;  %v3103_v63 = vmul.f32 0.5, %v3087_v20  ;;  %v3086_v40 = vadd.f32 1.0, %v4743_v57 }
 0xeb3   : > { %v3062_v12 = vmul.f32 0.7978846, %v3046_v45  ;;  %v3031_v23 = vmul.f32 0.044715, %v3015_v15  ;;  %3298 = vmatprep.mubr.bf16.mxu0 %v3129_v37  ;;  %v3100_v26 = vmul.f32 0.5, %v3084_v54  ;;  %v3117_v25 = vmul.f32 %v3101_v42, %v6005_v24 }
 0xeb4   : > { %4752 = vtanh.f32 %v3060_v39  ;;  %3299 = vmatmul.mubr.bf16.vlgmr.msra.gmra.mrb[48].mxu0 %v3128_v17  ;;  %v3119_v60 = vmul.f32 %v3103_v63, %v6017_v22  ;;  %v3102_v32 = vmul.f32 0.5, %v3086_v40  ;;  %v3340_v40 = vld [vmem:[%s3339_s19] sm:$0x1] }
 0xeb5   : > { %v4745_v5 = vpop.eup %4744  ;;  %4754 = vtanh.f32 %v3061_v30  ;;  %v3047_v13 = vadd.f32 %v3031_v23, %v6080_v43  ;;  %v3116_v48 = vmul.f32 %v3100_v26, %v6001_v4 }
 0xeb6   : > { %v4747_v38 = vpop.eup %4746  ;;  %4756 = vtanh.f32 %v3062_v12  ;;  %v3131_v47 = vpack.c.bf16 %v3119_v60, %v3117_v25  ;;  %v3118_v55 = vmul.f32 %v3102_v32, %v6011_v10  ;;  %v3088_v50 = vadd.f32 1.0, %v4745_v5 }
 0xeb7   : > { %v4749_v41 = vpop.eup %4748  ;;  %v3063_v1 = vmul.f32 0.7978846, %v3047_v13  ;;  %v3089_v17 = vadd.f32 1.0, %v4747_v38  ;;  %v3341_v12 = vunpack.c.l.bf16 %v3340_v40 }
 0xeb8   : > { %v4751_v35 = vpop.eup %4750  ;;  %3306 = vmatprep.mubr.bf16.mxu0 %v3131_v47  ;;  %v3130_v24 = vpack.c.bf16 %v3118_v55, %v3116_v48  ;;  %v3090_v22 = vadd.f32 1.0, %v4749_v41  ;;  %v3104_v34 = vmul.f32 0.5, %v3088_v50 }
 0xeb9   : > { %4758 = vtanh.f32 %v3063_v1  ;;  %v3091_v11 = vadd.f32 1.0, %v4751_v35  ;;  %v3105_v2 = vmul.f32 0.5, %v3089_v17 }
 0xeba   : > { %v3106_v46 = vmul.f32 0.5, %v3090_v22  ;;  %v3120_v4 = vmul.f32 %v3104_v34, %v6032_v56 }
 0xebb   : > { %v3107_v57 = vmul.f32 0.5, %v3091_v11  ;;  %v3121_v10 = vmul.f32 %v3105_v2, %v6035_v29 }
 0xebc   : > { %3307 = vmatmul.mubr.bf16.gmra.mrb[52].mxu0 %v3130_v24  ;;  %v3122_v9 = vmul.f32 %v3106_v46, %v6040_v19 }
 0xebd   : > { %v3123_v59 = vmul.f32 %v3107_v57, %v6045_v36 }
 0xebe   : > { %v4753_v21 = vpop.eup %4752  ;;  %v3132_v53 = vpack.c.bf16 %v3122_v9, %v3120_v4 }
 0xebf   : > { %v4755_v44 = vpop.eup %4754  ;;  %v3133_v62 = vpack.c.bf16 %v3123_v59, %v3121_v10  ;;  %v3092_v8 = vadd.f32 1.0, %v4753_v21 }
 0xec0   : > { %v4757_v16 = vpop.eup %4756  ;;  %v3093_v31 = vadd.f32 1.0, %v4755_v44 }
 0xec1   : > { %3314 = vmatprep.mubr.bf16.mxu0 %v3133_v62  ;;  %v3094_v20 = vadd.f32 1.0, %v4757_v16  ;;  %v3108_v54 = vmul.f32 0.5, %v3092_v8  ;;  %v4778_v16 = vld [vmem:[%s6325_s14] ss:$8 sps:$4 sm:$0xff] (!%p4016_p0)  }
 0xec2   : > { %v3109_v19 = vmul.f32 0.5, %v3093_v31  ;;  %v4907_v31 = vmov (!%p4016_p0), 0  }
 0xec3   : > { %v4759_v45 = vpop.eup %4758  ;;  %v3110_v15 = vmul.f32 0.5, %v3094_v20  ;;  %v3124_v29 = vmul.f32 %v3108_v54, %v6059_v3  ;;  %v4782_v20 = vld [vmem:[%s6325_s14 + $0x24] ss:$8 sps:$4 sm:$0xff] (!%p4016_p0)   ;;  %v4784_v54 = vld [vmem:[%s6325_s14 + $0x20] ss:$8 sps:$4 sm:$0xff] (!%p4016_p0)  }
 0xec4   : > { %3315 = vmatmul.mubr.bf16.gmra.mrb[56].mxu0 %v3132_v53  ;;  %v3095_v56 = vadd.f32 1.0, %v4759_v45  ;;  %v3125_v39 = vmul.f32 %v3109_v19, %v6062_v49  ;;  %v4785_v45 = vld [vmem:[%s6325_s14 + $0x34] ss:$8 sps:$4 sm:$0xff] (!%p4016_p0)   ;;  %v4790_v19 = vld [vmem:[%s6325_s14 + $0x40] ss:$8 sps:$4 sm:$0xff] (!%p4016_p0)  }
 0xec5   : > { %v3126_v36 = vmul.f32 %v3110_v15, %v6067_v0  ;;  %v3345_v0 = vrot.slane %v3341_v12, %v5169_v7  ;;  %v4787_v15 = vld [vmem:[%s6325_s14 + $0x30] ss:$8 sps:$4 sm:$0xff] (!%p4016_p0)  }
 0xec6   : > { %v3111_v37 = vmul.f32 0.5, %v3095_v56  ;;  %v4788_v56 = vld [vmem:[%s6325_s14 + $0x44] ss:$8 sps:$4 sm:$0xff] (!%p4016_p0)   ;;  %v4799_v12 = vld [vmem:[%s6325_s14 + $0x70] ss:$8 sps:$4 sm:$0xff] (!%p4016_p0)  }
 0xec7   : > { %v3134_v42 = vpack.c.bf16 %v3126_v36, %v3124_v29  ;;  %v4791_v29 = vld [vmem:[%s6325_s14 + $0x54] ss:$8 sps:$4 sm:$0xff] (!%p4016_p0)   ;;  %v4793_v36 = vld [vmem:[%s6325_s14 + $0x50] ss:$8 sps:$4 sm:$0xff] (!%p4016_p0)  }
 0xec8   : > { %v3127_v30 = vmul.f32 %v3111_v37, %v6080_v43  ;;  %v4794_v37 = vld [vmem:[%s6325_s14 + $0x64] ss:$8 sps:$4 sm:$0xff] (!%p4016_p0)  }
 0xeca   : > { %v3135_v63 = vpack.c.bf16 %v3127_v30, %v3125_v39  ;;  %v4796_v39 = vld [vmem:[%s6325_s14 + $0x60] ss:$8 sps:$4 sm:$0xff] (!%p4016_p0)  }
 0xecc   : > { %3322 = vmatprep.mubr.bf16.mxu0 %v3135_v63  ;;  %v4797_v63 = vld [vmem:[%s6325_s14 + $0x74] ss:$8 sps:$4 sm:$0xff] (!%p4016_p0)  }
 0xecd   : > { %3323 = vmatmul.mubr.bf16.gmra.mrb[60].mxu0 %v3134_v42 }
 0xece   : > { %3508 = vmatprep.mubr.bf16.mxu0 (!%p4016_p0), %v4907_v31  ;;  %v3836_v31 = vld [vmem:[#allocation9] sm:$0x3] (!%p4016_p0) }
 0xf87   : > { %v4194_v23 = vpop.f32.mrb[48].mxu0 }
 0xf88   : > { %v4195_v26 = vpop.f32.mrb[49].mxu0 }
 0xf89   : > { %v4196_v3 = vadd.f32 %v4195_v26, %v4194_v23  ;;  %v4197_v25 = vpop.f32.mrb[50].mxu0 }
 0xf8a   : > { %v4198_v60 = vpop.f32.mrb[51].mxu0 }
 0xf8b   : > { %v3331_v49 = vadd.f32 %v4196_v3, %v5834_v61  ;;  %v4199_v32 = vadd.f32 %v4198_v60, %v4197_v25 }
 0xf8d   : > { %v3346_v43 = vadd.f32 %v3345_v0, %v3331_v49  ;;  %v3332_v5 = vadd.f32 %v4199_v32, %v5836_v18 }
 0xf8f   : > { %3354 = vst [vmem:[#allocation3] sm:$0xff] %v3346_v43  ;;  %v3347_v13 = vadd.f32 %v3345_v0, %v3332_v5  ;;  %v4200_v48 = vpop.f32.mrb[52].mxu0  ;;  %v6176_v5 = vand.u32 (!%p4016_p0), 127, %v802_v51  ;;  %v4800_v51 = vld [vmem:[%s6326_s15 + $0x40] sm:$0xff] (!%p4016_p0)  }
 0xf90   : > { %v4201_v38 = vpop.f32.mrb[53].mxu0  ;;  %4218 = vmatprep.subr.bf16.mxu1 (!%p4016_p0), %v4800_v51 }
 0xf91   : > { %3355 = vst [vmem:[#allocation3 + $0x8] sm:$0xff] %v3347_v13  ;;  %v4202_v47 = vadd.f32 %v4201_v38, %v4200_v48  ;;  %v4203_v55 = vpop.f32.mrb[54].mxu0  ;;  %v6179_v13 = vadd.s32 (!%p4016_p0), 128, %v6176_v5 }
 0xf92   : > { %v4204_v50 = vpop.f32.mrb[55].mxu0 }
 0xf93   : > { %v3333_v41 = vadd.f32 %v4202_v47, %v5839_v52  ;;  %v4205_v1 = vadd.f32 %v4204_v50, %v4203_v55 }
 0xf95   : > { %v3348_v17 = vadd.f32 %v3345_v0, %v3333_v41  ;;  %v3334_v35 = vadd.f32 %v4205_v1, %v5843_v28 }
 0xf97   : > { %3356 = vst [vmem:[#allocation3 + $0x10] sm:$0xff] %v3348_v17  ;;  %v3349_v61 = vadd.f32 %v3345_v0, %v3334_v35  ;;  %v4206_v24 = vpop.f32.mrb[56].mxu0  ;;  %v4801_v35 = vld [vmem:[%s6326_s15] sm:$0xff] (!%p4016_p0)  }
 0xf98   : > { %v4207_v22 = vpop.f32.mrb[57].mxu0  ;;  %4219 = vmatpush3.bf16.msra.mxu1 (!%p4016_p0), %v4801_v35 }
 0xf99   : > { %3357 = vst [vmem:[#allocation3 + $0x18] sm:$0xff] %v3349_v61  ;;  %v4208_v18 = vadd.f32 %v4207_v22, %v4206_v24  ;;  %v4209_v34 = vpop.f32.mrb[58].mxu0  ;;  %v4802_v61 = vld [vmem:[%s6326_s15 + $0x48] sm:$0xff] (!%p4016_p0)   ;;  %v4804_v22 = vld [vmem:[%s6326_s15 + $0x50] sm:$0xff] (!%p4016_p0)  }
 0xf9a   : > { %v4210_v11 = vpop.f32.mrb[59].mxu0  ;;  %v4803_v24 = vld [vmem:[%s6326_s15 + $0x8] sm:$0xff] (!%p4016_p0)   ;;  %4220 = vmatprep.subr.bf16.mxu1 (!%p4016_p0), %v4802_v61 }
 0xf9b   : > { %v3335_v2 = vadd.f32 %v4208_v18, %v5846_v14  ;;  %v4211_v46 = vadd.f32 %v4210_v11, %v4209_v34  ;;  %v4805_v18 = vld [vmem:[%s6326_s15 + $0x10] sm:$0xff] (!%p4016_p0)   ;;  %v4806_v34 = vld [vmem:[%s6326_s15 + $0x58] sm:$0xff] (!%p4016_p0)  }
 0xf9c   : > { %4221 = vmatpush3.bf16.msra.mxu1 (!%p4016_p0), %v4803_v24  ;;  %v4807_v11 = vld [vmem:[%s6326_s15 + $0x18] sm:$0xff] (!%p4016_p0)  }
 0xf9d   : > { %v3350_v57 = vadd.f32 %v3345_v0, %v3335_v2  ;;  %v3336_v4 = vadd.f32 %v4211_v46, %v5848_v33  ;;  %v4776_v33 = vld [vmem:[%s6325_s14 + $0x4] ss:$8 sps:$4 sm:$0xff] (!%p4016_p0)   ;;  %4222 = vmatprep.subr.bf16.mxu1 (!%p4016_p0), %v4804_v22 }
 0xf9e   : > { %3476 = vmatprep.subr.bf16.mxu0 (!%p4016_p0), %v4776_v33  ;;  %v4808_v2 = vld [vmem:[%s6326_s15 + $0x60] sm:$0xff] (!%p4016_p0)  }
 0xf9f   : > { %3358 = vst [vmem:[#allocation3 + $0x20] sm:$0xff] %v3350_v57  ;;  %v3351_v52 = vadd.f32 %v3345_v0, %v3336_v4  ;;  %3477 = vmatpush1.bf16.msra.mxu0 (!%p4016_p0), %v4778_v16  ;;  %v4809_v46 = vld [vmem:[%s6326_s15 + $0x20] sm:$0xff] (!%p4016_p0)   ;;  %v4810_v57 = vld [vmem:[%s6326_s15 + $0x68] sm:$0xff] (!%p4016_p0)  }
 0xfa0   : > { %v4212_v9 = vpop.f32.mrb[60].mxu0  ;;  %4223 = vmatpush3.bf16.msra.mxu1 (!%p4016_p0), %v4805_v18  ;;  %v4811_v4 = vld [vmem:[%s6326_s15 + $0x28] sm:$0xff] (!%p4016_p0)  }
 0xfa1   : > { %3359 = vst [vmem:[#allocation3 + $0x28] sm:$0xff] %v3351_v52  ;;  %v4213_v10 = vpop.f32.mrb[61].mxu0  ;;  %4224 = vmatprep.subr.bf16.mxu1 (!%p4016_p0), %v4806_v34  ;;  %v4812_v52 = vld [vmem:[%s6326_s15 + $0x70] sm:$0xff] (!%p4016_p0)  }
 0xfa2   : > { %v4214_v28 = vadd.f32 %v4213_v10, %v4212_v9  ;;  %v4215_v59 = vpop.f32.mrb[62].mxu0 }
 0xfa3   : > { %v4216_v21 = vpop.f32.mrb[63].mxu0 }
 0xfa4   : > { %v3337_v53 = vadd.f32 %v4214_v28, %v5851_v27  ;;  %v4217_v44 = vadd.f32 %v4216_v21, %v4215_v59  ;;  %3365 = sbr.rel (%p4016_p0) target bundleno = 4923 (0x133b), region = 92  ;;  %v4779_v27 = vld [vmem:[%s6325_s14 + $0x14] ss:$8 sps:$4 sm:$0xff] (!%p4016_p0)   ;;  %4225 = vmatpush3.bf16.msra.mxu1 (!%p4016_p0), %v4807_v11 }
 0xfa5   : > { %3478 = vmatprep.subr.bf16.mxu0 (!%p4016_p0), %v4779_v27  ;;  %4226 = vmatprep.subr.bf16.mxu1 (!%p4016_p0), %v4808_v2  ;;  %v4813_v21 = vld [vmem:[%s6326_s15 + $0x30] sm:$0xff] (!%p4016_p0)  }
 0xfa6   : > { %v3352_v62 = vadd.f32 %v3345_v0, %v3337_v53  ;;  %v3338_v8 = vadd.f32 %v4217_v44, %v5854_v6  ;;  %v4781_v6 = vld [vmem:[%s6325_s14 + $0x10] ss:$8 sps:$4 sm:$0xff] (!%p4016_p0)  }
 0xfa7   : > { %3479 = vmatpush1.bf16.msra.mxu0 (!%p4016_p0), %v4781_v6  ;;  %v4814_v53 = vld [vmem:[%s6326_s15 + $0x78] sm:$0xff] (!%p4016_p0)  }
 0xfa8   : > { %3360 = vst [vmem:[#allocation3 + $0x30] sm:$0xff] %v3352_v62  ;;  %v3353_v14 = vadd.f32 %v3345_v0, %v3338_v8  ;;  %3480 = vmatprep.subr.bf16.mxu0 (!%p4016_p0), %v4782_v20  ;;  %4227 = vmatpush3.bf16.msra.mxu1 (!%p4016_p0), %v4809_v46  ;;  %v4815_v44 = vld [vmem:[%s6326_s15 + $0x38] sm:$0xff] (!%p4016_p0)   ;;  %v3834_v8 = vstv (!%p4016_p0), %s4886_s27  ;;  %v4908_v20 = vmov (!%p4016_p0), 1.0|1.0   ;;  %s3780_s27 = sadd.s32 (!%p4016_p0), 32, %s6134_s23 }
 0xfa9   : > { %4228 = vmatprep.subr.bf16.mxu1 (!%p4016_p0), %v4810_v57  ;;  %vm3835_vm8 = vcmp.eq.s32.totalorder (!%p4016_p0), %v6176_v5, %v3834_v8 }
 0xfaa   : > { %3361 = vst [vmem:[#allocation3 + $0x38] sm:$0xff] %v3353_v14 }
 0xfab   : > { %3481 = vmatpush1.bf16.msra.mxu0 %v4784_v54 }
 0xfac   : > { %3482 = vmatprep.subr.bf16.mxu0 %v4785_v45  ;;  %4229 = vmatpush3.bf16.msra.mxu1 %v4811_v4  ;;  %v3743_v45 = vstv %s6126_s18 }
 0xfad   : > { %4230 = vmatprep.subr.bf16.mxu1 %v4812_v52  ;;  %vm3744_vm9 = vcmp.eq.s32.totalorder %v5162_v58, %v3743_v45 }
 0xfaf   : > { %3483 = vmatpush1.bf16.msra.mxu0 %v4787_v15 }
 0xfb0   : > { %3484 = vmatprep.subr.bf16.mxu0 %v4788_v56  ;;  %4231 = vmatpush3.bf16.msra.mxu1 %v4813_v21  ;;  %v3728_v56 = vadd.s32 8, %v5162_v58 }
 0xfb1   : > { %v4020_v42 = vld [vmem:[%s3882_s22 + $0x1f] sm:$0x1]  ;;  %4232 = vmatprep.subr.bf16.mxu1 %v4814_v53 }
 0xfb2   : > { %v3375_v30 = vrot.slane %v4020_v42, 7  ;;  %v4070_v40 = vld [vmem:[%s4068_s21 - $0x1] sm:$0x1]  ;;  %v3732_v42 = vadd.s32 40, %v5162_v58  ;;  %vm3745_vm3 = vcmp.eq.s32.totalorder %v3728_v56, %v3743_v45 }
 0xfb3   : > { %3485 = vmatpush1.bf16.msra.mxu0 %v4790_v19  ;;  %v3729_v19 = vadd.s32 16, %v5162_v58 }
 0xfb4   : > { %3486 = vmatprep.subr.bf16.mxu0 %v4791_v29  ;;  %v3378_v23 = vsel %vm3377_vm6, %v4070_v40, %v3375_v30  ;;  %4233 = vmatpush3.bf16.msra.mxu1 %v4815_v44  ;;  %v3733_v30 = vadd.s32 48, %v5162_v58 }
 0xfb5   : > { %v3379_v26 = vpack.c.bf16 %v3378_v23, %v3378_v23  ;;  %vm3746_vm4 = vcmp.eq.s32.totalorder %v3729_v19, %v3743_v45 }
 0xfb7   : > { %3487 = vmatpush1.bf16.msra.mxu0 %v4793_v36  ;;  %v3730_v36 = vadd.s32 24, %v5162_v58 }
 0xfb8   : > { %3488 = vmatprep.subr.bf16.mxu0 %v4794_v37  ;;  %v3731_v37 = vadd.s32 32, %v5162_v58 }
 0xfb9   : > { %vm3747_vm5 = vcmp.eq.s32.totalorder %v3730_v36, %v3743_v45 }
 0xfba   : > { %vm3748_vm6 = vcmp.eq.s32.totalorder %v3731_v37, %v3743_v45 }
 0xfbb   : > { %3489 = vmatpush1.bf16.msra.mxu0 %v4796_v39 }
 0xfbc   : > { %3490 = vmatprep.subr.bf16.mxu0 %v4797_v63  ;;  %v3734_v63 = vadd.s32 56, %v5162_v58 }
 0xfbf   : > { %3491 = vmatpush1.bf16.msra.mxu0 %v4799_v12  ;;  %v3781_v12 = vstv %s3780_s27 }
 0xfc2   : > { %3509 = vmatmul.mubr.bf16.vlgmr.msra.gmra.mrb[0].mxu0 %v3379_v26  ;;  %v3808_v26 = vsub.s32 1, %v5162_v58 }
0x1095   : > { %v3510_v3 = vpop.f32.mrb[0].mxu0 }
0x1096   : > { %v3512_v0 = vpop.f32.mrb[1].mxu0  ;;  %v3521_v25 = vsel %vm3520_vm10, %v3510_v3, -inf }
0x1097   : > { %v3514_v60 = vpop.f32.mrb[2].mxu0  ;;  %v3522_v49 = vsel %vm3520_vm10, %v3512_v0, -inf }
0x1098   : > { %v3515_v32 = vpop.f32.mrb[3].mxu0  ;;  %v3523_v43 = vmax.f32 %v3521_v25, %v3522_v49  ;;  %v3736_v25 = vld [vmem:[#allocation2 + $0x8] sm:$0xff]  ;;  %v3737_v60 = vld [vmem:[#allocation2 + $0x10] sm:$0xff]  ;;  %v3738_v49 = vld [vmem:[#allocation2 + $0x18] sm:$0xff] }
0x1099   : > { %v3739_v32 = vld [vmem:[#allocation2 + $0x20] sm:$0xff] }
0x109a   : > { %3524 = vmax.xlane.f32.xlu0 %v3523_v43  ;;  %v3740_v43 = vld [vmem:[#allocation2 + $0x28] sm:$0xff] }
0x1127   : > { %v3525_v48 = vpop.xlane.xlu0 %3524 }
0x1128   : > { %vm3526_vm11 = vcmp.eq.f32.partialorder %v3510_v3, %v3525_v48  ;;  %vm3527_vm12 = vcmp.eq.f32.partialorder %v3512_v0, %v3525_v48  ;;  %v3735_v0 = vld [vmem:[#allocation2] sm:$0xff] }
0x1129   : > { %v3528_v38 = vsel %vm3526_vm11, %v6176_v5, 256  ;;  %v3529_v47 = vsel %vm3527_vm12, %v6179_v13, 256  ;;  %vm3750_vm11 = vcmp.eq.s32.totalorder %v3733_v30, %v3743_v45  ;;  %vm3751_vm12 = vcmp.eq.s32.totalorder %v3734_v63, %v3743_v45 }
0x112a   : > { %v3530_v55 = vsel %vm3520_vm10, %v3528_v38, 2147483647  ;;  %v3531_v50 = vsel %vm3520_vm10, %v3529_v47, 2147483647  ;;  %vm3749_vm10 = vcmp.eq.s32.totalorder %v3732_v42, %v3743_v45 }
0x112b   : > { %vm3532_vm1 = vcmp.lt.s32.totalorder %v3530_v55, %v3531_v50 }
0x112c   : > { %v3533_v41 = vsel %vm3532_vm1, %v3530_v55, %v3531_v50  ;;  %vm3782_vm1 = vcmp.eq.s32.totalorder %v5162_v58, %v3781_v12 }
0x112d   : > { %v3535_v1 = vshra.s32 %v3533_v41, 16  ;;  %v3534_v9 = vand.u32 65535, %v3533_v41 }
0x112f   : > { %v3537_v17 = vcvt.s32.f32 %v3535_v1  ;;  %v3536_v28 = vcvt.s32.f32 %v3534_v9 }
0x1131   : > { %3538 = vmin.xlane.f32.xlu0 %v3537_v17 }
0x11be   : > { %v3539_v10 = vpop.xlane.xlu0 %3538 }
0x11bf   : > { %vm3540_vm13 = vcmp.eq.f32.partialorder %v3537_v17, %v3539_v10  ;;  %v3545_v62 = vcvt.f32.s32 %v3539_v10 }
0x11c0   : > { %v3541_v59 = vsel %vm3540_vm13, %v3536_v28, inf  ;;  %vm3783_vm13 = vcmp.eq.s32.totalorder %v3728_v56, %v3781_v12 }
0x11c1   : > { %3542 = vmin.xlane.f32.xlu1 %v3541_v59  ;;  %v3546_v33 = vshll.u32 %v3545_v62, 16 }
0x124e   : > { %v3543_v14 = vpop.xlane.xlu1 %3542 }
0x124f   : > { %v3544_v16 = vcvt.f32.s32 %v3543_v14 }
0x1251   : > { %v3547_v27 = vadd.s32 %v3546_v33, %v3544_v16 }
0x1253   : > { %v3837_v6 = vsel %vm3835_vm8, %v3547_v27, %v3836_v31  ;;  %vm3549_vm15 = vcmp.eq.s32.totalorder %v6179_v13, %v3547_v27  ;;  %vm3548_vm0 = vcmp.eq.s32.totalorder %v6176_v5, %v3547_v27  ;;  %v3741_v5 = vld [vmem:[#allocation2 + $0x30] sm:$0xff]  ;;  %v3742_v13 = vld [vmem:[#allocation2 + $0x38] sm:$0xff]  ;;  %vm3784_vm8 = vcmp.eq.s32.totalorder %v3729_v19, %v3781_v12 }
0x1254   : > { %3839 = vst.msk [vmem:[#allocation9] sm:$0x3] %vm3838_vm14, %v3837_v6  ;;  %vm4055_vm2 = vmpackc.low %vm3549_vm15, %vm3549_vm15  ;;  %vm3785_vm14 = vcmp.eq.s32.totalorder %v3730_v36, %v3781_v12  ;;  %vm3786_vm15 = vcmp.eq.s32.totalorder %v3731_v37, %v3781_v12 }
0x1255   : > { %4056 = vmatprep.mubr.msk.bf16.mxu1 %vm4055_vm2, %v4908_v20  ;;  %vm4057_vm7 = vmpackc.low %vm3548_vm0, %vm3548_vm0  ;;  %vm3787_vm0 = vcmp.eq.s32.totalorder %v3732_v42, %v3781_v12  ;;  %vm3788_vm2 = vcmp.eq.s32.totalorder %v3733_v30, %v3781_v12 }
0x1256   : > { %4058 = vmatmul.mubr.msk.bf16.vlgmr.msra.gmra.mrb[0].mxu1 %vm4057_vm7, %v4908_v20  ;;  %vm3789_vm7 = vcmp.eq.s32.totalorder %v3734_v63, %v3781_v12 }
0x1329   : > { %v4234_v54 = vpop.f32.mrb[0].mxu1 }
0x132a   : > { %v4235_v15 = vpop.f32.mrb[1].mxu1 }
0x132b   : > { %v4236_v29 = vadd.f32 %v4235_v15, %v4234_v54  ;;  %v4237_v39 = vpop.f32.mrb[2].mxu1 }
0x132c   : > { %v4238_v40 = vpop.f32.mrb[3].mxu1 }
0x132d   : > { %v3724_v23 = vpack.c.bf16 %v4236_v29, %v4236_v29 }
0x132f   : > { %v3725_v3 = vunpack.c.l.bf16 %v3724_v23 }
0x1331   : > { %v3771_v48 = vrot.slane %v3725_v3, %v5169_v7  ;;  %v3809_v38 = vrot.slane %v3725_v3, %v3808_v26 }
0x1333   : > { %v3772_v47 = vsel %vm3744_vm9, %v3771_v48, %v3735_v0  ;;  %v3773_v55 = vsel %vm3745_vm3, %v3771_v48, %v3736_v25  ;;  %v3774_v50 = vsel %vm3746_vm4, %v3771_v48, %v3737_v60  ;;  %v3775_v41 = vsel %vm3747_vm5, %v3771_v48, %v3738_v49 }
0x1334   : > { %v3776_v1 = vsel %vm3748_vm6, %v3771_v48, %v3739_v32  ;;  %v3777_v7 = vsel %vm3749_vm10, %v3771_v48, %v3740_v43  ;;  %v3778_v17 = vsel %vm3750_vm11, %v3771_v48, %v3741_v5  ;;  %v3779_v51 = vsel %vm3751_vm12, %v3771_v48, %v3742_v13 }
0x1335   : > { %v3810_v35 = vsel %vm3782_vm1, %v3809_v38, %v3772_v47  ;;  %v3811_v61 = vsel %vm3783_vm13, %v3809_v38, %v3773_v55  ;;  %v3812_v24 = vsel %vm3784_vm8, %v3809_v38, %v3774_v50  ;;  %v3813_v22 = vsel %vm3785_vm14, %v3809_v38, %v3775_v41 }
0x1336   : > { %v3814_v18 = vsel %vm3786_vm15, %v3809_v38, %v3776_v1  ;;  %v3815_v34 = vsel %vm3787_vm0, %v3809_v38, %v3777_v7  ;;  %v3816_v11 = vsel %vm3788_vm2, %v3809_v38, %v3778_v17  ;;  %v3817_v2 = vsel %vm3789_vm7, %v3809_v38, %v3779_v51  ;;  %3818 = vst [vmem:[#allocation2] sm:$0xff] %v3810_v35 }
0x1337   : > { %3819 = vst [vmem:[#allocation2 + $0x8] sm:$0xff] %v3811_v61  ;;  %3820 = vst [vmem:[#allocation2 + $0x10] sm:$0xff] %v3812_v24 }
0x1338   : > { %3821 = vst [vmem:[#allocation2 + $0x18] sm:$0xff] %v3813_v22  ;;  %3822 = vst [vmem:[#allocation2 + $0x20] sm:$0xff] %v3814_v18 }
0x1339   : > { %3823 = vst [vmem:[#allocation2 + $0x28] sm:$0xff] %v3815_v34  ;;  %3824 = vst [vmem:[#allocation2 + $0x30] sm:$0xff] %v3816_v11 }
0x133a   : > { %3825 = vst [vmem:[#allocation2 + $0x38] sm:$0xff] %v3817_v2 }
0x133b PF: > { %s6342_s18 = sadd.s32 4294967295, %s4898_s30   ;;  %s4909_s22 = smov [#allocation9]  }
0x133c   : > { %p6270_p1 = scmp.eq.s32.totalorder %s6342_s18, 7  ;;  %s3847_s2 = sshll.u32 %s4909_s22, 4  ;;  %s3848_s2 = int_to_ptr.vmem [resolvable:$true] %s3847_s2 }
0x133d   : > { %s4828_s24 = scalar_lea.vmem %s3848_s2, 32  ;;  %p4835_p5 = scmp.lt.s32.totalorder %s3848_s2, %s3848_s2 }
0x133e   : > { %p4829_p2 = scmp.ne.s32.totalorder %s3848_s2, %s4828_s24  ;;  %p4836_p6 = scmp.lt.s32.totalorder %s4828_s24, %s4828_s24 }
0x1340   : > { %p4830_p3 = pnand %p4829_p2, %p6270_p1  ;;  %p4837_p7 = por %p4836_p6, %p4835_p5 }
0x1342   : > { %p4831_p4 = pneg %p4830_p3 }
0x1344   : > { %p4838_p8 = pnand %p4837_p7, %p4831_p4 }
0x1346   : > { %4841 = shalt.err (!%p4838_p8)
}
0x1347   : > { %s4842_s21 = scalar_lea.hbm %s6327_s16, 32 }
0x1348   : > { %p4843_p9 = scmp.ne.s32.totalorder %s6327_s16, %s4842_s21  ;;  %p4848_p12 = scmp.lt.u32.totalorder %s4842_s21, %s6327_s16 }
0x134a   : > { %p4844_p10 = pnand %p4843_p9, %p6270_p1 }
0x134c   : > { %p4845_p11 = pneg %p4844_p10 }
0x134e   : > { %p4850_p13 = pnand %p4848_p12, %p4845_p11 }
0x1350   : > { %4853 = shalt.err (!%p4850_p13)
}
0x1351   : > { %4433 = dma.vmem_to_hbm [thread:$0]  (%p6270_p1), %s3848_s2, 32, %s6327_s16, [#allocation10]  }
0x1352   : > { %4877 = dma.done.wait (%p6270_p1), [#allocation10], 32  }
0x1353   : > { %4879 = vsyncadd (%p6270_p1), [#allocation10], 4294967264 }
0x1354 PF: > { %s33_s30 = sadd.s32 1, %s4898_s30   ;;  %s6344_s26 = smov %s4890_s28 }
0x1355   : > { %p30_p0 = scmp.ge.s32.totalorder %s33_s30, 10   ;;  %s6345_s27 = smov %s4894_s29 }
0x1356   : > { %s6346_s28 = smov %s6349_s0  ;;  %s6347_s29 = smov %s6353_s17 }
0x1357   :  { %32 = sbr.rel (!%p30_p0) target bundleno = 25 (0x19), region = 134 }
0x135e   :  { %3860 = vsyncpa [#allocation10], 1 }
0x135f   :  { %3862 = vsyncpa [#allocation10 + $0x1], 1 }

</bundles_post_ra>
